<compile_context>
chip_gen: v6e
topology: v6e:2x2x1
jax: 0.10.0
libtpu: 0.0.40
codegen_flags: <defaults>
</compile_context>

<pallas_src>
import functools

import numpy as np
import jax
import jax.numpy as jnp
from jax import lax
from jax.experimental import pallas as pl
from jax.experimental.pallas import tpu as pltpu


# ----------------------------------------------------------------------------
# Pallas kernel: fused L-layer bidirectional GRU stack, single invocation.
# ----------------------------------------------------------------------------
def _encoder_kernel(*refs, L, T, B, H):
    """Ref layout (positional, in order):
      inputs : x (T*B, E) f32, h0 (2L, B, H) f32,
               then per layer l: w_ih (bf16; layer 0: (E,6H), else (2,H,6H)),
                                 w_hh (2H, 6H) f32 block-diagonal,
                                 b_i  (1, 6H) f32  (b_ih + folded b_hh{r,z}),
                                 b_hn (1, 2H) f32
      outputs: y (T*B, H) f32 (fwd+bwd summed), hn (2L, B, H) f32
      scratch: gi (T*B, 6H) f32, act_f (T*B, H) f32, act_b (T*B, H) f32
    """
    f32 = jnp.float32
    bf16 = jnp.bfloat16

    x_ref, h0_ref = refs[0], refs[1]
    lrefs = refs[2:2 + 4 * L]
    y_ref, hn_ref = refs[2 + 4 * L], refs[3 + 4 * L]
    gi_scr = refs[4 + 4 * L]
    actf_scr = refs[5 + 4 * L]
    actb_scr = refs[6 + 4 * L]

    unroll = True if T <= 16 else 4

    for l in range(L):
        w_ih_ref, w_hh_ref, b_i_ref, b_hn_ref = lrefs[4 * l:4 * l + 4]
        last = l == L - 1

        # ---- 1. Input projection for the whole sequence, both directions,
        #         hoisted out of the recurrence (bf16 operands, f32 acc),
        #         written straight into the single (T*B, 6H) gate scratch. ----
        if l == 0:
            gi = jnp.dot(x_ref[...].astype(bf16), w_ih_ref[...],
                         preferred_element_type=f32)
        else:
            # Previous layer's output is stored direction-major (lane-dense),
            # so the 2H-wide contraction is two H-wide dots summed.
            gi = (jnp.dot(actf_scr[...].astype(bf16), w_ih_ref[0],
                          preferred_element_type=f32)
                  + jnp.dot(actb_scr[...].astype(bf16), w_ih_ref[1],
                            preferred_element_type=f32))
        gi_scr[...] = gi + b_i_ref[...]       # b_hh{r,z} already folded in

        # ---- 2. Loop-invariant recurrent operands (hoisted out of the loop).
        w_hh = w_hh_ref[...]                                   # (2H, 6H) f32
        b_hn = b_hn_ref[...]                                   # (1, 2H)
        bhn_f = jnp.broadcast_to(b_hn[:, 0:H], (B, H))
        bhn_b = jnp.broadcast_to(b_hn[:, H:2 * H], (B, H))

        # ---- 3. Sequential recurrence; fwd + bwd share ONE per-step matmul
        #         via the block-diagonal W_hh.  PyTorch gate order (r, z, n);
        #         n uses r * (W_hn h + b_hn). ----
        def step(t, carry, last=last, w_hh=w_hh, bhn_f=bhn_f, bhn_b=bhn_b):
            h_f, h_b = carry
            rows_f = pl.ds(pl.multiple_of(t * B, B), B)            # time t
            rows_b = pl.ds(pl.multiple_of((T - 1 - t) * B, B), B)  # time T-1-t

            h_cat = jnp.concatenate([h_f, h_b], axis=1)            # (B, 2H)
            gh = jnp.dot(h_cat, w_hh, preferred_element_type=f32)  # (B, 6H)

            gi_f = gi_scr[rows_f, 0:3 * H]                         # (B, 3H)
            gi_b = gi_scr[rows_b, 3 * H:6 * H]                     # (B, 3H)

            # forward direction (time t)
            rz_f = jax.nn.sigmoid(gi_f[:, 0:2 * H] + gh[:, 0:2 * H])
            n_f = jnp.tanh(gi_f[:, 2 * H:3 * H]
                           + rz_f[:, 0:H] * (gh[:, 2 * H:3 * H] + bhn_f))
            z_f = rz_f[:, H:2 * H]
            h_f = (1.0 - z_f) * n_f + z_f * h_f

            # backward direction (time T-1-t)
            rz_b = jax.nn.sigmoid(gi_b[:, 0:2 * H] + gh[:, 3 * H:5 * H])
            n_b = jnp.tanh(gi_b[:, 2 * H:3 * H]
                           + rz_b[:, 0:H] * (gh[:, 5 * H:6 * H] + bhn_b))
            z_b = rz_b[:, H:2 * H]
            h_b = (1.0 - z_b) * n_b + z_b * h_b

            # Write outputs straight from the loop.  Only the last layer's
            # bwd half needs staging (its fwd counterpart row may not have
            # been written yet, so it cannot be summed in place).
            if last:
                y_ref[rows_f, :] = h_f
                actb_scr[rows_b, :] = h_b
            else:
                actf_scr[rows_f, :] = h_f
                actb_scr[rows_b, :] = h_b
            return (h_f, h_b)

        h_f, h_b = lax.fori_loop(0, T, step,
                                 (h0_ref[2 * l], h0_ref[2 * l + 1]),
                                 unroll=unroll)
        hn_ref[2 * l] = h_f
        hn_ref[2 * l + 1] = h_b

    # ---- 4. Last layer: outputs[:, :, :H] + outputs[:, :, H:]. ----
    y_ref[...] = y_ref[...] + actb_scr[...]


# ----------------------------------------------------------------------------
# One-time parameter preparation (weight fusion / casting hoisted out of the
# forward call, per the performance review).
# ----------------------------------------------------------------------------
def prepare_params(params):
    H = params["hidden_size"]
    L = params["n_layers"]
    layers = []
    zeros_h = jnp.zeros((1, H), jnp.float32)
    for l, lp in enumerate(params["layers"]):
        # Fold the r/z halves of b_hh into the input-projection bias; b_hn
        # must stay separate because n = tanh(gi_n + r * (W_hn h + b_hn)).
        fold_f = jnp.concatenate([lp["b_hh_f"][:, :2 * H], zeros_h], axis=1)
        fold_b = jnp.concatenate([lp["b_hh_b"][:, :2 * H], zeros_h], axis=1)
        b_i = jnp.concatenate([lp["b_ih_f"] + fold_f,
                               lp["b_ih_b"] + fold_b], axis=1)        # (1, 6H)
        b_hn = jnp.concatenate([lp["b_hh_f"][:, 2 * H:],
                                lp["b_hh_b"][:, 2 * H:]], axis=1)     # (1, 2H)

        # Block-diagonal recurrent weight: [h_f | h_b] @ W -> [gh_f | gh_b].
        # Kept in f32: the per-step matmul is tiny and latency-bound, and f32
        # avoids compounding bf16 rounding through T sequential steps.
        w_hh = jnp.zeros((2 * H, 6 * H), jnp.float32)
        w_hh = w_hh.at[:H, :3 * H].set(lp["w_hh_f"])
        w_hh = w_hh.at[H:, 3 * H:].set(lp["w_hh_b"])

        # Fused input weights [fwd 3H | bwd 3H], bf16 for the hoisted MXU dot.
        w_full = jnp.concatenate([lp["w_ih_f"], lp["w_ih_b"]], axis=1)
        if l == 0:
            w_ih = w_full.astype(jnp.bfloat16)                        # (E, 6H)
        else:
            # Direction-major split of the 2H input rows, matching the
            # direction-major (lane-dense) inter-layer activation slabs.
            w_ih = jnp.stack([w_full[:H, :], w_full[H:, :]],
                             axis=0).astype(jnp.bfloat16)             # (2, H, 6H)

        layers.append({"w_ih": w_ih, "w_hh": w_hh, "b_i": b_i, "b_hn": b_hn})

    return {
        "embedding": params["embedding"],
        "hidden_size": H,
        "n_layers": L,
        "layers": layers,
    }


# ----------------------------------------------------------------------------
# Wrapper: embedding lookup (plain-JAX gather) + one fused Pallas kernel.
# ----------------------------------------------------------------------------
def encoder_forward(prepared, input_seqs, hidden=None):
    emb = prepared["embedding"]                    # (V, E)
    H = prepared["hidden_size"]
    L = prepared["n_layers"]
    T, B = input_seqs.shape

    # Embedding lookup (device-side gather) + time*batch flatten (free).
    x = jnp.take(emb, input_seqs, axis=0).reshape(T * B, -1)

    if hidden is None:
        hidden = jnp.zeros((2 * L, B, H), jnp.float32)

    weight_args = []
    for lp in prepared["layers"]:
        weight_args += [lp["w_ih"], lp["w_hh"], lp["b_i"], lp["b_hn"]]

    y, hn = pl.pallas_call(
        functools.partial(_encoder_kernel, L=L, T=T, B=B, H=H),
        out_shape=(
            jax.ShapeDtypeStruct((T * B, H), jnp.float32),     # summed outputs
            jax.ShapeDtypeStruct((2 * L, B, H), jnp.float32),  # final hidden
        ),
        scratch_shapes=[
            pltpu.VMEM((T * B, 6 * H), jnp.float32),   # input-projection gates
            pltpu.VMEM((T * B, H), jnp.float32),       # fwd activations
            pltpu.VMEM((T * B, H), jnp.float32),       # bwd activations / stage
        ],
        compiler_params=pltpu.CompilerParams(
            # Raised above the 16/32 MiB scoped defaults; stays below v7x's
            # 64 MiB physical VMEM.  Bump further (up to ~100 MiB) on
            # v5e/v6e if T*B*H grows.
            vmem_limit_bytes=48 * 1024 * 1024),
    )(x, hidden, *weight_args)

    outputs = y.reshape(T, B, H)                   # already fwd + bwd summed
    return outputs, hn


# ----------------------------------------------------------------------------
# Pure-JAX (float32) reference mirroring the PyTorch forward, for validation.
# ----------------------------------------------------------------------------
def _ref_gru_direction(x, h0, w_ih, w_hh, b_ih, b_hh, reverse):
    T = x.shape[0]
    H = h0.shape[-1]
    h = h0
    outs = [None] * T
    order = range(T - 1, -1, -1) if reverse else range(T)
    for t in order:
        gi = x[t] @ w_ih + b_ih
        gh = h @ w_hh + b_hh
        r = jax.nn.sigmoid(gi[:, :H] + gh[:, :H])
        z = jax.nn.sigmoid(gi[:, H:2 * H] + gh[:, H:2 * H])
        n = jnp.tanh(gi[:, 2 * H:] + r * gh[:, 2 * H:])
        h = (1.0 - z) * n + z * h
        outs[t] = h
    return jnp.stack(outs, axis=0), h


def reference_forward(params, input_seqs, hidden=None):
    emb = params["embedding"]
    H = params["hidden_size"]
    L = params["n_layers"]
    T, B = input_seqs.shape
    x = jnp.take(emb, input_seqs, axis=0)
    if hidden is None:
        hidden = jnp.zeros((2 * L, B, H), jnp.float32)
    h_finals = []
    for l in range(L):
        lp = params["layers"][l]
        yf, hf = _ref_gru_direction(x, hidden[2 * l], lp["w_ih_f"],
                                    lp["w_hh_f"], lp["b_ih_f"], lp["b_hh_f"],
                                    reverse=False)
        yb, hb = _ref_gru_direction(x, hidden[2 * l + 1], lp["w_ih_b"],
                                    lp["w_hh_b"], lp["b_ih_b"], lp["b_hh_b"],
                                    reverse=True)
        x = jnp.concatenate([yf, yb], axis=-1)
        h_finals += [hf, hb]
    outputs = x[:, :, :H] + x[:, :, H:]
    return outputs, jnp.stack(h_finals, axis=0)


# ----------------------------------------------------------------------------
# Deterministic parameter construction (weights stored pre-transposed as
# (in_features, out_features) so both kernel and reference compute x @ W).
# ----------------------------------------------------------------------------
def make_params(key, V, E, H, L):
    keys = jax.random.split(key, 1 + 8 * L)
    std = 1.0 / np.sqrt(H)
    u = lambda k, shape: jax.random.uniform(k, shape, jnp.float32, -std, std)
    layers = []
    idx = 1
    for l in range(L):
        Din = E if l == 0 else 2 * H
        layers.append({
            "w_ih_f": u(keys[idx + 0], (Din, 3 * H)),
            "w_hh_f": u(keys[idx + 1], (H, 3 * H)),
            "b_ih_f": u(keys[idx + 2], (1, 3 * H)),
            "b_hh_f": u(keys[idx + 3], (1, 3 * H)),
            "w_ih_b": u(keys[idx + 4], (Din, 3 * H)),
            "w_hh_b": u(keys[idx + 5], (H, 3 * H)),
            "b_ih_b": u(keys[idx + 6], (1, 3 * H)),
            "b_hh_b": u(keys[idx + 7], (1, 3 * H)),
        })
        idx += 8
    return {
        "embedding": 0.5 * jax.random.normal(keys[0], (V, E), jnp.float32),
        "hidden_size": H,
        "n_layers": L,
        "layers": layers,
    }


if __name__ == "__main__":
    V, E, H, L = 64, 32, 32, 2      # vocab, embed, hidden, n_layers
    T, B = 8, 8                     # seq len, batch (B=8 keeps rows sublane-aligned)

    root = jax.random.PRNGKey(0)
    kp, kid = jax.random.split(root)
    params = make_params(kp, V, E, H, L)
    input_seqs = jax.random.randint(kid, (T, B), 0, V)

    prepared = prepare_params(params)               # one-time weight fusion
    outputs, hidden = encoder_forward(prepared, input_seqs)
    outputs, hidden = jax.block_until_ready((outputs, hidden))

    ref_out, ref_hid = reference_forward(params, input_seqs)

    # Tolerance covers the bf16-operand / f32-accumulate input projections
    # (recurrent matmul stays in f32) vs. the pure-f32 reference.
    np.testing.assert_allclose(np.asarray(outputs), np.asarray(ref_out),
                               rtol=2e-2, atol=2e-2, err_msg="outputs")
    np.testing.assert_allclose(np.asarray(hidden), np.asarray(ref_hid),
                               rtol=2e-2, atol=2e-2, err_msg="hidden")
    print("KERNEL_OK")
</pallas_src>

<mosaic_0001>
module attributes {stable_mosaic.version = 11 : i64} {
  func.func @_encoder_kernel(%arg0: memref<64x32xf32, #tpu.memory_space<vmem>>, %arg1: memref<4x8x32xf32, #tpu.memory_space<vmem>>, %arg2: memref<32x192xbf16, #tpu.memory_space<vmem>>, %arg3: memref<64x192xf32, #tpu.memory_space<vmem>>, %arg4: memref<1x192xf32, #tpu.memory_space<vmem>>, %arg5: memref<1x64xf32, #tpu.memory_space<vmem>>, %arg6: memref<2x32x192xbf16, #tpu.memory_space<vmem>>, %arg7: memref<64x192xf32, #tpu.memory_space<vmem>>, %arg8: memref<1x192xf32, #tpu.memory_space<vmem>>, %arg9: memref<1x64xf32, #tpu.memory_space<vmem>>, %arg10: memref<64x32xf32, #tpu.memory_space<vmem>>, %arg11: memref<4x8x32xf32, #tpu.memory_space<vmem>>, %arg12: memref<64x192xf32, #tpu.memory_space<vmem>>, %arg13: memref<64x32xf32, #tpu.memory_space<vmem>>, %arg14: memref<64x32xf32, #tpu.memory_space<vmem>>) attributes {dimension_semantics = [], scalar_prefetch = 0 : i64, scratch_operands = 3 : i64, tpu.core_type = #tpu.core_type<tc>} {
    %c0 = arith.constant 0 : index
    %c0_0 = arith.constant 0 : index
    %0 = vector.load %arg0[%c0, %c0_0] : memref<64x32xf32, #tpu.memory_space<vmem>>, vector<64x32xf32>
    %1 = arith.truncf %0 : vector<64x32xf32> to vector<64x32xbf16>
    %c0_1 = arith.constant 0 : index
    %c0_2 = arith.constant 0 : index
    %2 = vector.load %arg2[%c0_1, %c0_2] : memref<32x192xbf16, #tpu.memory_space<vmem>>, vector<32x192xbf16>
    %cst = arith.constant dense<0.000000e+00> : vector<64x192xf32>
    %3 = tpu.matmul %1, %2, %cst {dimension_numbers = #tpu.dot_dimension_numbers<[1], [0], [0], [1], [0, 0, 1, 1], [], []>} : vector<64x32xbf16>, vector<32x192xbf16>, vector<64x192xf32> -> vector<64x192xf32>
    %c0_3 = arith.constant 0 : index
    %c0_4 = arith.constant 0 : index
    %4 = vector.load %arg4[%c0_3, %c0_4] : memref<1x192xf32, #tpu.memory_space<vmem>>, vector<1x192xf32>
    %5 = vector.broadcast %4 : vector<1x192xf32> to vector<64x192xf32>
    %6 = arith.addf %3, %5 : vector<64x192xf32>
    %c0_5 = arith.constant 0 : index
    %c0_6 = arith.constant 0 : index
    %7 = vector.load %arg12[%c0_5, %c0_6] : memref<64x192xf32, #tpu.memory_space<vmem>>, vector<64x192xf32>
    tpu.vector_store %arg12[%c0_5, %c0_6], %6 {strides = array<i32>} : memref<64x192xf32, #tpu.memory_space<vmem>>, vector<64x192xf32>,
    %c0_7 = arith.constant 0 : index
    %c0_8 = arith.constant 0 : index
    %8 = vector.load %arg3[%c0_7, %c0_8] : memref<64x192xf32, #tpu.memory_space<vmem>>, vector<64x192xf32>
    %c0_9 = arith.constant 0 : index
    %c0_10 = arith.constant 0 : index
    %9 = vector.load %arg5[%c0_9, %c0_10] : memref<1x64xf32, #tpu.memory_space<vmem>>, vector<1x64xf32>
    %10 = vector.extract_strided_slice %9 {offsets = [0, 0], sizes = [1, 32], strides = [1, 1]} : vector<1x64xf32> to vector<1x32xf32>
    %11 = vector.shape_cast %10 : vector<1x32xf32> to vector<1x32xf32>
    %12 = vector.broadcast %11 : vector<1x32xf32> to vector<8x32xf32>
    %13 = vector.extract_strided_slice %9 {offsets = [0, 32], sizes = [1, 32], strides = [1, 1]} : vector<1x64xf32> to vector<1x32xf32>
    %14 = vector.shape_cast %13 : vector<1x32xf32> to vector<1x32xf32>
    %15 = vector.broadcast %14 : vector<1x32xf32> to vector<8x32xf32>
    %c0_11 = arith.constant 0 : index
    %c0_12 = arith.constant 0 : index
    %c0_13 = arith.constant 0 : index
    %16 = vector.load %arg1[%c0_11, %c0_12, %c0_13] : memref<4x8x32xf32, #tpu.memory_space<vmem>>, vector<1x8x32xf32>
    %17 = vector.shape_cast %16 : vector<1x8x32xf32> to vector<8x32xf32>
    %c1 = arith.constant 1 : index
    %c0_14 = arith.constant 0 : index
    %c0_15 = arith.constant 0 : index
    %18 = vector.load %arg1[%c1, %c0_14, %c0_15] : memref<4x8x32xf32, #tpu.memory_space<vmem>>, vector<1x8x32xf32>
    %19 = vector.shape_cast %18 : vector<1x8x32xf32> to vector<8x32xf32>
    %c0_i32 = arith.constant 0 : i32
    %c8_i32 = arith.constant 8 : i32
    %20 = arith.muli %c0_i32, %c8_i32 : i32
    %21 = tpu.assume_multiple %20, 8 : i32
    %c7_i32 = arith.constant 7 : i32
    %22 = arith.subi %c7_i32, %c0_i32 : i32
    %c8_i32_16 = arith.constant 8 : i32
    %23 = arith.muli %22, %c8_i32_16 : i32
    %24 = tpu.assume_multiple %23, 8 : i32
    %25 = tpu.concatenate %17, %19 in 1 : vector<8x32xf32>, vector<8x32xf32> -> vector<8x64xf32>
    %cst_17 = arith.constant dense<0.000000e+00> : vector<8x192xf32>
    %26 = tpu.matmul %25, %8, %cst_17 {dimension_numbers = #tpu.dot_dimension_numbers<[1], [0], [0], [1], [0, 0, 1, 1], [], []>} : vector<8x64xf32>, vector<64x192xf32>, vector<8x192xf32> -> vector<8x192xf32>
    %27 = arith.index_cast %21 : i32 to index
    %c0_18 = arith.constant 0 : index
    %28 = vector.load %arg12[%27, %c0_18] : memref<64x192xf32, #tpu.memory_space<vmem>>, vector<8x96xf32>
    %29 = arith.index_cast %24 : i32 to index
    %c96 = arith.constant 96 : index
    %30 = vector.load %arg12[%29, %c96] : memref<64x192xf32, #tpu.memory_space<vmem>>, vector<8x96xf32>
    %31 = vector.extract_strided_slice %28 {offsets = [0, 0], sizes = [8, 64], strides = [1, 1]} : vector<8x96xf32> to vector<8x64xf32>
    %32 = vector.extract_strided_slice %26 {offsets = [0, 0], sizes = [8, 64], strides = [1, 1]} : vector<8x192xf32> to vector<8x64xf32>
    %33 = arith.addf %31, %32 : vector<8x64xf32>
    %34 = arith.negf %33 : vector<8x64xf32>
    %35 = math.exp %34 : vector<8x64xf32>
    %cst_19 = arith.constant 1.000000e+00 : f32
    %36 = vector.broadcast %cst_19 : f32 to vector<8x64xf32>
    %37 = arith.addf %36, %35 : vector<8x64xf32>
    %38 = arith.divf %36, %37 : vector<8x64xf32>
    %39 = vector.extract_strided_slice %28 {offsets = [0, 64], sizes = [8, 32], strides = [1, 1]} : vector<8x96xf32> to vector<8x32xf32>
    %40 = vector.extract_strided_slice %38 {offsets = [0, 0], sizes = [8, 32], strides = [1, 1]} : vector<8x64xf32> to vector<8x32xf32>
    %41 = vector.extract_strided_slice %26 {offsets = [0, 64], sizes = [8, 32], strides = [1, 1]} : vector<8x192xf32> to vector<8x32xf32>
    %42 = arith.addf %41, %12 : vector<8x32xf32>
    %43 = arith.mulf %40, %42 : vector<8x32xf32>
    %44 = arith.addf %39, %43 : vector<8x32xf32>
    %45 = math.tanh %44 : vector<8x32xf32>
    %46 = vector.extract_strided_slice %38 {offsets = [0, 32], sizes = [8, 32], strides = [1, 1]} : vector<8x64xf32> to vector<8x32xf32>
    %cst_20 = arith.constant 1.000000e+00 : f32
    %47 = vector.broadcast %cst_20 : f32 to vector<8x32xf32>
    %48 = arith.subf %47, %46 : vector<8x32xf32>
    %49 = arith.mulf %48, %45 : vector<8x32xf32>
    %50 = arith.mulf %46, %17 : vector<8x32xf32>
    %51 = arith.addf %49, %50 : vector<8x32xf32>
    %52 = vector.extract_strided_slice %30 {offsets = [0, 0], sizes = [8, 64], strides = [1, 1]} : vector<8x96xf32> to vector<8x64xf32>
    %53 = vector.extract_strided_slice %26 {offsets = [0, 96], sizes = [8, 64], strides = [1, 1]} : vector<8x192xf32> to vector<8x64xf32>
    %54 = arith.addf %52, %53 : vector<8x64xf32>
    %55 = arith.negf %54 : vector<8x64xf32>
    %56 = math.exp %55 : vector<8x64xf32>
    %cst_21 = arith.constant 1.000000e+00 : f32
    %57 = vector.broadcast %cst_21 : f32 to vector<8x64xf32>
    %58 = arith.addf %57, %56 : vector<8x64xf32>
    %59 = arith.divf %57, %58 : vector<8x64xf32>
    %60 = vector.extract_strided_slice %30 {offsets = [0, 64], sizes = [8, 32], strides = [1, 1]} : vector<8x96xf32> to vector<8x32xf32>
    %61 = vector.extract_strided_slice %59 {offsets = [0, 0], sizes = [8, 32], strides = [1, 1]} : vector<8x64xf32> to vector<8x32xf32>
    %62 = vector.extract_strided_slice %26 {offsets = [0, 160], sizes = [8, 32], strides = [1, 1]} : vector<8x192xf32> to vector<8x32xf32>
    %63 = arith.addf %62, %15 : vector<8x32xf32>
    %64 = arith.mulf %61, %63 : vector<8x32xf32>
    %65 = arith.addf %60, %64 : vector<8x32xf32>
    %66 = math.tanh %65 : vector<8x32xf32>
    %67 = vector.extract_strided_slice %59 {offsets = [0, 32], sizes = [8, 32], strides = [1, 1]} : vector<8x64xf32> to vector<8x32xf32>
    %cst_22 = arith.constant 1.000000e+00 : f32
    %68 = vector.broadcast %cst_22 : f32 to vector<8x32xf32>
    %69 = arith.subf %68, %67 : vector<8x32xf32>
    %70 = arith.mulf %69, %66 : vector<8x32xf32>
    %71 = arith.mulf %67, %19 : vector<8x32xf32>
    %72 = arith.addf %70, %71 : vector<8x32xf32>
    %73 = arith.index_cast %21 : i32 to index
    %c0_23 = arith.constant 0 : index
    %74 = vector.load %arg13[%73, %c0_23] : memref<64x32xf32, #tpu.memory_space<vmem>>, vector<8x32xf32>
    tpu.vector_store %arg13[%73, %c0_23], %51 {strides = array<i32>} : memref<64x32xf32, #tpu.memory_space<vmem>>, vector<8x32xf32>,
    %75 = arith.index_cast %24 : i32 to index
    %c0_24 = arith.constant 0 : index
    %76 = vector.load %arg14[%75, %c0_24] : memref<64x32xf32, #tpu.memory_space<vmem>>, vector<8x32xf32>
    tpu.vector_store %arg14[%75, %c0_24], %72 {strides = array<i32>} : memref<64x32xf32, #tpu.memory_space<vmem>>, vector<8x32xf32>,
    %c1_i32 = arith.constant 1 : i32
    %c8_i32_25 = arith.constant 8 : i32
    %77 = arith.muli %c1_i32, %c8_i32_25 : i32
    %78 = tpu.assume_multiple %77, 8 : i32
    %c7_i32_26 = arith.constant 7 : i32
    %79 = arith.subi %c7_i32_26, %c1_i32 : i32
    %c8_i32_27 = arith.constant 8 : i32
    %80 = arith.muli %79, %c8_i32_27 : i32
    %81 = tpu.assume_multiple %80, 8 : i32
    %82 = tpu.concatenate %51, %72 in 1 : vector<8x32xf32>, vector<8x32xf32> -> vector<8x64xf32>
    %cst_28 = arith.constant dense<0.000000e+00> : vector<8x192xf32>
    %83 = tpu.matmul %82, %8, %cst_28 {dimension_numbers = #tpu.dot_dimension_numbers<[1], [0], [0], [1], [0, 0, 1, 1], [], []>} : vector<8x64xf32>, vector<64x192xf32>, vector<8x192xf32> -> vector<8x192xf32>
    %84 = arith.index_cast %78 : i32 to index
    %c0_29 = arith.constant 0 : index
    %85 = vector.load %arg12[%84, %c0_29] : memref<64x192xf32, #tpu.memory_space<vmem>>, vector<8x96xf32>
    %86 = arith.index_cast %81 : i32 to index
    %c96_30 = arith.constant 96 : index
    %87 = vector.load %arg12[%86, %c96_30] : memref<64x192xf32, #tpu.memory_space<vmem>>, vector<8x96xf32>
    %88 = vector.extract_strided_slice %85 {offsets = [0, 0], sizes = [8, 64], strides = [1, 1]} : vector<8x96xf32> to vector<8x64xf32>
    %89 = vector.extract_strided_slice %83 {offsets = [0, 0], sizes = [8, 64], strides = [1, 1]} : vector<8x192xf32> to vector<8x64xf32>
    %90 = arith.addf %88, %89 : vector<8x64xf32>
    %91 = arith.negf %90 : vector<8x64xf32>
    %92 = math.exp %91 : vector<8x64xf32>
    %cst_31 = arith.constant 1.000000e+00 : f32
    %93 = vector.broadcast %cst_31 : f32 to vector<8x64xf32>
    %94 = arith.addf %93, %92 : vector<8x64xf32>
    %95 = arith.divf %93, %94 : vector<8x64xf32>
    %96 = vector.extract_strided_slice %85 {offsets = [0, 64], sizes = [8, 32], strides = [1, 1]} : vector<8x96xf32> to vector<8x32xf32>
    %97 = vector.extract_strided_slice %95 {offsets = [0, 0], sizes = [8, 32], strides = [1, 1]} : vector<8x64xf32> to vector<8x32xf32>
    %98 = vector.extract_strided_slice %83 {offsets = [0, 64], sizes = [8, 32], strides = [1, 1]} : vector<8x192xf32> to vector<8x32xf32>
    %99 = arith.addf %98, %12 : vector<8x32xf32>
    %100 = arith.mulf %97, %99 : vector<8x32xf32>
    %101 = arith.addf %96, %100 : vector<8x32xf32>
    %102 = math.tanh %101 : vector<8x32xf32>
    %103 = vector.extract_strided_slice %95 {offsets = [0, 32], sizes = [8, 32], strides = [1, 1]} : vector<8x64xf32> to vector<8x32xf32>
    %cst_32 = arith.constant 1.000000e+00 : f32
    %104 = vector.broadcast %cst_32 : f32 to vector<8x32xf32>
    %105 = arith.subf %104, %103 : vector<8x32xf32>
    %106 = arith.mulf %105, %102 : vector<8x32xf32>
    %107 = arith.mulf %103, %51 : vector<8x32xf32>
    %108 = arith.addf %106, %107 : vector<8x32xf32>
    %109 = vector.extract_strided_slice %87 {offsets = [0, 0], sizes = [8, 64], strides = [1, 1]} : vector<8x96xf32> to vector<8x64xf32>
    %110 = vector.extract_strided_slice %83 {offsets = [0, 96], sizes = [8, 64], strides = [1, 1]} : vector<8x192xf32> to vector<8x64xf32>
    %111 = arith.addf %109, %110 : vector<8x64xf32>
    %112 = arith.negf %111 : vector<8x64xf32>
    %113 = math.exp %112 : vector<8x64xf32>
    %cst_33 = arith.constant 1.000000e+00 : f32
    %114 = vector.broadcast %cst_33 : f32 to vector<8x64xf32>
    %115 = arith.addf %114, %113 : vector<8x64xf32>
    %116 = arith.divf %114, %115 : vector<8x64xf32>
    %117 = vector.extract_strided_slice %87 {offsets = [0, 64], sizes = [8, 32], strides = [1, 1]} : vector<8x96xf32> to vector<8x32xf32>
    %118 = vector.extract_strided_slice %116 {offsets = [0, 0], sizes = [8, 32], strides = [1, 1]} : vector<8x64xf32> to vector<8x32xf32>
    %119 = vector.extract_strided_slice %83 {offsets = [0, 160], sizes = [8, 32], strides = [1, 1]} : vector<8x192xf32> to vector<8x32xf32>
    %120 = arith.addf %119, %15 : vector<8x32xf32>
    %121 = arith.mulf %118, %120 : vector<8x32xf32>
    %122 = arith.addf %117, %121 : vector<8x32xf32>
    %123 = math.tanh %122 : vector<8x32xf32>
    %124 = vector.extract_strided_slice %116 {offsets = [0, 32], sizes = [8, 32], strides = [1, 1]} : vector<8x64xf32> to vector<8x32xf32>
    %cst_34 = arith.constant 1.000000e+00 : f32
    %125 = vector.broadcast %cst_34 : f32 to vector<8x32xf32>
    %126 = arith.subf %125, %124 : vector<8x32xf32>
    %127 = arith.mulf %126, %123 : vector<8x32xf32>
    %128 = arith.mulf %124, %72 : vector<8x32xf32>
    %129 = arith.addf %127, %128 : vector<8x32xf32>
    %130 = arith.index_cast %78 : i32 to index
    %c0_35 = arith.constant 0 : index
    %131 = vector.load %arg13[%130, %c0_35] : memref<64x32xf32, #tpu.memory_space<vmem>>, vector<8x32xf32>
    tpu.vector_store %arg13[%130, %c0_35], %108 {strides = array<i32>} : memref<64x32xf32, #tpu.memory_space<vmem>>, vector<8x32xf32>,
    %132 = arith.index_cast %81 : i32 to index
    %c0_36 = arith.constant 0 : index
    %133 = vector.load %arg14[%132, %c0_36] : memref<64x32xf32, #tpu.memory_space<vmem>>, vector<8x32xf32>
    tpu.vector_store %arg14[%132, %c0_36], %129 {strides = array<i32>} : memref<64x32xf32, #tpu.memory_space<vmem>>, vector<8x32xf32>,
    %c2_i32 = arith.constant 2 : i32
    %c8_i32_37 = arith.constant 8 : i32
    %134 = arith.muli %c2_i32, %c8_i32_37 : i32
    %135 = tpu.assume_multiple %134, 8 : i32
    %c7_i32_38 = arith.constant 7 : i32
    %136 = arith.subi %c7_i32_38, %c2_i32 : i32
    %c8_i32_39 = arith.constant 8 : i32
    %137 = arith.muli %136, %c8_i32_39 : i32
    %138 = tpu.assume_multiple %137, 8 : i32
    %139 = tpu.concatenate %108, %129 in 1 : vector<8x32xf32>, vector<8x32xf32> -> vector<8x64xf32>
    %cst_40 = arith.constant dense<0.000000e+00> : vector<8x192xf32>
    %140 = tpu.matmul %139, %8, %cst_40 {dimension_numbers = #tpu.dot_dimension_numbers<[1], [0], [0], [1], [0, 0, 1, 1], [], []>} : vector<8x64xf32>, vector<64x192xf32>, vector<8x192xf32> -> vector<8x192xf32>
    %141 = arith.index_cast %135 : i32 to index
    %c0_41 = arith.constant 0 : index
    %142 = vector.load %arg12[%141, %c0_41] : memref<64x192xf32, #tpu.memory_space<vmem>>, vector<8x96xf32>
    %143 = arith.index_cast %138 : i32 to index
    %c96_42 = arith.constant 96 : index
    %144 = vector.load %arg12[%143, %c96_42] : memref<64x192xf32, #tpu.memory_space<vmem>>, vector<8x96xf32>
    %145 = vector.extract_strided_slice %142 {offsets = [0, 0], sizes = [8, 64], strides = [1, 1]} : vector<8x96xf32> to vector<8x64xf32>
    %146 = vector.extract_strided_slice %140 {offsets = [0, 0], sizes = [8, 64], strides = [1, 1]} : vector<8x192xf32> to vector<8x64xf32>
    %147 = arith.addf %145, %146 : vector<8x64xf32>
    %148 = arith.negf %147 : vector<8x64xf32>
    %149 = math.exp %148 : vector<8x64xf32>
    %cst_43 = arith.constant 1.000000e+00 : f32
    %150 = vector.broadcast %cst_43 : f32 to vector<8x64xf32>
    %151 = arith.addf %150, %149 : vector<8x64xf32>
    %152 = arith.divf %150, %151 : vector<8x64xf32>
    %153 = vector.extract_strided_slice %142 {offsets = [0, 64], sizes = [8, 32], strides = [1, 1]} : vector<8x96xf32> to vector<8x32xf32>
    %154 = vector.extract_strided_slice %152 {offsets = [0, 0], sizes = [8, 32], strides = [1, 1]} : vector<8x64xf32> to vector<8x32xf32>
    %155 = vector.extract_strided_slice %140 {offsets = [0, 64], sizes = [8, 32], strides = [1, 1]} : vector<8x192xf32> to vector<8x32xf32>
    %156 = arith.addf %155, %12 : vector<8x32xf32>
    %157 = arith.mulf %154, %156 : vector<8x32xf32>
    %158 = arith.addf %153, %157 : vector<8x32xf32>
    %159 = math.tanh %158 : vector<8x32xf32>
    %160 = vector.extract_strided_slice %152 {offsets = [0, 32], sizes = [8, 32], strides = [1, 1]} : vector<8x64xf32> to vector<8x32xf32>
    %cst_44 = arith.constant 1.000000e+00 : f32
    %161 = vector.broadcast %cst_44 : f32 to vector<8x32xf32>
    %162 = arith.subf %161, %160 : vector<8x32xf32>
    %163 = arith.mulf %162, %159 : vector<8x32xf32>
    %164 = arith.mulf %160, %108 : vector<8x32xf32>
    %165 = arith.addf %163, %164 : vector<8x32xf32>
    %166 = vector.extract_strided_slice %144 {offsets = [0, 0], sizes = [8, 64], strides = [1, 1]} : vector<8x96xf32> to vector<8x64xf32>
    %167 = vector.extract_strided_slice %140 {offsets = [0, 96], sizes = [8, 64], strides = [1, 1]} : vector<8x192xf32> to vector<8x64xf32>
    %168 = arith.addf %166, %167 : vector<8x64xf32>
    %169 = arith.negf %168 : vector<8x64xf32>
    %170 = math.exp %169 : vector<8x64xf32>
    %cst_45 = arith.constant 1.000000e+00 : f32
    %171 = vector.broadcast %cst_45 : f32 to vector<8x64xf32>
    %172 = arith.addf %171, %170 : vector<8x64xf32>
    %173 = arith.divf %171, %172 : vector<8x64xf32>
    %174 = vector.extract_strided_slice %144 {offsets = [0, 64], sizes = [8, 32], strides = [1, 1]} : vector<8x96xf32> to vector<8x32xf32>
    %175 = vector.extract_strided_slice %173 {offsets = [0, 0], sizes = [8, 32], strides = [1, 1]} : vector<8x64xf32> to vector<8x32xf32>
    %176 = vector.extract_strided_slice %140 {offsets = [0, 160], sizes = [8, 32], strides = [1, 1]} : vector<8x192xf32> to vector<8x32xf32>
    %177 = arith.addf %176, %15 : vector<8x32xf32>
    %178 = arith.mulf %175, %177 : vector<8x32xf32>
    %179 = arith.addf %174, %178 : vector<8x32xf32>
    %180 = math.tanh %179 : vector<8x32xf32>
    %181 = vector.extract_strided_slice %173 {offsets = [0, 32], sizes = [8, 32], strides = [1, 1]} : vector<8x64xf32> to vector<8x32xf32>
    %cst_46 = arith.constant 1.000000e+00 : f32
    %182 = vector.broadcast %cst_46 : f32 to vector<8x32xf32>
    %183 = arith.subf %182, %181 : vector<8x32xf32>
    %184 = arith.mulf %183, %180 : vector<8x32xf32>
    %185 = arith.mulf %181, %129 : vector<8x32xf32>
    %186 = arith.addf %184, %185 : vector<8x32xf32>
    %187 = arith.index_cast %135 : i32 to index
    %c0_47 = arith.constant 0 : index
    %188 = vector.load %arg13[%187, %c0_47] : memref<64x32xf32, #tpu.memory_space<vmem>>, vector<8x32xf32>
    tpu.vector_store %arg13[%187, %c0_47], %165 {strides = array<i32>} : memref<64x32xf32, #tpu.memory_space<vmem>>, vector<8x32xf32>,
    %189 = arith.index_cast %138 : i32 to index
    %c0_48 = arith.constant 0 : index
    %190 = vector.load %arg14[%189, %c0_48] : memref<64x32xf32, #tpu.memory_space<vmem>>, vector<8x32xf32>
    tpu.vector_store %arg14[%189, %c0_48], %186 {strides = array<i32>} : memref<64x32xf32, #tpu.memory_space<vmem>>, vector<8x32xf32>,
    %c3_i32 = arith.constant 3 : i32
    %c8_i32_49 = arith.constant 8 : i32
    %191 = arith.muli %c3_i32, %c8_i32_49 : i32
    %192 = tpu.assume_multiple %191, 8 : i32
    %c7_i32_50 = arith.constant 7 : i32
    %193 = arith.subi %c7_i32_50, %c3_i32 : i32
    %c8_i32_51 = arith.constant 8 : i32
    %194 = arith.muli %193, %c8_i32_51 : i32
    %195 = tpu.assume_multiple %194, 8 : i32
    %196 = tpu.concatenate %165, %186 in 1 : vector<8x32xf32>, vector<8x32xf32> -> vector<8x64xf32>
    %cst_52 = arith.constant dense<0.000000e+00> : vector<8x192xf32>
    %197 = tpu.matmul %196, %8, %cst_52 {dimension_numbers = #tpu.dot_dimension_numbers<[1], [0], [0], [1], [0, 0, 1, 1], [], []>} : vector<8x64xf32>, vector<64x192xf32>, vector<8x192xf32> -> vector<8x192xf32>
    %198 = arith.index_cast %192 : i32 to index
    %c0_53 = arith.constant 0 : index
    %199 = vector.load %arg12[%198, %c0_53] : memref<64x192xf32, #tpu.memory_space<vmem>>, vector<8x96xf32>
    %200 = arith.index_cast %195 : i32 to index
    %c96_54 = arith.constant 96 : index
    %201 = vector.load %arg12[%200, %c96_54] : memref<64x192xf32, #tpu.memory_space<vmem>>, vector<8x96xf32>
    %202 = vector.extract_strided_slice %199 {offsets = [0, 0], sizes = [8, 64], strides = [1, 1]} : vector<8x96xf32> to vector<8x64xf32>
    %203 = vector.extract_strided_slice %197 {offsets = [0, 0], sizes = [8, 64], strides = [1, 1]} : vector<8x192xf32> to vector<8x64xf32>
    %204 = arith.addf %202, %203 : vector<8x64xf32>
    %205 = arith.negf %204 : vector<8x64xf32>
    %206 = math.exp %205 : vector<8x64xf32>
    %cst_55 = arith.constant 1.000000e+00 : f32
    %207 = vector.broadcast %cst_55 : f32 to vector<8x64xf32>
    %208 = arith.addf %207, %206 : vector<8x64xf32>
    %209 = arith.divf %207, %208 : vector<8x64xf32>
    %210 = vector.extract_strided_slice %199 {offsets = [0, 64], sizes = [8, 32], strides = [1, 1]} : vector<8x96xf32> to vector<8x32xf32>
    %211 = vector.extract_strided_slice %209 {offsets = [0, 0], sizes = [8, 32], strides = [1, 1]} : vector<8x64xf32> to vector<8x32xf32>
    %212 = vector.extract_strided_slice %197 {offsets = [0, 64], sizes = [8, 32], strides = [1, 1]} : vector<8x192xf32> to vector<8x32xf32>
    %213 = arith.addf %212, %12 : vector<8x32xf32>
    %214 = arith.mulf %211, %213 : vector<8x32xf32>
    %215 = arith.addf %210, %214 : vector<8x32xf32>
    %216 = math.tanh %215 : vector<8x32xf32>
    %217 = vector.extract_strided_slice %209 {offsets = [0, 32], sizes = [8, 32], strides = [1, 1]} : vector<8x64xf32> to vector<8x32xf32>
    %cst_56 = arith.constant 1.000000e+00 : f32
    %218 = vector.broadcast %cst_56 : f32 to vector<8x32xf32>
    %219 = arith.subf %218, %217 : vector<8x32xf32>
    %220 = arith.mulf %219, %216 : vector<8x32xf32>
    %221 = arith.mulf %217, %165 : vector<8x32xf32>
    %222 = arith.addf %220, %221 : vector<8x32xf32>
    %223 = vector.extract_strided_slice %201 {offsets = [0, 0], sizes = [8, 64], strides = [1, 1]} : vector<8x96xf32> to vector<8x64xf32>
    %224 = vector.extract_strided_slice %197 {offsets = [0, 96], sizes = [8, 64], strides = [1, 1]} : vector<8x192xf32> to vector<8x64xf32>
    %225 = arith.addf %223, %224 : vector<8x64xf32>
    %226 = arith.negf %225 : vector<8x64xf32>
    %227 = math.exp %226 : vector<8x64xf32>
    %cst_57 = arith.constant 1.000000e+00 : f32
    %228 = vector.broadcast %cst_57 : f32 to vector<8x64xf32>
    %229 = arith.addf %228, %227 : vector<8x64xf32>
    %230 = arith.divf %228, %229 : vector<8x64xf32>
    %231 = vector.extract_strided_slice %201 {offsets = [0, 64], sizes = [8, 32], strides = [1, 1]} : vector<8x96xf32> to vector<8x32xf32>
    %232 = vector.extract_strided_slice %230 {offsets = [0, 0], sizes = [8, 32], strides = [1, 1]} : vector<8x64xf32> to vector<8x32xf32>
    %233 = vector.extract_strided_slice %197 {offsets = [0, 160], sizes = [8, 32], strides = [1, 1]} : vector<8x192xf32> to vector<8x32xf32>
    %234 = arith.addf %233, %15 : vector<8x32xf32>
    %235 = arith.mulf %232, %234 : vector<8x32xf32>
    %236 = arith.addf %231, %235 : vector<8x32xf32>
    %237 = math.tanh %236 : vector<8x32xf32>
    %238 = vector.extract_strided_slice %230 {offsets = [0, 32], sizes = [8, 32], strides = [1, 1]} : vector<8x64xf32> to vector<8x32xf32>
    %cst_58 = arith.constant 1.000000e+00 : f32
    %239 = vector.broadcast %cst_58 : f32 to vector<8x32xf32>
    %240 = arith.subf %239, %238 : vector<8x32xf32>
    %241 = arith.mulf %240, %237 : vector<8x32xf32>
    %242 = arith.mulf %238, %186 : vector<8x32xf32>
    %243 = arith.addf %241, %242 : vector<8x32xf32>
    %244 = arith.index_cast %192 : i32 to index
    %c0_59 = arith.constant 0 : index
    %245 = vector.load %arg13[%244, %c0_59] : memref<64x32xf32, #tpu.memory_space<vmem>>, vector<8x32xf32>
    tpu.vector_store %arg13[%244, %c0_59], %222 {strides = array<i32>} : memref<64x32xf32, #tpu.memory_space<vmem>>, vector<8x32xf32>,
    %246 = arith.index_cast %195 : i32 to index
    %c0_60 = arith.constant 0 : index
    %247 = vector.load %arg14[%246, %c0_60] : memref<64x32xf32, #tpu.memory_space<vmem>>, vector<8x32xf32>
    tpu.vector_store %arg14[%246, %c0_60], %243 {strides = array<i32>} : memref<64x32xf32, #tpu.memory_space<vmem>>, vector<8x32xf32>,
    %c4_i32 = arith.constant 4 : i32
    %c8_i32_61 = arith.constant 8 : i32
    %248 = arith.muli %c4_i32, %c8_i32_61 : i32
    %249 = tpu.assume_multiple %248, 8 : i32
    %c7_i32_62 = arith.constant 7 : i32
    %250 = arith.subi %c7_i32_62, %c4_i32 : i32
    %c8_i32_63 = arith.constant 8 : i32
    %251 = arith.muli %250, %c8_i32_63 : i32
    %252 = tpu.assume_multiple %251, 8 : i32
    %253 = tpu.concatenate %222, %243 in 1 : vector<8x32xf32>, vector<8x32xf32> -> vector<8x64xf32>
    %cst_64 = arith.constant dense<0.000000e+00> : vector<8x192xf32>
    %254 = tpu.matmul %253, %8, %cst_64 {dimension_numbers = #tpu.dot_dimension_numbers<[1], [0], [0], [1], [0, 0, 1, 1], [], []>} : vector<8x64xf32>, vector<64x192xf32>, vector<8x192xf32> -> vector<8x192xf32>
    %255 = arith.index_cast %249 : i32 to index
    %c0_65 = arith.constant 0 : index
    %256 = vector.load %arg12[%255, %c0_65] : memref<64x192xf32, #tpu.memory_space<vmem>>, vector<8x96xf32>
    %257 = arith.index_cast %252 : i32 to index
    %c96_66 = arith.constant 96 : index
    %258 = vector.load %arg12[%257, %c96_66] : memref<64x192xf32, #tpu.memory_space<vmem>>, vector<8x96xf32>
    %259 = vector.extract_strided_slice %256 {offsets = [0, 0], sizes = [8, 64], strides = [1, 1]} : vector<8x96xf32> to vector<8x64xf32>
    %260 = vector.extract_strided_slice %254 {offsets = [0, 0], sizes = [8, 64], strides = [1, 1]} : vector<8x192xf32> to vector<8x64xf32>
    %261 = arith.addf %259, %260 : vector<8x64xf32>
    %262 = arith.negf %261 : vector<8x64xf32>
    %263 = math.exp %262 : vector<8x64xf32>
    %cst_67 = arith.constant 1.000000e+00 : f32
    %264 = vector.broadcast %cst_67 : f32 to vector<8x64xf32>
    %265 = arith.addf %264, %263 : vector<8x64xf32>
    %266 = arith.divf %264, %265 : vector<8x64xf32>
    %267 = vector.extract_strided_slice %256 {offsets = [0, 64], sizes = [8, 32], strides = [1, 1]} : vector<8x96xf32> to vector<8x32xf32>
    %268 = vector.extract_strided_slice %266 {offsets = [0, 0], sizes = [8, 32], strides = [1, 1]} : vector<8x64xf32> to vector<8x32xf32>
    %269 = vector.extract_strided_slice %254 {offsets = [0, 64], sizes = [8, 32], strides = [1, 1]} : vector<8x192xf32> to vector<8x32xf32>
    %270 = arith.addf %269, %12 : vector<8x32xf32>
    %271 = arith.mulf %268, %270 : vector<8x32xf32>
    %272 = arith.addf %267, %271 : vector<8x32xf32>
    %273 = math.tanh %272 : vector<8x32xf32>
    %274 = vector.extract_strided_slice %266 {offsets = [0, 32], sizes = [8, 32], strides = [1, 1]} : vector<8x64xf32> to vector<8x32xf32>
    %cst_68 = arith.constant 1.000000e+00 : f32
    %275 = vector.broadcast %cst_68 : f32 to vector<8x32xf32>
    %276 = arith.subf %275, %274 : vector<8x32xf32>
    %277 = arith.mulf %276, %273 : vector<8x32xf32>
    %278 = arith.mulf %274, %222 : vector<8x32xf32>
    %279 = arith.addf %277, %278 : vector<8x32xf32>
    %280 = vector.extract_strided_slice %258 {offsets = [0, 0], sizes = [8, 64], strides = [1, 1]} : vector<8x96xf32> to vector<8x64xf32>
    %281 = vector.extract_strided_slice %254 {offsets = [0, 96], sizes = [8, 64], strides = [1, 1]} : vector<8x192xf32> to vector<8x64xf32>
    %282 = arith.addf %280, %281 : vector<8x64xf32>
    %283 = arith.negf %282 : vector<8x64xf32>
    %284 = math.exp %283 : vector<8x64xf32>
    %cst_69 = arith.constant 1.000000e+00 : f32
    %285 = vector.broadcast %cst_69 : f32 to vector<8x64xf32>
    %286 = arith.addf %285, %284 : vector<8x64xf32>
    %287 = arith.divf %285, %286 : vector<8x64xf32>
    %288 = vector.extract_strided_slice %258 {offsets = [0, 64], sizes = [8, 32], strides = [1, 1]} : vector<8x96xf32> to vector<8x32xf32>
    %289 = vector.extract_strided_slice %287 {offsets = [0, 0], sizes = [8, 32], strides = [1, 1]} : vector<8x64xf32> to vector<8x32xf32>
    %290 = vector.extract_strided_slice %254 {offsets = [0, 160], sizes = [8, 32], strides = [1, 1]} : vector<8x192xf32> to vector<8x32xf32>
    %291 = arith.addf %290, %15 : vector<8x32xf32>
    %292 = arith.mulf %289, %291 : vector<8x32xf32>
    %293 = arith.addf %288, %292 : vector<8x32xf32>
    %294 = math.tanh %293 : vector<8x32xf32>
    %295 = vector.extract_strided_slice %287 {offsets = [0, 32], sizes = [8, 32], strides = [1, 1]} : vector<8x64xf32> to vector<8x32xf32>
    %cst_70 = arith.constant 1.000000e+00 : f32
    %296 = vector.broadcast %cst_70 : f32 to vector<8x32xf32>
    %297 = arith.subf %296, %295 : vector<8x32xf32>
    %298 = arith.mulf %297, %294 : vector<8x32xf32>
    %299 = arith.mulf %295, %243 : vector<8x32xf32>
    %300 = arith.addf %298, %299 : vector<8x32xf32>
    %301 = arith.index_cast %249 : i32 to index
    %c0_71 = arith.constant 0 : index
    %302 = vector.load %arg13[%301, %c0_71] : memref<64x32xf32, #tpu.memory_space<vmem>>, vector<8x32xf32>
    tpu.vector_store %arg13[%301, %c0_71], %279 {strides = array<i32>} : memref<64x32xf32, #tpu.memory_space<vmem>>, vector<8x32xf32>,
    %303 = arith.index_cast %252 : i32 to index
    %c0_72 = arith.constant 0 : index
    %304 = vector.load %arg14[%303, %c0_72] : memref<64x32xf32, #tpu.memory_space<vmem>>, vector<8x32xf32>
    tpu.vector_store %arg14[%303, %c0_72], %300 {strides = array<i32>} : memref<64x32xf32, #tpu.memory_space<vmem>>, vector<8x32xf32>,
    %c5_i32 = arith.constant 5 : i32
    %c8_i32_73 = arith.constant 8 : i32
    %305 = arith.muli %c5_i32, %c8_i32_73 : i32
    %306 = tpu.assume_multiple %305, 8 : i32
    %c7_i32_74 = arith.constant 7 : i32
    %307 = arith.subi %c7_i32_74, %c5_i32 : i32
    %c8_i32_75 = arith.constant 8 : i32
    %308 = arith.muli %307, %c8_i32_75 : i32
    %309 = tpu.assume_multiple %308, 8 : i32
    %310 = tpu.concatenate %279, %300 in 1 : vector<8x32xf32>, vector<8x32xf32> -> vector<8x64xf32>
    %cst_76 = arith.constant dense<0.000000e+00> : vector<8x192xf32>
    %311 = tpu.matmul %310, %8, %cst_76 {dimension_numbers = #tpu.dot_dimension_numbers<[1], [0], [0], [1], [0, 0, 1, 1], [], []>} : vector<8x64xf32>, vector<64x192xf32>, vector<8x192xf32> -> vector<8x192xf32>
    %312 = arith.index_cast %306 : i32 to index
    %c0_77 = arith.constant 0 : index
    %313 = vector.load %arg12[%312, %c0_77] : memref<64x192xf32, #tpu.memory_space<vmem>>, vector<8x96xf32>
    %314 = arith.index_cast %309 : i32 to index
    %c96_78 = arith.constant 96 : index
    %315 = vector.load %arg12[%314, %c96_78] : memref<64x192xf32, #tpu.memory_space<vmem>>, vector<8x96xf32>
    %316 = vector.extract_strided_slice %313 {offsets = [0, 0], sizes = [8, 64], strides = [1, 1]} : vector<8x96xf32> to vector<8x64xf32>
    %317 = vector.extract_strided_slice %311 {offsets = [0, 0], sizes = [8, 64], strides = [1, 1]} : vector<8x192xf32> to vector<8x64xf32>
    %318 = arith.addf %316, %317 : vector<8x64xf32>
    %319 = arith.negf %318 : vector<8x64xf32>
    %320 = math.exp %319 : vector<8x64xf32>
    %cst_79 = arith.constant 1.000000e+00 : f32
    %321 = vector.broadcast %cst_79 : f32 to vector<8x64xf32>
    %322 = arith.addf %321, %320 : vector<8x64xf32>
    %323 = arith.divf %321, %322 : vector<8x64xf32>
    %324 = vector.extract_strided_slice %313 {offsets = [0, 64], sizes = [8, 32], strides = [1, 1]} : vector<8x96xf32> to vector<8x32xf32>
    %325 = vector.extract_strided_slice %323 {offsets = [0, 0], sizes = [8, 32], strides = [1, 1]} : vector<8x64xf32> to vector<8x32xf32>
    %326 = vector.extract_strided_slice %311 {offsets = [0, 64], sizes = [8, 32], strides = [1, 1]} : vector<8x192xf32> to vector<8x32xf32>
    %327 = arith.addf %326, %12 : vector<8x32xf32>
    %328 = arith.mulf %325, %327 : vector<8x32xf32>
    %329 = arith.addf %324, %328 : vector<8x32xf32>
    %330 = math.tanh %329 : vector<8x32xf32>
    %331 = vector.extract_strided_slice %323 {offsets = [0, 32], sizes = [8, 32], strides = [1, 1]} : vector<8x64xf32> to vector<8x32xf32>
    %cst_80 = arith.constant 1.000000e+00 : f32
    %332 = vector.broadcast %cst_80 : f32 to vector<8x32xf32>
    %333 = arith.subf %332, %331 : vector<8x32xf32>
    %334 = arith.mulf %333, %330 : vector<8x32xf32>
    %335 = arith.mulf %331, %279 : vector<8x32xf32>
    %336 = arith.addf %334, %335 : vector<8x32xf32>
    %337 = vector.extract_strided_slice %315 {offsets = [0, 0], sizes = [8, 64], strides = [1, 1]} : vector<8x96xf32> to vector<8x64xf32>
    %338 = vector.extract_strided_slice %311 {offsets = [0, 96], sizes = [8, 64], strides = [1, 1]} : vector<8x192xf32> to vector<8x64xf32>
    %339 = arith.addf %337, %338 : vector<8x64xf32>
    %340 = arith.negf %339 : vector<8x64xf32>
    %341 = math.exp %340 : vector<8x64xf32>
    %cst_81 = arith.constant 1.000000e+00 : f32
    %342 = vector.broadcast %cst_81 : f32 to vector<8x64xf32>
    %343 = arith.addf %342, %341 : vector<8x64xf32>
    %344 = arith.divf %342, %343 : vector<8x64xf32>
    %345 = vector.extract_strided_slice %315 {offsets = [0, 64], sizes = [8, 32], strides = [1, 1]} : vector<8x96xf32> to vector<8x32xf32>
    %346 = vector.extract_strided_slice %344 {offsets = [0, 0], sizes = [8, 32], strides = [1, 1]} : vector<8x64xf32> to vector<8x32xf32>
    %347 = vector.extract_strided_slice %311 {offsets = [0, 160], sizes = [8, 32], strides = [1, 1]} : vector<8x192xf32> to vector<8x32xf32>
    %348 = arith.addf %347, %15 : vector<8x32xf32>
    %349 = arith.mulf %346, %348 : vector<8x32xf32>
    %350 = arith.addf %345, %349 : vector<8x32xf32>
    %351 = math.tanh %350 : vector<8x32xf32>
    %352 = vector.extract_strided_slice %344 {offsets = [0, 32], sizes = [8, 32], strides = [1, 1]} : vector<8x64xf32> to vector<8x32xf32>
    %cst_82 = arith.constant 1.000000e+00 : f32
    %353 = vector.broadcast %cst_82 : f32 to vector<8x32xf32>
    %354 = arith.subf %353, %352 : vector<8x32xf32>
    %355 = arith.mulf %354, %351 : vector<8x32xf32>
    %356 = arith.mulf %352, %300 : vector<8x32xf32>
    %357 = arith.addf %355, %356 : vector<8x32xf32>
    %358 = arith.index_cast %306 : i32 to index
    %c0_83 = arith.constant 0 : index
    %359 = vector.load %arg13[%358, %c0_83] : memref<64x32xf32, #tpu.memory_space<vmem>>, vector<8x32xf32>
    tpu.vector_store %arg13[%358, %c0_83], %336 {strides = array<i32>} : memref<64x32xf32, #tpu.memory_space<vmem>>, vector<8x32xf32>,
    %360 = arith.index_cast %309 : i32 to index
    %c0_84 = arith.constant 0 : index
    %361 = vector.load %arg14[%360, %c0_84] : memref<64x32xf32, #tpu.memory_space<vmem>>, vector<8x32xf32>
    tpu.vector_store %arg14[%360, %c0_84], %357 {strides = array<i32>} : memref<64x32xf32, #tpu.memory_space<vmem>>, vector<8x32xf32>,
    %c6_i32 = arith.constant 6 : i32
    %c8_i32_85 = arith.constant 8 : i32
    %362 = arith.muli %c6_i32, %c8_i32_85 : i32
    %363 = tpu.assume_multiple %362, 8 : i32
    %c7_i32_86 = arith.constant 7 : i32
    %364 = arith.subi %c7_i32_86, %c6_i32 : i32
    %c8_i32_87 = arith.constant 8 : i32
    %365 = arith.muli %364, %c8_i32_87 : i32
    %366 = tpu.assume_multiple %365, 8 : i32
    %367 = tpu.concatenate %336, %357 in 1 : vector<8x32xf32>, vector<8x32xf32> -> vector<8x64xf32>
    %cst_88 = arith.constant dense<0.000000e+00> : vector<8x192xf32>
    %368 = tpu.matmul %367, %8, %cst_88 {dimension_numbers = #tpu.dot_dimension_numbers<[1], [0], [0], [1], [0, 0, 1, 1], [], []>} : vector<8x64xf32>, vector<64x192xf32>, vector<8x192xf32> -> vector<8x192xf32>
    %369 = arith.index_cast %363 : i32 to index
    %c0_89 = arith.constant 0 : index
    %370 = vector.load %arg12[%369, %c0_89] : memref<64x192xf32, #tpu.memory_space<vmem>>, vector<8x96xf32>
    %371 = arith.index_cast %366 : i32 to index
    %c96_90 = arith.constant 96 : index
    %372 = vector.load %arg12[%371, %c96_90] : memref<64x192xf32, #tpu.memory_space<vmem>>, vector<8x96xf32>
    %373 = vector.extract_strided_slice %370 {offsets = [0, 0], sizes = [8, 64], strides = [1, 1]} : vector<8x96xf32> to vector<8x64xf32>
    %374 = vector.extract_strided_slice %368 {offsets = [0, 0], sizes = [8, 64], strides = [1, 1]} : vector<8x192xf32> to vector<8x64xf32>
    %375 = arith.addf %373, %374 : vector<8x64xf32>
    %376 = arith.negf %375 : vector<8x64xf32>
    %377 = math.exp %376 : vector<8x64xf32>
    %cst_91 = arith.constant 1.000000e+00 : f32
    %378 = vector.broadcast %cst_91 : f32 to vector<8x64xf32>
    %379 = arith.addf %378, %377 : vector<8x64xf32>
    %380 = arith.divf %378, %379 : vector<8x64xf32>
    %381 = vector.extract_strided_slice %370 {offsets = [0, 64], sizes = [8, 32], strides = [1, 1]} : vector<8x96xf32> to vector<8x32xf32>
    %382 = vector.extract_strided_slice %380 {offsets = [0, 0], sizes = [8, 32], strides = [1, 1]} : vector<8x64xf32> to vector<8x32xf32>
    %383 = vector.extract_strided_slice %368 {offsets = [0, 64], sizes = [8, 32], strides = [1, 1]} : vector<8x192xf32> to vector<8x32xf32>
    %384 = arith.addf %383, %12 : vector<8x32xf32>
    %385 = arith.mulf %382, %384 : vector<8x32xf32>
    %386 = arith.addf %381, %385 : vector<8x32xf32>
    %387 = math.tanh %386 : vector<8x32xf32>
    %388 = vector.extract_strided_slice %380 {offsets = [0, 32], sizes = [8, 32], strides = [1, 1]} : vector<8x64xf32> to vector<8x32xf32>
    %cst_92 = arith.constant 1.000000e+00 : f32
    %389 = vector.broadcast %cst_92 : f32 to vector<8x32xf32>
    %390 = arith.subf %389, %388 : vector<8x32xf32>
    %391 = arith.mulf %390, %387 : vector<8x32xf32>
    %392 = arith.mulf %388, %336 : vector<8x32xf32>
    %393 = arith.addf %391, %392 : vector<8x32xf32>
    %394 = vector.extract_strided_slice %372 {offsets = [0, 0], sizes = [8, 64], strides = [1, 1]} : vector<8x96xf32> to vector<8x64xf32>
    %395 = vector.extract_strided_slice %368 {offsets = [0, 96], sizes = [8, 64], strides = [1, 1]} : vector<8x192xf32> to vector<8x64xf32>
    %396 = arith.addf %394, %395 : vector<8x64xf32>
    %397 = arith.negf %396 : vector<8x64xf32>
    %398 = math.exp %397 : vector<8x64xf32>
    %cst_93 = arith.constant 1.000000e+00 : f32
    %399 = vector.broadcast %cst_93 : f32 to vector<8x64xf32>
    %400 = arith.addf %399, %398 : vector<8x64xf32>
    %401 = arith.divf %399, %400 : vector<8x64xf32>
    %402 = vector.extract_strided_slice %372 {offsets = [0, 64], sizes = [8, 32], strides = [1, 1]} : vector<8x96xf32> to vector<8x32xf32>
    %403 = vector.extract_strided_slice %401 {offsets = [0, 0], sizes = [8, 32], strides = [1, 1]} : vector<8x64xf32> to vector<8x32xf32>
    %404 = vector.extract_strided_slice %368 {offsets = [0, 160], sizes = [8, 32], strides = [1, 1]} : vector<8x192xf32> to vector<8x32xf32>
    %405 = arith.addf %404, %15 : vector<8x32xf32>
    %406 = arith.mulf %403, %405 : vector<8x32xf32>
    %407 = arith.addf %402, %406 : vector<8x32xf32>
    %408 = math.tanh %407 : vector<8x32xf32>
    %409 = vector.extract_strided_slice %401 {offsets = [0, 32], sizes = [8, 32], strides = [1, 1]} : vector<8x64xf32> to vector<8x32xf32>
    %cst_94 = arith.constant 1.000000e+00 : f32
    %410 = vector.broadcast %cst_94 : f32 to vector<8x32xf32>
    %411 = arith.subf %410, %409 : vector<8x32xf32>
    %412 = arith.mulf %411, %408 : vector<8x32xf32>
    %413 = arith.mulf %409, %357 : vector<8x32xf32>
    %414 = arith.addf %412, %413 : vector<8x32xf32>
    %415 = arith.index_cast %363 : i32 to index
    %c0_95 = arith.constant 0 : index
    %416 = vector.load %arg13[%415, %c0_95] : memref<64x32xf32, #tpu.memory_space<vmem>>, vector<8x32xf32>
    tpu.vector_store %arg13[%415, %c0_95], %393 {strides = array<i32>} : memref<64x32xf32, #tpu.memory_space<vmem>>, vector<8x32xf32>,
    %417 = arith.index_cast %366 : i32 to index
    %c0_96 = arith.constant 0 : index
    %418 = vector.load %arg14[%417, %c0_96] : memref<64x32xf32, #tpu.memory_space<vmem>>, vector<8x32xf32>
    tpu.vector_store %arg14[%417, %c0_96], %414 {strides = array<i32>} : memref<64x32xf32, #tpu.memory_space<vmem>>, vector<8x32xf32>,
    %c7_i32_97 = arith.constant 7 : i32
    %c8_i32_98 = arith.constant 8 : i32
    %419 = arith.muli %c7_i32_97, %c8_i32_98 : i32
    %420 = tpu.assume_multiple %419, 8 : i32
    %c7_i32_99 = arith.constant 7 : i32
    %421 = arith.subi %c7_i32_99, %c7_i32_97 : i32
    %c8_i32_100 = arith.constant 8 : i32
    %422 = arith.muli %421, %c8_i32_100 : i32
    %423 = tpu.assume_multiple %422, 8 : i32
    %424 = tpu.concatenate %393, %414 in 1 : vector<8x32xf32>, vector<8x32xf32> -> vector<8x64xf32>
    %cst_101 = arith.constant dense<0.000000e+00> : vector<8x192xf32>
    %425 = tpu.matmul %424, %8, %cst_101 {dimension_numbers = #tpu.dot_dimension_numbers<[1], [0], [0], [1], [0, 0, 1, 1], [], []>} : vector<8x64xf32>, vector<64x192xf32>, vector<8x192xf32> -> vector<8x192xf32>
    %426 = arith.index_cast %420 : i32 to index
    %c0_102 = arith.constant 0 : index
    %427 = vector.load %arg12[%426, %c0_102] : memref<64x192xf32, #tpu.memory_space<vmem>>, vector<8x96xf32>
    %428 = arith.index_cast %423 : i32 to index
    %c96_103 = arith.constant 96 : index
    %429 = vector.load %arg12[%428, %c96_103] : memref<64x192xf32, #tpu.memory_space<vmem>>, vector<8x96xf32>
    %430 = vector.extract_strided_slice %427 {offsets = [0, 0], sizes = [8, 64], strides = [1, 1]} : vector<8x96xf32> to vector<8x64xf32>
    %431 = vector.extract_strided_slice %425 {offsets = [0, 0], sizes = [8, 64], strides = [1, 1]} : vector<8x192xf32> to vector<8x64xf32>
    %432 = arith.addf %430, %431 : vector<8x64xf32>
    %433 = arith.negf %432 : vector<8x64xf32>
    %434 = math.exp %433 : vector<8x64xf32>
    %cst_104 = arith.constant 1.000000e+00 : f32
    %435 = vector.broadcast %cst_104 : f32 to vector<8x64xf32>
    %436 = arith.addf %435, %434 : vector<8x64xf32>
    %437 = arith.divf %435, %436 : vector<8x64xf32>
    %438 = vector.extract_strided_slice %427 {offsets = [0, 64], sizes = [8, 32], strides = [1, 1]} : vector<8x96xf32> to vector<8x32xf32>
    %439 = vector.extract_strided_slice %437 {offsets = [0, 0], sizes = [8, 32], strides = [1, 1]} : vector<8x64xf32> to vector<8x32xf32>
    %440 = vector.extract_strided_slice %425 {offsets = [0, 64], sizes = [8, 32], strides = [1, 1]} : vector<8x192xf32> to vector<8x32xf32>
    %441 = arith.addf %440, %12 : vector<8x32xf32>
    %442 = arith.mulf %439, %441 : vector<8x32xf32>
    %443 = arith.addf %438, %442 : vector<8x32xf32>
    %444 = math.tanh %443 : vector<8x32xf32>
    %445 = vector.extract_strided_slice %437 {offsets = [0, 32], sizes = [8, 32], strides = [1, 1]} : vector<8x64xf32> to vector<8x32xf32>
    %cst_105 = arith.constant 1.000000e+00 : f32
    %446 = vector.broadcast %cst_105 : f32 to vector<8x32xf32>
    %447 = arith.subf %446, %445 : vector<8x32xf32>
    %448 = arith.mulf %447, %444 : vector<8x32xf32>
    %449 = arith.mulf %445, %393 : vector<8x32xf32>
    %450 = arith.addf %448, %449 : vector<8x32xf32>
    %451 = vector.extract_strided_slice %429 {offsets = [0, 0], sizes = [8, 64], strides = [1, 1]} : vector<8x96xf32> to vector<8x64xf32>
    %452 = vector.extract_strided_slice %425 {offsets = [0, 96], sizes = [8, 64], strides = [1, 1]} : vector<8x192xf32> to vector<8x64xf32>
    %453 = arith.addf %451, %452 : vector<8x64xf32>
    %454 = arith.negf %453 : vector<8x64xf32>
    %455 = math.exp %454 : vector<8x64xf32>
    %cst_106 = arith.constant 1.000000e+00 : f32
    %456 = vector.broadcast %cst_106 : f32 to vector<8x64xf32>
    %457 = arith.addf %456, %455 : vector<8x64xf32>
    %458 = arith.divf %456, %457 : vector<8x64xf32>
    %459 = vector.extract_strided_slice %429 {offsets = [0, 64], sizes = [8, 32], strides = [1, 1]} : vector<8x96xf32> to vector<8x32xf32>
    %460 = vector.extract_strided_slice %458 {offsets = [0, 0], sizes = [8, 32], strides = [1, 1]} : vector<8x64xf32> to vector<8x32xf32>
    %461 = vector.extract_strided_slice %425 {offsets = [0, 160], sizes = [8, 32], strides = [1, 1]} : vector<8x192xf32> to vector<8x32xf32>
    %462 = arith.addf %461, %15 : vector<8x32xf32>
    %463 = arith.mulf %460, %462 : vector<8x32xf32>
    %464 = arith.addf %459, %463 : vector<8x32xf32>
    %465 = math.tanh %464 : vector<8x32xf32>
    %466 = vector.extract_strided_slice %458 {offsets = [0, 32], sizes = [8, 32], strides = [1, 1]} : vector<8x64xf32> to vector<8x32xf32>
    %cst_107 = arith.constant 1.000000e+00 : f32
    %467 = vector.broadcast %cst_107 : f32 to vector<8x32xf32>
    %468 = arith.subf %467, %466 : vector<8x32xf32>
    %469 = arith.mulf %468, %465 : vector<8x32xf32>
    %470 = arith.mulf %466, %414 : vector<8x32xf32>
    %471 = arith.addf %469, %470 : vector<8x32xf32>
    %472 = arith.index_cast %420 : i32 to index
    %c0_108 = arith.constant 0 : index
    %473 = vector.load %arg13[%472, %c0_108] : memref<64x32xf32, #tpu.memory_space<vmem>>, vector<8x32xf32>
    tpu.vector_store %arg13[%472, %c0_108], %450 {strides = array<i32>} : memref<64x32xf32, #tpu.memory_space<vmem>>, vector<8x32xf32>,
    %474 = arith.index_cast %423 : i32 to index
    %c0_109 = arith.constant 0 : index
    %475 = vector.load %arg14[%474, %c0_109] : memref<64x32xf32, #tpu.memory_space<vmem>>, vector<8x32xf32>
    tpu.vector_store %arg14[%474, %c0_109], %471 {strides = array<i32>} : memref<64x32xf32, #tpu.memory_space<vmem>>, vector<8x32xf32>,
    %c8_i32_110 = arith.constant 8 : i32
    %c0_111 = arith.constant 0 : index
    %c0_112 = arith.constant 0 : index
    %c0_113 = arith.constant 0 : index
    %476 = vector.load %arg11[%c0_111, %c0_112, %c0_113] : memref<4x8x32xf32, #tpu.memory_space<vmem>>, vector<1x8x32xf32>
    %477 = vector.shape_cast %476 : vector<1x8x32xf32> to vector<8x32xf32>
    %478 = vector.shape_cast %450 : vector<8x32xf32> to vector<1x8x32xf32>
    tpu.vector_store %arg11[%c0_111, %c0_112, %c0_113], %478 {strides = array<i32>} : memref<4x8x32xf32, #tpu.memory_space<vmem>>, vector<1x8x32xf32>,
    %c1_114 = arith.constant 1 : index
    %c0_115 = arith.constant 0 : index
    %c0_116 = arith.constant 0 : index
    %479 = vector.load %arg11[%c1_114, %c0_115, %c0_116] : memref<4x8x32xf32, #tpu.memory_space<vmem>>, vector<1x8x32xf32>
    %480 = vector.shape_cast %479 : vector<1x8x32xf32> to vector<8x32xf32>
    %481 = vector.shape_cast %471 : vector<8x32xf32> to vector<1x8x32xf32>
    tpu.vector_store %arg11[%c1_114, %c0_115, %c0_116], %481 {strides = array<i32>} : memref<4x8x32xf32, #tpu.memory_space<vmem>>, vector<1x8x32xf32>,
    %c0_117 = arith.constant 0 : index
    %c0_118 = arith.constant 0 : index
    %482 = vector.load %arg13[%c0_117, %c0_118] : memref<64x32xf32, #tpu.memory_space<vmem>>, vector<64x32xf32>
    %483 = arith.truncf %482 : vector<64x32xf32> to vector<64x32xbf16>
    %c0_119 = arith.constant 0 : index
    %c0_120 = arith.constant 0 : index
    %c0_121 = arith.constant 0 : index
    %484 = vector.load %arg6[%c0_119, %c0_120, %c0_121] : memref<2x32x192xbf16, #tpu.memory_space<vmem>>, vector<1x32x192xbf16>
    %485 = vector.shape_cast %484 : vector<1x32x192xbf16> to vector<32x192xbf16>
    %cst_122 = arith.constant dense<0.000000e+00> : vector<64x192xf32>
    %486 = tpu.matmul %483, %485, %cst_122 {dimension_numbers = #tpu.dot_dimension_numbers<[1], [0], [0], [1], [0, 0, 1, 1], [], []>} : vector<64x32xbf16>, vector<32x192xbf16>, vector<64x192xf32> -> vector<64x192xf32>
    %c0_123 = arith.constant 0 : index
    %c0_124 = arith.constant 0 : index
    %487 = vector.load %arg14[%c0_123, %c0_124] : memref<64x32xf32, #tpu.memory_space<vmem>>, vector<64x32xf32>
    %488 = arith.truncf %487 : vector<64x32xf32> to vector<64x32xbf16>
    %c1_125 = arith.constant 1 : index
    %c0_126 = arith.constant 0 : index
    %c0_127 = arith.constant 0 : index
    %489 = vector.load %arg6[%c1_125, %c0_126, %c0_127] : memref<2x32x192xbf16, #tpu.memory_space<vmem>>, vector<1x32x192xbf16>
    %490 = vector.shape_cast %489 : vector<1x32x192xbf16> to vector<32x192xbf16>
    %cst_128 = arith.constant dense<0.000000e+00> : vector<64x192xf32>
    %491 = tpu.matmul %488, %490, %cst_128 {dimension_numbers = #tpu.dot_dimension_numbers<[1], [0], [0], [1], [0, 0, 1, 1], [], []>} : vector<64x32xbf16>, vector<32x192xbf16>, vector<64x192xf32> -> vector<64x192xf32>
    %492 = arith.addf %486, %491 : vector<64x192xf32>
    %c0_129 = arith.constant 0 : index
    %c0_130 = arith.constant 0 : index
    %493 = vector.load %arg8[%c0_129, %c0_130] : memref<1x192xf32, #tpu.memory_space<vmem>>, vector<1x192xf32>
    %494 = vector.broadcast %493 : vector<1x192xf32> to vector<64x192xf32>
    %495 = arith.addf %492, %494 : vector<64x192xf32>
    %c0_131 = arith.constant 0 : index
    %c0_132 = arith.constant 0 : index
    %496 = vector.load %arg12[%c0_131, %c0_132] : memref<64x192xf32, #tpu.memory_space<vmem>>, vector<64x192xf32>
    tpu.vector_store %arg12[%c0_131, %c0_132], %495 {strides = array<i32>} : memref<64x192xf32, #tpu.memory_space<vmem>>, vector<64x192xf32>,
    %c0_133 = arith.constant 0 : index
    %c0_134 = arith.constant 0 : index
    %497 = vector.load %arg7[%c0_133, %c0_134] : memref<64x192xf32, #tpu.memory_space<vmem>>, vector<64x192xf32>
    %c0_135 = arith.constant 0 : index
    %c0_136 = arith.constant 0 : index
    %498 = vector.load %arg9[%c0_135, %c0_136] : memref<1x64xf32, #tpu.memory_space<vmem>>, vector<1x64xf32>
    %499 = vector.extract_strided_slice %498 {offsets = [0, 0], sizes = [1, 32], strides = [1, 1]} : vector<1x64xf32> to vector<1x32xf32>
    %500 = vector.shape_cast %499 : vector<1x32xf32> to vector<1x32xf32>
    %501 = vector.broadcast %500 : vector<1x32xf32> to vector<8x32xf32>
    %502 = vector.extract_strided_slice %498 {offsets = [0, 32], sizes = [1, 32], strides = [1, 1]} : vector<1x64xf32> to vector<1x32xf32>
    %503 = vector.shape_cast %502 : vector<1x32xf32> to vector<1x32xf32>
    %504 = vector.broadcast %503 : vector<1x32xf32> to vector<8x32xf32>
    %c2 = arith.constant 2 : index
    %c0_137 = arith.constant 0 : index
    %c0_138 = arith.constant 0 : index
    %505 = vector.load %arg1[%c2, %c0_137, %c0_138] : memref<4x8x32xf32, #tpu.memory_space<vmem>>, vector<1x8x32xf32>
    %506 = vector.shape_cast %505 : vector<1x8x32xf32> to vector<8x32xf32>
    %c3 = arith.constant 3 : index
    %c0_139 = arith.constant 0 : index
    %c0_140 = arith.constant 0 : index
    %507 = vector.load %arg1[%c3, %c0_139, %c0_140] : memref<4x8x32xf32, #tpu.memory_space<vmem>>, vector<1x8x32xf32>
    %508 = vector.shape_cast %507 : vector<1x8x32xf32> to vector<8x32xf32>
    %c0_i32_141 = arith.constant 0 : i32
    %c8_i32_142 = arith.constant 8 : i32
    %509 = arith.muli %c0_i32_141, %c8_i32_142 : i32
    %510 = tpu.assume_multiple %509, 8 : i32
    %c7_i32_143 = arith.constant 7 : i32
    %511 = arith.subi %c7_i32_143, %c0_i32_141 : i32
    %c8_i32_144 = arith.constant 8 : i32
    %512 = arith.muli %511, %c8_i32_144 : i32
    %513 = tpu.assume_multiple %512, 8 : i32
    %514 = tpu.concatenate %506, %508 in 1 : vector<8x32xf32>, vector<8x32xf32> -> vector<8x64xf32>
    %cst_145 = arith.constant dense<0.000000e+00> : vector<8x192xf32>
    %515 = tpu.matmul %514, %497, %cst_145 {dimension_numbers = #tpu.dot_dimension_numbers<[1], [0], [0], [1], [0, 0, 1, 1], [], []>} : vector<8x64xf32>, vector<64x192xf32>, vector<8x192xf32> -> vector<8x192xf32>
    %516 = arith.index_cast %510 : i32 to index
    %c0_146 = arith.constant 0 : index
    %517 = vector.load %arg12[%516, %c0_146] : memref<64x192xf32, #tpu.memory_space<vmem>>, vector<8x96xf32>
    %518 = arith.index_cast %513 : i32 to index
    %c96_147 = arith.constant 96 : index
    %519 = vector.load %arg12[%518, %c96_147] : memref<64x192xf32, #tpu.memory_space<vmem>>, vector<8x96xf32>
    %520 = vector.extract_strided_slice %517 {offsets = [0, 0], sizes = [8, 64], strides = [1, 1]} : vector<8x96xf32> to vector<8x64xf32>
    %521 = vector.extract_strided_slice %515 {offsets = [0, 0], sizes = [8, 64], strides = [1, 1]} : vector<8x192xf32> to vector<8x64xf32>
    %522 = arith.addf %520, %521 : vector<8x64xf32>
    %523 = arith.negf %522 : vector<8x64xf32>
    %524 = math.exp %523 : vector<8x64xf32>
    %cst_148 = arith.constant 1.000000e+00 : f32
    %525 = vector.broadcast %cst_148 : f32 to vector<8x64xf32>
    %526 = arith.addf %525, %524 : vector<8x64xf32>
    %527 = arith.divf %525, %526 : vector<8x64xf32>
    %528 = vector.extract_strided_slice %517 {offsets = [0, 64], sizes = [8, 32], strides = [1, 1]} : vector<8x96xf32> to vector<8x32xf32>
    %529 = vector.extract_strided_slice %527 {offsets = [0, 0], sizes = [8, 32], strides = [1, 1]} : vector<8x64xf32> to vector<8x32xf32>
    %530 = vector.extract_strided_slice %515 {offsets = [0, 64], sizes = [8, 32], strides = [1, 1]} : vector<8x192xf32> to vector<8x32xf32>
    %531 = arith.addf %530, %501 : vector<8x32xf32>
    %532 = arith.mulf %529, %531 : vector<8x32xf32>
    %533 = arith.addf %528, %532 : vector<8x32xf32>
    %534 = math.tanh %533 : vector<8x32xf32>
    %535 = vector.extract_strided_slice %527 {offsets = [0, 32], sizes = [8, 32], strides = [1, 1]} : vector<8x64xf32> to vector<8x32xf32>
    %cst_149 = arith.constant 1.000000e+00 : f32
    %536 = vector.broadcast %cst_149 : f32 to vector<8x32xf32>
    %537 = arith.subf %536, %535 : vector<8x32xf32>
    %538 = arith.mulf %537, %534 : vector<8x32xf32>
    %539 = arith.mulf %535, %506 : vector<8x32xf32>
    %540 = arith.addf %538, %539 : vector<8x32xf32>
    %541 = vector.extract_strided_slice %519 {offsets = [0, 0], sizes = [8, 64], strides = [1, 1]} : vector<8x96xf32> to vector<8x64xf32>
    %542 = vector.extract_strided_slice %515 {offsets = [0, 96], sizes = [8, 64], strides = [1, 1]} : vector<8x192xf32> to vector<8x64xf32>
    %543 = arith.addf %541, %542 : vector<8x64xf32>
    %544 = arith.negf %543 : vector<8x64xf32>
    %545 = math.exp %544 : vector<8x64xf32>
    %cst_150 = arith.constant 1.000000e+00 : f32
    %546 = vector.broadcast %cst_150 : f32 to vector<8x64xf32>
    %547 = arith.addf %546, %545 : vector<8x64xf32>
    %548 = arith.divf %546, %547 : vector<8x64xf32>
    %549 = vector.extract_strided_slice %519 {offsets = [0, 64], sizes = [8, 32], strides = [1, 1]} : vector<8x96xf32> to vector<8x32xf32>
    %550 = vector.extract_strided_slice %548 {offsets = [0, 0], sizes = [8, 32], strides = [1, 1]} : vector<8x64xf32> to vector<8x32xf32>
    %551 = vector.extract_strided_slice %515 {offsets = [0, 160], sizes = [8, 32], strides = [1, 1]} : vector<8x192xf32> to vector<8x32xf32>
    %552 = arith.addf %551, %504 : vector<8x32xf32>
    %553 = arith.mulf %550, %552 : vector<8x32xf32>
    %554 = arith.addf %549, %553 : vector<8x32xf32>
    %555 = math.tanh %554 : vector<8x32xf32>
    %556 = vector.extract_strided_slice %548 {offsets = [0, 32], sizes = [8, 32], strides = [1, 1]} : vector<8x64xf32> to vector<8x32xf32>
    %cst_151 = arith.constant 1.000000e+00 : f32
    %557 = vector.broadcast %cst_151 : f32 to vector<8x32xf32>
    %558 = arith.subf %557, %556 : vector<8x32xf32>
    %559 = arith.mulf %558, %555 : vector<8x32xf32>
    %560 = arith.mulf %556, %508 : vector<8x32xf32>
    %561 = arith.addf %559, %560 : vector<8x32xf32>
    %562 = arith.index_cast %510 : i32 to index
    %c0_152 = arith.constant 0 : index
    %563 = vector.load %arg10[%562, %c0_152] : memref<64x32xf32, #tpu.memory_space<vmem>>, vector<8x32xf32>
    tpu.vector_store %arg10[%562, %c0_152], %540 {strides = array<i32>} : memref<64x32xf32, #tpu.memory_space<vmem>>, vector<8x32xf32>,
    %564 = arith.index_cast %513 : i32 to index
    %c0_153 = arith.constant 0 : index
    %565 = vector.load %arg14[%564, %c0_153] : memref<64x32xf32, #tpu.memory_space<vmem>>, vector<8x32xf32>
    tpu.vector_store %arg14[%564, %c0_153], %561 {strides = array<i32>} : memref<64x32xf32, #tpu.memory_space<vmem>>, vector<8x32xf32>,
    %c1_i32_154 = arith.constant 1 : i32
    %c8_i32_155 = arith.constant 8 : i32
    %566 = arith.muli %c1_i32_154, %c8_i32_155 : i32
    %567 = tpu.assume_multiple %566, 8 : i32
    %c7_i32_156 = arith.constant 7 : i32
    %568 = arith.subi %c7_i32_156, %c1_i32_154 : i32
    %c8_i32_157 = arith.constant 8 : i32
    %569 = arith.muli %568, %c8_i32_157 : i32
    %570 = tpu.assume_multiple %569, 8 : i32
    %571 = tpu.concatenate %540, %561 in 1 : vector<8x32xf32>, vector<8x32xf32> -> vector<8x64xf32>
    %cst_158 = arith.constant dense<0.000000e+00> : vector<8x192xf32>
    %572 = tpu.matmul %571, %497, %cst_158 {dimension_numbers = #tpu.dot_dimension_numbers<[1], [0], [0], [1], [0, 0, 1, 1], [], []>} : vector<8x64xf32>, vector<64x192xf32>, vector<8x192xf32> -> vector<8x192xf32>
    %573 = arith.index_cast %567 : i32 to index
    %c0_159 = arith.constant 0 : index
    %574 = vector.load %arg12[%573, %c0_159] : memref<64x192xf32, #tpu.memory_space<vmem>>, vector<8x96xf32>
    %575 = arith.index_cast %570 : i32 to index
    %c96_160 = arith.constant 96 : index
    %576 = vector.load %arg12[%575, %c96_160] : memref<64x192xf32, #tpu.memory_space<vmem>>, vector<8x96xf32>
    %577 = vector.extract_strided_slice %574 {offsets = [0, 0], sizes = [8, 64], strides = [1, 1]} : vector<8x96xf32> to vector<8x64xf32>
    %578 = vector.extract_strided_slice %572 {offsets = [0, 0], sizes = [8, 64], strides = [1, 1]} : vector<8x192xf32> to vector<8x64xf32>
    %579 = arith.addf %577, %578 : vector<8x64xf32>
    %580 = arith.negf %579 : vector<8x64xf32>
    %581 = math.exp %580 : vector<8x64xf32>
    %cst_161 = arith.constant 1.000000e+00 : f32
    %582 = vector.broadcast %cst_161 : f32 to vector<8x64xf32>
    %583 = arith.addf %582, %581 : vector<8x64xf32>
    %584 = arith.divf %582, %583 : vector<8x64xf32>
    %585 = vector.extract_strided_slice %574 {offsets = [0, 64], sizes = [8, 32], strides = [1, 1]} : vector<8x96xf32> to vector<8x32xf32>
    %586 = vector.extract_strided_slice %584 {offsets = [0, 0], sizes = [8, 32], strides = [1, 1]} : vector<8x64xf32> to vector<8x32xf32>
    %587 = vector.extract_strided_slice %572 {offsets = [0, 64], sizes = [8, 32], strides = [1, 1]} : vector<8x192xf32> to vector<8x32xf32>
    %588 = arith.addf %587, %501 : vector<8x32xf32>
    %589 = arith.mulf %586, %588 : vector<8x32xf32>
    %590 = arith.addf %585, %589 : vector<8x32xf32>
    %591 = math.tanh %590 : vector<8x32xf32>
    %592 = vector.extract_strided_slice %584 {offsets = [0, 32], sizes = [8, 32], strides = [1, 1]} : vector<8x64xf32> to vector<8x32xf32>
    %cst_162 = arith.constant 1.000000e+00 : f32
    %593 = vector.broadcast %cst_162 : f32 to vector<8x32xf32>
    %594 = arith.subf %593, %592 : vector<8x32xf32>
    %595 = arith.mulf %594, %591 : vector<8x32xf32>
    %596 = arith.mulf %592, %540 : vector<8x32xf32>
    %597 = arith.addf %595, %596 : vector<8x32xf32>
    %598 = vector.extract_strided_slice %576 {offsets = [0, 0], sizes = [8, 64], strides = [1, 1]} : vector<8x96xf32> to vector<8x64xf32>
    %599 = vector.extract_strided_slice %572 {offsets = [0, 96], sizes = [8, 64], strides = [1, 1]} : vector<8x192xf32> to vector<8x64xf32>
    %600 = arith.addf %598, %599 : vector<8x64xf32>
    %601 = arith.negf %600 : vector<8x64xf32>
    %602 = math.exp %601 : vector<8x64xf32>
    %cst_163 = arith.constant 1.000000e+00 : f32
    %603 = vector.broadcast %cst_163 : f32 to vector<8x64xf32>
    %604 = arith.addf %603, %602 : vector<8x64xf32>
    %605 = arith.divf %603, %604 : vector<8x64xf32>
    %606 = vector.extract_strided_slice %576 {offsets = [0, 64], sizes = [8, 32], strides = [1, 1]} : vector<8x96xf32> to vector<8x32xf32>
    %607 = vector.extract_strided_slice %605 {offsets = [0, 0], sizes = [8, 32], strides = [1, 1]} : vector<8x64xf32> to vector<8x32xf32>
    %608 = vector.extract_strided_slice %572 {offsets = [0, 160], sizes = [8, 32], strides = [1, 1]} : vector<8x192xf32> to vector<8x32xf32>
    %609 = arith.addf %608, %504 : vector<8x32xf32>
    %610 = arith.mulf %607, %609 : vector<8x32xf32>
    %611 = arith.addf %606, %610 : vector<8x32xf32>
    %612 = math.tanh %611 : vector<8x32xf32>
    %613 = vector.extract_strided_slice %605 {offsets = [0, 32], sizes = [8, 32], strides = [1, 1]} : vector<8x64xf32> to vector<8x32xf32>
    %cst_164 = arith.constant 1.000000e+00 : f32
    %614 = vector.broadcast %cst_164 : f32 to vector<8x32xf32>
    %615 = arith.subf %614, %613 : vector<8x32xf32>
    %616 = arith.mulf %615, %612 : vector<8x32xf32>
    %617 = arith.mulf %613, %561 : vector<8x32xf32>
    %618 = arith.addf %616, %617 : vector<8x32xf32>
    %619 = arith.index_cast %567 : i32 to index
    %c0_165 = arith.constant 0 : index
    %620 = vector.load %arg10[%619, %c0_165] : memref<64x32xf32, #tpu.memory_space<vmem>>, vector<8x32xf32>
    tpu.vector_store %arg10[%619, %c0_165], %597 {strides = array<i32>} : memref<64x32xf32, #tpu.memory_space<vmem>>, vector<8x32xf32>,
    %621 = arith.index_cast %570 : i32 to index
    %c0_166 = arith.constant 0 : index
    %622 = vector.load %arg14[%621, %c0_166] : memref<64x32xf32, #tpu.memory_space<vmem>>, vector<8x32xf32>
    tpu.vector_store %arg14[%621, %c0_166], %618 {strides = array<i32>} : memref<64x32xf32, #tpu.memory_space<vmem>>, vector<8x32xf32>,
    %c2_i32_167 = arith.constant 2 : i32
    %c8_i32_168 = arith.constant 8 : i32
    %623 = arith.muli %c2_i32_167, %c8_i32_168 : i32
    %624 = tpu.assume_multiple %623, 8 : i32
    %c7_i32_169 = arith.constant 7 : i32
    %625 = arith.subi %c7_i32_169, %c2_i32_167 : i32
    %c8_i32_170 = arith.constant 8 : i32
    %626 = arith.muli %625, %c8_i32_170 : i32
    %627 = tpu.assume_multiple %626, 8 : i32
    %628 = tpu.concatenate %597, %618 in 1 : vector<8x32xf32>, vector<8x32xf32> -> vector<8x64xf32>
    %cst_171 = arith.constant dense<0.000000e+00> : vector<8x192xf32>
    %629 = tpu.matmul %628, %497, %cst_171 {dimension_numbers = #tpu.dot_dimension_numbers<[1], [0], [0], [1], [0, 0, 1, 1], [], []>} : vector<8x64xf32>, vector<64x192xf32>, vector<8x192xf32> -> vector<8x192xf32>
    %630 = arith.index_cast %624 : i32 to index
    %c0_172 = arith.constant 0 : index
    %631 = vector.load %arg12[%630, %c0_172] : memref<64x192xf32, #tpu.memory_space<vmem>>, vector<8x96xf32>
    %632 = arith.index_cast %627 : i32 to index
    %c96_173 = arith.constant 96 : index
    %633 = vector.load %arg12[%632, %c96_173] : memref<64x192xf32, #tpu.memory_space<vmem>>, vector<8x96xf32>
    %634 = vector.extract_strided_slice %631 {offsets = [0, 0], sizes = [8, 64], strides = [1, 1]} : vector<8x96xf32> to vector<8x64xf32>
    %635 = vector.extract_strided_slice %629 {offsets = [0, 0], sizes = [8, 64], strides = [1, 1]} : vector<8x192xf32> to vector<8x64xf32>
    %636 = arith.addf %634, %635 : vector<8x64xf32>
    %637 = arith.negf %636 : vector<8x64xf32>
    %638 = math.exp %637 : vector<8x64xf32>
    %cst_174 = arith.constant 1.000000e+00 : f32
    %639 = vector.broadcast %cst_174 : f32 to vector<8x64xf32>
    %640 = arith.addf %639, %638 : vector<8x64xf32>
    %641 = arith.divf %639, %640 : vector<8x64xf32>
    %642 = vector.extract_strided_slice %631 {offsets = [0, 64], sizes = [8, 32], strides = [1, 1]} : vector<8x96xf32> to vector<8x32xf32>
    %643 = vector.extract_strided_slice %641 {offsets = [0, 0], sizes = [8, 32], strides = [1, 1]} : vector<8x64xf32> to vector<8x32xf32>
    %644 = vector.extract_strided_slice %629 {offsets = [0, 64], sizes = [8, 32], strides = [1, 1]} : vector<8x192xf32> to vector<8x32xf32>
    %645 = arith.addf %644, %501 : vector<8x32xf32>
    %646 = arith.mulf %643, %645 : vector<8x32xf32>
    %647 = arith.addf %642, %646 : vector<8x32xf32>
    %648 = math.tanh %647 : vector<8x32xf32>
    %649 = vector.extract_strided_slice %641 {offsets = [0, 32], sizes = [8, 32], strides = [1, 1]} : vector<8x64xf32> to vector<8x32xf32>
    %cst_175 = arith.constant 1.000000e+00 : f32
    %650 = vector.broadcast %cst_175 : f32 to vector<8x32xf32>
    %651 = arith.subf %650, %649 : vector<8x32xf32>
    %652 = arith.mulf %651, %648 : vector<8x32xf32>
    %653 = arith.mulf %649, %597 : vector<8x32xf32>
    %654 = arith.addf %652, %653 : vector<8x32xf32>
    %655 = vector.extract_strided_slice %633 {offsets = [0, 0], sizes = [8, 64], strides = [1, 1]} : vector<8x96xf32> to vector<8x64xf32>
    %656 = vector.extract_strided_slice %629 {offsets = [0, 96], sizes = [8, 64], strides = [1, 1]} : vector<8x192xf32> to vector<8x64xf32>
    %657 = arith.addf %655, %656 : vector<8x64xf32>
    %658 = arith.negf %657 : vector<8x64xf32>
    %659 = math.exp %658 : vector<8x64xf32>
    %cst_176 = arith.constant 1.000000e+00 : f32
    %660 = vector.broadcast %cst_176 : f32 to vector<8x64xf32>
    %661 = arith.addf %660, %659 : vector<8x64xf32>
    %662 = arith.divf %660, %661 : vector<8x64xf32>
    %663 = vector.extract_strided_slice %633 {offsets = [0, 64], sizes = [8, 32], strides = [1, 1]} : vector<8x96xf32> to vector<8x32xf32>
    %664 = vector.extract_strided_slice %662 {offsets = [0, 0], sizes = [8, 32], strides = [1, 1]} : vector<8x64xf32> to vector<8x32xf32>
    %665 = vector.extract_strided_slice %629 {offsets = [0, 160], sizes = [8, 32], strides = [1, 1]} : vector<8x192xf32> to vector<8x32xf32>
    %666 = arith.addf %665, %504 : vector<8x32xf32>
    %667 = arith.mulf %664, %666 : vector<8x32xf32>
    %668 = arith.addf %663, %667 : vector<8x32xf32>
    %669 = math.tanh %668 : vector<8x32xf32>
    %670 = vector.extract_strided_slice %662 {offsets = [0, 32], sizes = [8, 32], strides = [1, 1]} : vector<8x64xf32> to vector<8x32xf32>
    %cst_177 = arith.constant 1.000000e+00 : f32
    %671 = vector.broadcast %cst_177 : f32 to vector<8x32xf32>
    %672 = arith.subf %671, %670 : vector<8x32xf32>
    %673 = arith.mulf %672, %669 : vector<8x32xf32>
    %674 = arith.mulf %670, %618 : vector<8x32xf32>
    %675 = arith.addf %673, %674 : vector<8x32xf32>
    %676 = arith.index_cast %624 : i32 to index
    %c0_178 = arith.constant 0 : index
    %677 = vector.load %arg10[%676, %c0_178] : memref<64x32xf32, #tpu.memory_space<vmem>>, vector<8x32xf32>
    tpu.vector_store %arg10[%676, %c0_178], %654 {strides = array<i32>} : memref<64x32xf32, #tpu.memory_space<vmem>>, vector<8x32xf32>,
    %678 = arith.index_cast %627 : i32 to index
    %c0_179 = arith.constant 0 : index
    %679 = vector.load %arg14[%678, %c0_179] : memref<64x32xf32, #tpu.memory_space<vmem>>, vector<8x32xf32>
    tpu.vector_store %arg14[%678, %c0_179], %675 {strides = array<i32>} : memref<64x32xf32, #tpu.memory_space<vmem>>, vector<8x32xf32>,
    %c3_i32_180 = arith.constant 3 : i32
    %c8_i32_181 = arith.constant 8 : i32
    %680 = arith.muli %c3_i32_180, %c8_i32_181 : i32
    %681 = tpu.assume_multiple %680, 8 : i32
    %c7_i32_182 = arith.constant 7 : i32
    %682 = arith.subi %c7_i32_182, %c3_i32_180 : i32
    %c8_i32_183 = arith.constant 8 : i32
    %683 = arith.muli %682, %c8_i32_183 : i32
    %684 = tpu.assume_multiple %683, 8 : i32
    %685 = tpu.concatenate %654, %675 in 1 : vector<8x32xf32>, vector<8x32xf32> -> vector<8x64xf32>
    %cst_184 = arith.constant dense<0.000000e+00> : vector<8x192xf32>
    %686 = tpu.matmul %685, %497, %cst_184 {dimension_numbers = #tpu.dot_dimension_numbers<[1], [0], [0], [1], [0, 0, 1, 1], [], []>} : vector<8x64xf32>, vector<64x192xf32>, vector<8x192xf32> -> vector<8x192xf32>
    %687 = arith.index_cast %681 : i32 to index
    %c0_185 = arith.constant 0 : index
    %688 = vector.load %arg12[%687, %c0_185] : memref<64x192xf32, #tpu.memory_space<vmem>>, vector<8x96xf32>
    %689 = arith.index_cast %684 : i32 to index
    %c96_186 = arith.constant 96 : index
    %690 = vector.load %arg12[%689, %c96_186] : memref<64x192xf32, #tpu.memory_space<vmem>>, vector<8x96xf32>
    %691 = vector.extract_strided_slice %688 {offsets = [0, 0], sizes = [8, 64], strides = [1, 1]} : vector<8x96xf32> to vector<8x64xf32>
    %692 = vector.extract_strided_slice %686 {offsets = [0, 0], sizes = [8, 64], strides = [1, 1]} : vector<8x192xf32> to vector<8x64xf32>
    %693 = arith.addf %691, %692 : vector<8x64xf32>
    %694 = arith.negf %693 : vector<8x64xf32>
    %695 = math.exp %694 : vector<8x64xf32>
    %cst_187 = arith.constant 1.000000e+00 : f32
    %696 = vector.broadcast %cst_187 : f32 to vector<8x64xf32>
    %697 = arith.addf %696, %695 : vector<8x64xf32>
    %698 = arith.divf %696, %697 : vector<8x64xf32>
    %699 = vector.extract_strided_slice %688 {offsets = [0, 64], sizes = [8, 32], strides = [1, 1]} : vector<8x96xf32> to vector<8x32xf32>
    %700 = vector.extract_strided_slice %698 {offsets = [0, 0], sizes = [8, 32], strides = [1, 1]} : vector<8x64xf32> to vector<8x32xf32>
    %701 = vector.extract_strided_slice %686 {offsets = [0, 64], sizes = [8, 32], strides = [1, 1]} : vector<8x192xf32> to vector<8x32xf32>
    %702 = arith.addf %701, %501 : vector<8x32xf32>
    %703 = arith.mulf %700, %702 : vector<8x32xf32>
    %704 = arith.addf %699, %703 : vector<8x32xf32>
    %705 = math.tanh %704 : vector<8x32xf32>
    %706 = vector.extract_strided_slice %698 {offsets = [0, 32], sizes = [8, 32], strides = [1, 1]} : vector<8x64xf32> to vector<8x32xf32>
    %cst_188 = arith.constant 1.000000e+00 : f32
    %707 = vector.broadcast %cst_188 : f32 to vector<8x32xf32>
    %708 = arith.subf %707, %706 : vector<8x32xf32>
    %709 = arith.mulf %708, %705 : vector<8x32xf32>
    %710 = arith.mulf %706, %654 : vector<8x32xf32>
    %711 = arith.addf %709, %710 : vector<8x32xf32>
    %712 = vector.extract_strided_slice %690 {offsets = [0, 0], sizes = [8, 64], strides = [1, 1]} : vector<8x96xf32> to vector<8x64xf32>
    %713 = vector.extract_strided_slice %686 {offsets = [0, 96], sizes = [8, 64], strides = [1, 1]} : vector<8x192xf32> to vector<8x64xf32>
    %714 = arith.addf %712, %713 : vector<8x64xf32>
    %715 = arith.negf %714 : vector<8x64xf32>
    %716 = math.exp %715 : vector<8x64xf32>
    %cst_189 = arith.constant 1.000000e+00 : f32
    %717 = vector.broadcast %cst_189 : f32 to vector<8x64xf32>
    %718 = arith.addf %717, %716 : vector<8x64xf32>
    %719 = arith.divf %717, %718 : vector<8x64xf32>
    %720 = vector.extract_strided_slice %690 {offsets = [0, 64], sizes = [8, 32], strides = [1, 1]} : vector<8x96xf32> to vector<8x32xf32>
    %721 = vector.extract_strided_slice %719 {offsets = [0, 0], sizes = [8, 32], strides = [1, 1]} : vector<8x64xf32> to vector<8x32xf32>
    %722 = vector.extract_strided_slice %686 {offsets = [0, 160], sizes = [8, 32], strides = [1, 1]} : vector<8x192xf32> to vector<8x32xf32>
    %723 = arith.addf %722, %504 : vector<8x32xf32>
    %724 = arith.mulf %721, %723 : vector<8x32xf32>
    %725 = arith.addf %720, %724 : vector<8x32xf32>
    %726 = math.tanh %725 : vector<8x32xf32>
    %727 = vector.extract_strided_slice %719 {offsets = [0, 32], sizes = [8, 32], strides = [1, 1]} : vector<8x64xf32> to vector<8x32xf32>
    %cst_190 = arith.constant 1.000000e+00 : f32
    %728 = vector.broadcast %cst_190 : f32 to vector<8x32xf32>
    %729 = arith.subf %728, %727 : vector<8x32xf32>
    %730 = arith.mulf %729, %726 : vector<8x32xf32>
    %731 = arith.mulf %727, %675 : vector<8x32xf32>
    %732 = arith.addf %730, %731 : vector<8x32xf32>
    %733 = arith.index_cast %681 : i32 to index
    %c0_191 = arith.constant 0 : index
    %734 = vector.load %arg10[%733, %c0_191] : memref<64x32xf32, #tpu.memory_space<vmem>>, vector<8x32xf32>
    tpu.vector_store %arg10[%733, %c0_191], %711 {strides = array<i32>} : memref<64x32xf32, #tpu.memory_space<vmem>>, vector<8x32xf32>,
    %735 = arith.index_cast %684 : i32 to index
    %c0_192 = arith.constant 0 : index
    %736 = vector.load %arg14[%735, %c0_192] : memref<64x32xf32, #tpu.memory_space<vmem>>, vector<8x32xf32>
    tpu.vector_store %arg14[%735, %c0_192], %732 {strides = array<i32>} : memref<64x32xf32, #tpu.memory_space<vmem>>, vector<8x32xf32>,
    %c4_i32_193 = arith.constant 4 : i32
    %c8_i32_194 = arith.constant 8 : i32
    %737 = arith.muli %c4_i32_193, %c8_i32_194 : i32
    %738 = tpu.assume_multiple %737, 8 : i32
    %c7_i32_195 = arith.constant 7 : i32
    %739 = arith.subi %c7_i32_195, %c4_i32_193 : i32
    %c8_i32_196 = arith.constant 8 : i32
    %740 = arith.muli %739, %c8_i32_196 : i32
    %741 = tpu.assume_multiple %740, 8 : i32
    %742 = tpu.concatenate %711, %732 in 1 : vector<8x32xf32>, vector<8x32xf32> -> vector<8x64xf32>
    %cst_197 = arith.constant dense<0.000000e+00> : vector<8x192xf32>
    %743 = tpu.matmul %742, %497, %cst_197 {dimension_numbers = #tpu.dot_dimension_numbers<[1], [0], [0], [1], [0, 0, 1, 1], [], []>} : vector<8x64xf32>, vector<64x192xf32>, vector<8x192xf32> -> vector<8x192xf32>
    %744 = arith.index_cast %738 : i32 to index
    %c0_198 = arith.constant 0 : index
    %745 = vector.load %arg12[%744, %c0_198] : memref<64x192xf32, #tpu.memory_space<vmem>>, vector<8x96xf32>
    %746 = arith.index_cast %741 : i32 to index
    %c96_199 = arith.constant 96 : index
    %747 = vector.load %arg12[%746, %c96_199] : memref<64x192xf32, #tpu.memory_space<vmem>>, vector<8x96xf32>
    %748 = vector.extract_strided_slice %745 {offsets = [0, 0], sizes = [8, 64], strides = [1, 1]} : vector<8x96xf32> to vector<8x64xf32>
    %749 = vector.extract_strided_slice %743 {offsets = [0, 0], sizes = [8, 64], strides = [1, 1]} : vector<8x192xf32> to vector<8x64xf32>
    %750 = arith.addf %748, %749 : vector<8x64xf32>
    %751 = arith.negf %750 : vector<8x64xf32>
    %752 = math.exp %751 : vector<8x64xf32>
    %cst_200 = arith.constant 1.000000e+00 : f32
    %753 = vector.broadcast %cst_200 : f32 to vector<8x64xf32>
    %754 = arith.addf %753, %752 : vector<8x64xf32>
    %755 = arith.divf %753, %754 : vector<8x64xf32>
    %756 = vector.extract_strided_slice %745 {offsets = [0, 64], sizes = [8, 32], strides = [1, 1]} : vector<8x96xf32> to vector<8x32xf32>
    %757 = vector.extract_strided_slice %755 {offsets = [0, 0], sizes = [8, 32], strides = [1, 1]} : vector<8x64xf32> to vector<8x32xf32>
    %758 = vector.extract_strided_slice %743 {offsets = [0, 64], sizes = [8, 32], strides = [1, 1]} : vector<8x192xf32> to vector<8x32xf32>
    %759 = arith.addf %758, %501 : vector<8x32xf32>
    %760 = arith.mulf %757, %759 : vector<8x32xf32>
    %761 = arith.addf %756, %760 : vector<8x32xf32>
    %762 = math.tanh %761 : vector<8x32xf32>
    %763 = vector.extract_strided_slice %755 {offsets = [0, 32], sizes = [8, 32], strides = [1, 1]} : vector<8x64xf32> to vector<8x32xf32>
    %cst_201 = arith.constant 1.000000e+00 : f32
    %764 = vector.broadcast %cst_201 : f32 to vector<8x32xf32>
    %765 = arith.subf %764, %763 : vector<8x32xf32>
    %766 = arith.mulf %765, %762 : vector<8x32xf32>
    %767 = arith.mulf %763, %711 : vector<8x32xf32>
    %768 = arith.addf %766, %767 : vector<8x32xf32>
    %769 = vector.extract_strided_slice %747 {offsets = [0, 0], sizes = [8, 64], strides = [1, 1]} : vector<8x96xf32> to vector<8x64xf32>
    %770 = vector.extract_strided_slice %743 {offsets = [0, 96], sizes = [8, 64], strides = [1, 1]} : vector<8x192xf32> to vector<8x64xf32>
    %771 = arith.addf %769, %770 : vector<8x64xf32>
    %772 = arith.negf %771 : vector<8x64xf32>
    %773 = math.exp %772 : vector<8x64xf32>
    %cst_202 = arith.constant 1.000000e+00 : f32
    %774 = vector.broadcast %cst_202 : f32 to vector<8x64xf32>
    %775 = arith.addf %774, %773 : vector<8x64xf32>
    %776 = arith.divf %774, %775 : vector<8x64xf32>
    %777 = vector.extract_strided_slice %747 {offsets = [0, 64], sizes = [8, 32], strides = [1, 1]} : vector<8x96xf32> to vector<8x32xf32>
    %778 = vector.extract_strided_slice %776 {offsets = [0, 0], sizes = [8, 32], strides = [1, 1]} : vector<8x64xf32> to vector<8x32xf32>
    %779 = vector.extract_strided_slice %743 {offsets = [0, 160], sizes = [8, 32], strides = [1, 1]} : vector<8x192xf32> to vector<8x32xf32>
    %780 = arith.addf %779, %504 : vector<8x32xf32>
    %781 = arith.mulf %778, %780 : vector<8x32xf32>
    %782 = arith.addf %777, %781 : vector<8x32xf32>
    %783 = math.tanh %782 : vector<8x32xf32>
    %784 = vector.extract_strided_slice %776 {offsets = [0, 32], sizes = [8, 32], strides = [1, 1]} : vector<8x64xf32> to vector<8x32xf32>
    %cst_203 = arith.constant 1.000000e+00 : f32
    %785 = vector.broadcast %cst_203 : f32 to vector<8x32xf32>
    %786 = arith.subf %785, %784 : vector<8x32xf32>
    %787 = arith.mulf %786, %783 : vector<8x32xf32>
    %788 = arith.mulf %784, %732 : vector<8x32xf32>
    %789 = arith.addf %787, %788 : vector<8x32xf32>
    %790 = arith.index_cast %738 : i32 to index
    %c0_204 = arith.constant 0 : index
    %791 = vector.load %arg10[%790, %c0_204] : memref<64x32xf32, #tpu.memory_space<vmem>>, vector<8x32xf32>
    tpu.vector_store %arg10[%790, %c0_204], %768 {strides = array<i32>} : memref<64x32xf32, #tpu.memory_space<vmem>>, vector<8x32xf32>,
    %792 = arith.index_cast %741 : i32 to index
    %c0_205 = arith.constant 0 : index
    %793 = vector.load %arg14[%792, %c0_205] : memref<64x32xf32, #tpu.memory_space<vmem>>, vector<8x32xf32>
    tpu.vector_store %arg14[%792, %c0_205], %789 {strides = array<i32>} : memref<64x32xf32, #tpu.memory_space<vmem>>, vector<8x32xf32>,
    %c5_i32_206 = arith.constant 5 : i32
    %c8_i32_207 = arith.constant 8 : i32
    %794 = arith.muli %c5_i32_206, %c8_i32_207 : i32
    %795 = tpu.assume_multiple %794, 8 : i32
    %c7_i32_208 = arith.constant 7 : i32
    %796 = arith.subi %c7_i32_208, %c5_i32_206 : i32
    %c8_i32_209 = arith.constant 8 : i32
    %797 = arith.muli %796, %c8_i32_209 : i32
    %798 = tpu.assume_multiple %797, 8 : i32
    %799 = tpu.concatenate %768, %789 in 1 : vector<8x32xf32>, vector<8x32xf32> -> vector<8x64xf32>
    %cst_210 = arith.constant dense<0.000000e+00> : vector<8x192xf32>
    %800 = tpu.matmul %799, %497, %cst_210 {dimension_numbers = #tpu.dot_dimension_numbers<[1], [0], [0], [1], [0, 0, 1, 1], [], []>} : vector<8x64xf32>, vector<64x192xf32>, vector<8x192xf32> -> vector<8x192xf32>
    %801 = arith.index_cast %795 : i32 to index
    %c0_211 = arith.constant 0 : index
    %802 = vector.load %arg12[%801, %c0_211] : memref<64x192xf32, #tpu.memory_space<vmem>>, vector<8x96xf32>
    %803 = arith.index_cast %798 : i32 to index
    %c96_212 = arith.constant 96 : index
    %804 = vector.load %arg12[%803, %c96_212] : memref<64x192xf32, #tpu.memory_space<vmem>>, vector<8x96xf32>
    %805 = vector.extract_strided_slice %802 {offsets = [0, 0], sizes = [8, 64], strides = [1, 1]} : vector<8x96xf32> to vector<8x64xf32>
    %806 = vector.extract_strided_slice %800 {offsets = [0, 0], sizes = [8, 64], strides = [1, 1]} : vector<8x192xf32> to vector<8x64xf32>
    %807 = arith.addf %805, %806 : vector<8x64xf32>
    %808 = arith.negf %807 : vector<8x64xf32>
    %809 = math.exp %808 : vector<8x64xf32>
    %cst_213 = arith.constant 1.000000e+00 : f32
    %810 = vector.broadcast %cst_213 : f32 to vector<8x64xf32>
    %811 = arith.addf %810, %809 : vector<8x64xf32>
    %812 = arith.divf %810, %811 : vector<8x64xf32>
    %813 = vector.extract_strided_slice %802 {offsets = [0, 64], sizes = [8, 32], strides = [1, 1]} : vector<8x96xf32> to vector<8x32xf32>
    %814 = vector.extract_strided_slice %812 {offsets = [0, 0], sizes = [8, 32], strides = [1, 1]} : vector<8x64xf32> to vector<8x32xf32>
    %815 = vector.extract_strided_slice %800 {offsets = [0, 64], sizes = [8, 32], strides = [1, 1]} : vector<8x192xf32> to vector<8x32xf32>
    %816 = arith.addf %815, %501 : vector<8x32xf32>
    %817 = arith.mulf %814, %816 : vector<8x32xf32>
    %818 = arith.addf %813, %817 : vector<8x32xf32>
    %819 = math.tanh %818 : vector<8x32xf32>
    %820 = vector.extract_strided_slice %812 {offsets = [0, 32], sizes = [8, 32], strides = [1, 1]} : vector<8x64xf32> to vector<8x32xf32>
    %cst_214 = arith.constant 1.000000e+00 : f32
    %821 = vector.broadcast %cst_214 : f32 to vector<8x32xf32>
    %822 = arith.subf %821, %820 : vector<8x32xf32>
    %823 = arith.mulf %822, %819 : vector<8x32xf32>
    %824 = arith.mulf %820, %768 : vector<8x32xf32>
    %825 = arith.addf %823, %824 : vector<8x32xf32>
    %826 = vector.extract_strided_slice %804 {offsets = [0, 0], sizes = [8, 64], strides = [1, 1]} : vector<8x96xf32> to vector<8x64xf32>
    %827 = vector.extract_strided_slice %800 {offsets = [0, 96], sizes = [8, 64], strides = [1, 1]} : vector<8x192xf32> to vector<8x64xf32>
    %828 = arith.addf %826, %827 : vector<8x64xf32>
    %829 = arith.negf %828 : vector<8x64xf32>
    %830 = math.exp %829 : vector<8x64xf32>
    %cst_215 = arith.constant 1.000000e+00 : f32
    %831 = vector.broadcast %cst_215 : f32 to vector<8x64xf32>
    %832 = arith.addf %831, %830 : vector<8x64xf32>
    %833 = arith.divf %831, %832 : vector<8x64xf32>
    %834 = vector.extract_strided_slice %804 {offsets = [0, 64], sizes = [8, 32], strides = [1, 1]} : vector<8x96xf32> to vector<8x32xf32>
    %835 = vector.extract_strided_slice %833 {offsets = [0, 0], sizes = [8, 32], strides = [1, 1]} : vector<8x64xf32> to vector<8x32xf32>
    %836 = vector.extract_strided_slice %800 {offsets = [0, 160], sizes = [8, 32], strides = [1, 1]} : vector<8x192xf32> to vector<8x32xf32>
    %837 = arith.addf %836, %504 : vector<8x32xf32>
    %838 = arith.mulf %835, %837 : vector<8x32xf32>
    %839 = arith.addf %834, %838 : vector<8x32xf32>
    %840 = math.tanh %839 : vector<8x32xf32>
    %841 = vector.extract_strided_slice %833 {offsets = [0, 32], sizes = [8, 32], strides = [1, 1]} : vector<8x64xf32> to vector<8x32xf32>
    %cst_216 = arith.constant 1.000000e+00 : f32
    %842 = vector.broadcast %cst_216 : f32 to vector<8x32xf32>
    %843 = arith.subf %842, %841 : vector<8x32xf32>
    %844 = arith.mulf %843, %840 : vector<8x32xf32>
    %845 = arith.mulf %841, %789 : vector<8x32xf32>
    %846 = arith.addf %844, %845 : vector<8x32xf32>
    %847 = arith.index_cast %795 : i32 to index
    %c0_217 = arith.constant 0 : index
    %848 = vector.load %arg10[%847, %c0_217] : memref<64x32xf32, #tpu.memory_space<vmem>>, vector<8x32xf32>
    tpu.vector_store %arg10[%847, %c0_217], %825 {strides = array<i32>} : memref<64x32xf32, #tpu.memory_space<vmem>>, vector<8x32xf32>,
    %849 = arith.index_cast %798 : i32 to index
    %c0_218 = arith.constant 0 : index
    %850 = vector.load %arg14[%849, %c0_218] : memref<64x32xf32, #tpu.memory_space<vmem>>, vector<8x32xf32>
    tpu.vector_store %arg14[%849, %c0_218], %846 {strides = array<i32>} : memref<64x32xf32, #tpu.memory_space<vmem>>, vector<8x32xf32>,
    %c6_i32_219 = arith.constant 6 : i32
    %c8_i32_220 = arith.constant 8 : i32
    %851 = arith.muli %c6_i32_219, %c8_i32_220 : i32
    %852 = tpu.assume_multiple %851, 8 : i32
    %c7_i32_221 = arith.constant 7 : i32
    %853 = arith.subi %c7_i32_221, %c6_i32_219 : i32
    %c8_i32_222 = arith.constant 8 : i32
    %854 = arith.muli %853, %c8_i32_222 : i32
    %855 = tpu.assume_multiple %854, 8 : i32
    %856 = tpu.concatenate %825, %846 in 1 : vector<8x32xf32>, vector<8x32xf32> -> vector<8x64xf32>
    %cst_223 = arith.constant dense<0.000000e+00> : vector<8x192xf32>
    %857 = tpu.matmul %856, %497, %cst_223 {dimension_numbers = #tpu.dot_dimension_numbers<[1], [0], [0], [1], [0, 0, 1, 1], [], []>} : vector<8x64xf32>, vector<64x192xf32>, vector<8x192xf32> -> vector<8x192xf32>
    %858 = arith.index_cast %852 : i32 to index
    %c0_224 = arith.constant 0 : index
    %859 = vector.load %arg12[%858, %c0_224] : memref<64x192xf32, #tpu.memory_space<vmem>>, vector<8x96xf32>
    %860 = arith.index_cast %855 : i32 to index
    %c96_225 = arith.constant 96 : index
    %861 = vector.load %arg12[%860, %c96_225] : memref<64x192xf32, #tpu.memory_space<vmem>>, vector<8x96xf32>
    %862 = vector.extract_strided_slice %859 {offsets = [0, 0], sizes = [8, 64], strides = [1, 1]} : vector<8x96xf32> to vector<8x64xf32>
    %863 = vector.extract_strided_slice %857 {offsets = [0, 0], sizes = [8, 64], strides = [1, 1]} : vector<8x192xf32> to vector<8x64xf32>
    %864 = arith.addf %862, %863 : vector<8x64xf32>
    %865 = arith.negf %864 : vector<8x64xf32>
    %866 = math.exp %865 : vector<8x64xf32>
    %cst_226 = arith.constant 1.000000e+00 : f32
    %867 = vector.broadcast %cst_226 : f32 to vector<8x64xf32>
    %868 = arith.addf %867, %866 : vector<8x64xf32>
    %869 = arith.divf %867, %868 : vector<8x64xf32>
    %870 = vector.extract_strided_slice %859 {offsets = [0, 64], sizes = [8, 32], strides = [1, 1]} : vector<8x96xf32> to vector<8x32xf32>
    %871 = vector.extract_strided_slice %869 {offsets = [0, 0], sizes = [8, 32], strides = [1, 1]} : vector<8x64xf32> to vector<8x32xf32>
    %872 = vector.extract_strided_slice %857 {offsets = [0, 64], sizes = [8, 32], strides = [1, 1]} : vector<8x192xf32> to vector<8x32xf32>
    %873 = arith.addf %872, %501 : vector<8x32xf32>
    %874 = arith.mulf %871, %873 : vector<8x32xf32>
    %875 = arith.addf %870, %874 : vector<8x32xf32>
    %876 = math.tanh %875 : vector<8x32xf32>
    %877 = vector.extract_strided_slice %869 {offsets = [0, 32], sizes = [8, 32], strides = [1, 1]} : vector<8x64xf32> to vector<8x32xf32>
    %cst_227 = arith.constant 1.000000e+00 : f32
    %878 = vector.broadcast %cst_227 : f32 to vector<8x32xf32>
    %879 = arith.subf %878, %877 : vector<8x32xf32>
    %880 = arith.mulf %879, %876 : vector<8x32xf32>
    %881 = arith.mulf %877, %825 : vector<8x32xf32>
    %882 = arith.addf %880, %881 : vector<8x32xf32>
    %883 = vector.extract_strided_slice %861 {offsets = [0, 0], sizes = [8, 64], strides = [1, 1]} : vector<8x96xf32> to vector<8x64xf32>
    %884 = vector.extract_strided_slice %857 {offsets = [0, 96], sizes = [8, 64], strides = [1, 1]} : vector<8x192xf32> to vector<8x64xf32>
    %885 = arith.addf %883, %884 : vector<8x64xf32>
    %886 = arith.negf %885 : vector<8x64xf32>
    %887 = math.exp %886 : vector<8x64xf32>
    %cst_228 = arith.constant 1.000000e+00 : f32
    %888 = vector.broadcast %cst_228 : f32 to vector<8x64xf32>
    %889 = arith.addf %888, %887 : vector<8x64xf32>
    %890 = arith.divf %888, %889 : vector<8x64xf32>
    %891 = vector.extract_strided_slice %861 {offsets = [0, 64], sizes = [8, 32], strides = [1, 1]} : vector<8x96xf32> to vector<8x32xf32>
    %892 = vector.extract_strided_slice %890 {offsets = [0, 0], sizes = [8, 32], strides = [1, 1]} : vector<8x64xf32> to vector<8x32xf32>
    %893 = vector.extract_strided_slice %857 {offsets = [0, 160], sizes = [8, 32], strides = [1, 1]} : vector<8x192xf32> to vector<8x32xf32>
    %894 = arith.addf %893, %504 : vector<8x32xf32>
    %895 = arith.mulf %892, %894 : vector<8x32xf32>
    %896 = arith.addf %891, %895 : vector<8x32xf32>
    %897 = math.tanh %896 : vector<8x32xf32>
    %898 = vector.extract_strided_slice %890 {offsets = [0, 32], sizes = [8, 32], strides = [1, 1]} : vector<8x64xf32> to vector<8x32xf32>
    %cst_229 = arith.constant 1.000000e+00 : f32
    %899 = vector.broadcast %cst_229 : f32 to vector<8x32xf32>
    %900 = arith.subf %899, %898 : vector<8x32xf32>
    %901 = arith.mulf %900, %897 : vector<8x32xf32>
    %902 = arith.mulf %898, %846 : vector<8x32xf32>
    %903 = arith.addf %901, %902 : vector<8x32xf32>
    %904 = arith.index_cast %852 : i32 to index
    %c0_230 = arith.constant 0 : index
    %905 = vector.load %arg10[%904, %c0_230] : memref<64x32xf32, #tpu.memory_space<vmem>>, vector<8x32xf32>
    tpu.vector_store %arg10[%904, %c0_230], %882 {strides = array<i32>} : memref<64x32xf32, #tpu.memory_space<vmem>>, vector<8x32xf32>,
    %906 = arith.index_cast %855 : i32 to index
    %c0_231 = arith.constant 0 : index
    %907 = vector.load %arg14[%906, %c0_231] : memref<64x32xf32, #tpu.memory_space<vmem>>, vector<8x32xf32>
    tpu.vector_store %arg14[%906, %c0_231], %903 {strides = array<i32>} : memref<64x32xf32, #tpu.memory_space<vmem>>, vector<8x32xf32>,
    %c7_i32_232 = arith.constant 7 : i32
    %c8_i32_233 = arith.constant 8 : i32
    %908 = arith.muli %c7_i32_232, %c8_i32_233 : i32
    %909 = tpu.assume_multiple %908, 8 : i32
    %c7_i32_234 = arith.constant 7 : i32
    %910 = arith.subi %c7_i32_234, %c7_i32_232 : i32
    %c8_i32_235 = arith.constant 8 : i32
    %911 = arith.muli %910, %c8_i32_235 : i32
    %912 = tpu.assume_multiple %911, 8 : i32
    %913 = tpu.concatenate %882, %903 in 1 : vector<8x32xf32>, vector<8x32xf32> -> vector<8x64xf32>
    %cst_236 = arith.constant dense<0.000000e+00> : vector<8x192xf32>
    %914 = tpu.matmul %913, %497, %cst_236 {dimension_numbers = #tpu.dot_dimension_numbers<[1], [0], [0], [1], [0, 0, 1, 1], [], []>} : vector<8x64xf32>, vector<64x192xf32>, vector<8x192xf32> -> vector<8x192xf32>
    %915 = arith.index_cast %909 : i32 to index
    %c0_237 = arith.constant 0 : index
    %916 = vector.load %arg12[%915, %c0_237] : memref<64x192xf32, #tpu.memory_space<vmem>>, vector<8x96xf32>
    %917 = arith.index_cast %912 : i32 to index
    %c96_238 = arith.constant 96 : index
    %918 = vector.load %arg12[%917, %c96_238] : memref<64x192xf32, #tpu.memory_space<vmem>>, vector<8x96xf32>
    %919 = vector.extract_strided_slice %916 {offsets = [0, 0], sizes = [8, 64], strides = [1, 1]} : vector<8x96xf32> to vector<8x64xf32>
    %920 = vector.extract_strided_slice %914 {offsets = [0, 0], sizes = [8, 64], strides = [1, 1]} : vector<8x192xf32> to vector<8x64xf32>
    %921 = arith.addf %919, %920 : vector<8x64xf32>
    %922 = arith.negf %921 : vector<8x64xf32>
    %923 = math.exp %922 : vector<8x64xf32>
    %cst_239 = arith.constant 1.000000e+00 : f32
    %924 = vector.broadcast %cst_239 : f32 to vector<8x64xf32>
    %925 = arith.addf %924, %923 : vector<8x64xf32>
    %926 = arith.divf %924, %925 : vector<8x64xf32>
    %927 = vector.extract_strided_slice %916 {offsets = [0, 64], sizes = [8, 32], strides = [1, 1]} : vector<8x96xf32> to vector<8x32xf32>
    %928 = vector.extract_strided_slice %926 {offsets = [0, 0], sizes = [8, 32], strides = [1, 1]} : vector<8x64xf32> to vector<8x32xf32>
    %929 = vector.extract_strided_slice %914 {offsets = [0, 64], sizes = [8, 32], strides = [1, 1]} : vector<8x192xf32> to vector<8x32xf32>
    %930 = arith.addf %929, %501 : vector<8x32xf32>
    %931 = arith.mulf %928, %930 : vector<8x32xf32>
    %932 = arith.addf %927, %931 : vector<8x32xf32>
    %933 = math.tanh %932 : vector<8x32xf32>
    %934 = vector.extract_strided_slice %926 {offsets = [0, 32], sizes = [8, 32], strides = [1, 1]} : vector<8x64xf32> to vector<8x32xf32>
    %cst_240 = arith.constant 1.000000e+00 : f32
    %935 = vector.broadcast %cst_240 : f32 to vector<8x32xf32>
    %936 = arith.subf %935, %934 : vector<8x32xf32>
    %937 = arith.mulf %936, %933 : vector<8x32xf32>
    %938 = arith.mulf %934, %882 : vector<8x32xf32>
    %939 = arith.addf %937, %938 : vector<8x32xf32>
    %940 = vector.extract_strided_slice %918 {offsets = [0, 0], sizes = [8, 64], strides = [1, 1]} : vector<8x96xf32> to vector<8x64xf32>
    %941 = vector.extract_strided_slice %914 {offsets = [0, 96], sizes = [8, 64], strides = [1, 1]} : vector<8x192xf32> to vector<8x64xf32>
    %942 = arith.addf %940, %941 : vector<8x64xf32>
    %943 = arith.negf %942 : vector<8x64xf32>
    %944 = math.exp %943 : vector<8x64xf32>
    %cst_241 = arith.constant 1.000000e+00 : f32
    %945 = vector.broadcast %cst_241 : f32 to vector<8x64xf32>
    %946 = arith.addf %945, %944 : vector<8x64xf32>
    %947 = arith.divf %945, %946 : vector<8x64xf32>
    %948 = vector.extract_strided_slice %918 {offsets = [0, 64], sizes = [8, 32], strides = [1, 1]} : vector<8x96xf32> to vector<8x32xf32>
    %949 = vector.extract_strided_slice %947 {offsets = [0, 0], sizes = [8, 32], strides = [1, 1]} : vector<8x64xf32> to vector<8x32xf32>
    %950 = vector.extract_strided_slice %914 {offsets = [0, 160], sizes = [8, 32], strides = [1, 1]} : vector<8x192xf32> to vector<8x32xf32>
    %951 = arith.addf %950, %504 : vector<8x32xf32>
    %952 = arith.mulf %949, %951 : vector<8x32xf32>
    %953 = arith.addf %948, %952 : vector<8x32xf32>
    %954 = math.tanh %953 : vector<8x32xf32>
    %955 = vector.extract_strided_slice %947 {offsets = [0, 32], sizes = [8, 32], strides = [1, 1]} : vector<8x64xf32> to vector<8x32xf32>
    %cst_242 = arith.constant 1.000000e+00 : f32
    %956 = vector.broadcast %cst_242 : f32 to vector<8x32xf32>
    %957 = arith.subf %956, %955 : vector<8x32xf32>
    %958 = arith.mulf %957, %954 : vector<8x32xf32>
    %959 = arith.mulf %955, %903 : vector<8x32xf32>
    %960 = arith.addf %958, %959 : vector<8x32xf32>
    %961 = arith.index_cast %909 : i32 to index
    %c0_243 = arith.constant 0 : index
    %962 = vector.load %arg10[%961, %c0_243] : memref<64x32xf32, #tpu.memory_space<vmem>>, vector<8x32xf32>
    tpu.vector_store %arg10[%961, %c0_243], %939 {strides = array<i32>} : memref<64x32xf32, #tpu.memory_space<vmem>>, vector<8x32xf32>,
    %963 = arith.index_cast %912 : i32 to index
    %c0_244 = arith.constant 0 : index
    %964 = vector.load %arg14[%963, %c0_244] : memref<64x32xf32, #tpu.memory_space<vmem>>, vector<8x32xf32>
    tpu.vector_store %arg14[%963, %c0_244], %960 {strides = array<i32>} : memref<64x32xf32, #tpu.memory_space<vmem>>, vector<8x32xf32>,
    %c8_i32_245 = arith.constant 8 : i32
    %c2_246 = arith.constant 2 : index
    %c0_247 = arith.constant 0 : index
    %c0_248 = arith.constant 0 : index
    %965 = vector.load %arg11[%c2_246, %c0_247, %c0_248] : memref<4x8x32xf32, #tpu.memory_space<vmem>>, vector<1x8x32xf32>
    %966 = vector.shape_cast %965 : vector<1x8x32xf32> to vector<8x32xf32>
    %967 = vector.shape_cast %939 : vector<8x32xf32> to vector<1x8x32xf32>
    tpu.vector_store %arg11[%c2_246, %c0_247, %c0_248], %967 {strides = array<i32>} : memref<4x8x32xf32, #tpu.memory_space<vmem>>, vector<1x8x32xf32>,
    %c3_249 = arith.constant 3 : index
    %c0_250 = arith.constant 0 : index
    %c0_251 = arith.constant 0 : index
    %968 = vector.load %arg11[%c3_249, %c0_250, %c0_251] : memref<4x8x32xf32, #tpu.memory_space<vmem>>, vector<1x8x32xf32>
    %969 = vector.shape_cast %968 : vector<1x8x32xf32> to vector<8x32xf32>
    %970 = vector.shape_cast %960 : vector<8x32xf32> to vector<1x8x32xf32>
    tpu.vector_store %arg11[%c3_249, %c0_250, %c0_251], %970 {strides = array<i32>} : memref<4x8x32xf32, #tpu.memory_space<vmem>>, vector<1x8x32xf32>,
    %c0_252 = arith.constant 0 : index
    %c0_253 = arith.constant 0 : index
    %971 = vector.load %arg10[%c0_252, %c0_253] : memref<64x32xf32, #tpu.memory_space<vmem>>, vector<64x32xf32>
    %c0_254 = arith.constant 0 : index
    %c0_255 = arith.constant 0 : index
    %972 = vector.load %arg14[%c0_254, %c0_255] : memref<64x32xf32, #tpu.memory_space<vmem>>, vector<64x32xf32>
    %973 = arith.addf %971, %972 : vector<64x32xf32>
    %c0_256 = arith.constant 0 : index
    %c0_257 = arith.constant 0 : index
    %974 = vector.load %arg10[%c0_256, %c0_257] : memref<64x32xf32, #tpu.memory_space<vmem>>, vector<64x32xf32>
    tpu.vector_store %arg10[%c0_256, %c0_257], %973 {strides = array<i32>} : memref<64x32xf32, #tpu.memory_space<vmem>>, vector<64x32xf32>,
    return
  }
}

</mosaic_0001>

<bundles_post_ra>
// kernel: tpu_custom_call.1
= control target key start
LH: loop header
LB: loop body
LE: loop exit
PB: predicated region body
PF: predicated region fallthrough
CT: control target
= control target key end

     0   :  { %17 = vsyncpa [#allocation6], 0  ;;  %s4681_s0 = inlined_call_operand.vmem [shape: f32[64,32], index: 0, kind: input, shape index: {}]   ;;  %s4682_s1 = inlined_call_operand.vmem [shape: f32[4,8,32], index: 1, kind: input, shape index: {}]   ;;  %s4683_s2 = inlined_call_operand.hbm [shape: bf16[32,192], index: 2, kind: input, shape index: {}]   ;;  %s4684_s3 = inlined_call_operand.hbm [shape: f32[64,192], index: 3, kind: input, shape index: {}]   ;;  %s4685_s4 = inlined_call_operand.vmem [shape: f32[1,192], index: 4, kind: input, shape index: {}]   ;;  %s4686_s5 = inlined_call_operand.vmem [shape: f32[1,64], index: 5, kind: input, shape index: {}]   ;;  %s4687_s6 = inlined_call_operand.vmem [shape: bf16[2,32,192], index: 6, kind: input, shape index: {}]   ;;  %s4688_s7 = inlined_call_operand.hbm [shape: f32[64,192], index: 7, kind: input, shape index: {}]   ;;  %s4689_s8 = inlined_call_operand.vmem [shape: f32[1,192], index: 8, kind: input, shape index: {}]   ;;  %s4690_s9 = inlined_call_operand.vmem [shape: f32[1,64], index: 9, kind: input, shape index: {}]   ;;  %s4691_s10 = inlined_call_operand.vmem [shape: f32[64,32], index: 10, kind: output, shape index: {0}]   ;;  %s4692_s11 = inlined_call_operand.hbm [shape: f32[4,8,32], index: 11, kind: output, shape index: {1}]  }
   0x1   :  { %18 = vsyncpa [#allocation9], 0 }
   0x2   :  { %19 = vsyncpa [#allocation7], 0  ;;  %s3586_s17 = smov [#allocation8]  }
   0x3   :  { %s41_s18 = sshll.u32 %s3586_s17, 4  ;;  %s42_s18 = int_to_ptr.vmem [resolvable:$true] %s41_s18 }
   0x4   :  { %s3508_s19 = scalar_lea.vmem %s42_s18, 2048  ;;  %p3513_p1 = scmp.lt.s32.totalorder %s42_s18, %s42_s18 }
   0x5   :  { %p3509_p0 = scmp.ne.s32.totalorder %s42_s18, %s3508_s19  ;;  %p3514_p2 = scmp.lt.s32.totalorder %s3508_s19, %s3508_s19 }
   0x7   :  { %p3515_p3 = por %p3514_p2, %p3513_p1 }
   0x9   :  { %p3516_p4 = pnand %p3515_p3, %p3509_p0 }
   0xb   :  { %3519 = shalt.err (!%p3516_p4)
}
   0xc   :  { %s3587_s20 = smov 256   ;;  %s3588_s21 = smov 16  }
   0xd   :  { %47 = dma.hbm_to_vmem [thread:$0]  %s4684_s3, 2048, %s42_s18, [#allocation9], %s3587_s20, %s3587_s20, %s3588_s21  }
   0xe   :  { %s3589_s24 = smov [#allocation5]  }
   0xf   :  { %s29_s25 = sshll.u32 %s3589_s24, 4  ;;  %s30_s25 = int_to_ptr.vmem [resolvable:$true] %s29_s25 }
  0x10   :  { %s3528_s26 = scalar_lea.vmem %s30_s25, 512  ;;  %p3533_p6 = scmp.lt.s32.totalorder %s30_s25, %s30_s25 }
  0x11   :  { %p3529_p5 = scmp.ne.s32.totalorder %s30_s25, %s3528_s26  ;;  %p3534_p7 = scmp.lt.s32.totalorder %s3528_s26, %s3528_s26 }
  0x13   :  { %p3535_p8 = por %p3534_p7, %p3533_p6 }
  0x15   :  { %p3536_p9 = pnand %p3535_p8, %p3529_p5 }
  0x17   :  { %3539 = shalt.err (!%p3536_p9)
}
  0x18   :  { %s3590_s27 = smov 128   ;;  %s3591_s28 = smov 8  }
  0x19   :  { %35 = dma.hbm_to_vmem [thread:$0]  %s4683_s2, 512, %s30_s25, [#allocation6], %s3590_s27, %s3590_s27, %s3591_s28  }
  0x1a   :  { %s3592_s3 = smov [#allocation10]  }
  0x1b   :  { %s59_s12 = sshll.u32 %s3592_s3, 4  ;;  %s60_s12 = int_to_ptr.vmem [resolvable:$true] %s59_s12 }
  0x1c   :  { %s3548_s13 = scalar_lea.vmem %s60_s12, 2048  ;;  %p3553_p11 = scmp.lt.s32.totalorder %s60_s12, %s60_s12 }
  0x1d   :  { %p3549_p10 = scmp.ne.s32.totalorder %s60_s12, %s3548_s13  ;;  %p3554_p12 = scmp.lt.s32.totalorder %s3548_s13, %s3548_s13 }
  0x1f   :  { %p3555_p13 = por %p3554_p12, %p3553_p11 }
  0x21   :  { %p3556_p0 = pnand %p3555_p13, %p3549_p10 }
  0x23   :  { %3559 = shalt.err (!%p3556_p0)
}
  0x24   :  { %65 = dma.hbm_to_vmem [thread:$0]  %s4688_s7, 2048, %s60_s12, [#allocation9], %s3587_s20, %s3587_s20, %s3588_s21  }
  0x25   :  { %3580 = dma.done.wait [#allocation6], 512  }
  0x26   :  { %3581 = vsyncadd [#allocation6], 4294966784 }
  0x27   :  { %3582 = dma.done.wait [#allocation9], 4096  }
  0x28   :  { %3583 = vsyncadd [#allocation9], 4294963200  ;;  %v3593_v0 = vmov 0   ;;  %v3594_v1 = vmov 0.0   ;;  %v3676_v2 = vld [vmem:[%s4682_s1 + $0x8] sm:$0xff]  ;;  %s3595_s17 = smov 32   ;;  %v98_v39 = vlaneseq }
  0x29   :  { %173 = vmatprep.mubr.bf16.mxu0 %v3593_v0  ;;  %329 = vmatprep.mubr.f32.mxu1 %v3594_v1  ;;  %v3199_v3 = vld [vmem:[#allocation5 + $0x14] ss:$8 sps:$4 sm:$0xff]   ;;  %v3201_v4 = vld [vmem:[#allocation5 + $0x10] ss:$8 sps:$4 sm:$0xff]   ;;  %v3202_v5 = vld [vmem:[#allocation5 + $0x4] ss:$8 sps:$4 sm:$0xff]  }
  0x2a   :  { %258 = vrot.lane.b32.xlu0 %v3676_v2, %s3595_s17  ;;  %153 = vmatprep.subr.bf16.mxu0 %v3199_v3  ;;  %v3204_v6 = vld [vmem:[#allocation5] ss:$8 sps:$4 sm:$0xff]   ;;  %v3686_v9 = vld [vmem:[#allocation8 + $0x78] sm:$0xff]  ;;  %v3688_v10 = vld [vmem:[#allocation8 + $0x70] sm:$0xff]  ;;  %vm128_vm0 = vcmask 261120   ;;  %s3596_s29 = smov 64  }
  0x2b   :  { %154 = vmatpush1.bf16.msra.mxu0 %v3201_v4  ;;  %v80_v7 = vld [vmem:[%s4681_s0] sm:$0xff]  ;;  %v81_v8 = vld [vmem:[%s4681_s0 + $0x8] sm:$0xff]  ;;  %281 = vmatprep.subr.mxu1 %v3686_v9  ;;  %v3696_v14 = vld [vmem:[#allocation8 + $0x58] sm:$0xff]  ;;  %vm215_vm1 = vcmask 523264   ;;  %v3810_v40 = vshrl.u32 %v98_v39, 7  ;;  %s3598_s20 = smov [#allocation11]  }
  0x2c   :  { %155 = vmatprep.subr.bf16.mxu0 %v3202_v5  ;;  %v3691_v11 = vld [vmem:[#allocation8 + $0x68] sm:$0xff]  ;;  %v3693_v12 = vld [vmem:[#allocation8 + $0x60] sm:$0xff]  ;;  %v88_v13 = vpack.c.bf16 %v81_v8, %v80_v7  ;;  %282 = vmatpush1.msra.mxu1 %v3688_v10  ;;  %v3699_v15 = vld [vmem:[#allocation8 + $0x50] sm:$0xff]  ;;  %s3060_s21 = sshll.u32 %s3598_s20, 4  ;;  %s3061_s21 = int_to_ptr.vmem [resolvable:$true] %s3060_s21 }
  0x2d   :  { %283 = vmatprep.subr.mxu1 %v3691_v11  ;;  %v3702_v16 = vld [vmem:[#allocation8 + $0x48] sm:$0xff]  ;;  %v82_v17 = vld [vmem:[%s4681_s0 + $0x10] sm:$0xff]  ;;  %v83_v18 = vld [vmem:[%s4681_s0 + $0x18] sm:$0xff]  ;;  %v100_v41 = vsub.s32 0, %v3810_v40  ;;  %v104_v44 = vsub.s32 1, %v3810_v40  ;;  %p3565_p2 = scmp.lt.s32.totalorder %s3061_s21, %s3061_s21 }
  0x2e   :  { %284 = vmatpush1.msra.mxu1 %v3693_v12  ;;  %v3712_v19 = vld [vmem:[#allocation8 + $0x40] sm:$0xff]  ;;  %v3714_v20 = vld [vmem:[#allocation8 + $0x38] sm:$0xff]  ;;  %v3718_v21 = vld [vmem:[#allocation8 + $0x30] sm:$0xff]  ;;  %v89_v25 = vpack.c.bf16 %v83_v18, %v82_v17 }
  0x2f   :  { %156 = vmatpush1.bf16.msra.mxu0 %v3204_v6  ;;  %285 = vmatprep.subr.mxu1 %v3696_v14  ;;  %v3720_v22 = vld [vmem:[#allocation8 + $0x28] sm:$0xff]  ;;  %v3725_v23 = vld [vmem:[%s4686_s5] ss:$0 sm:$0xff]  ;;  %v3737_v26 = vld [vmem:[#allocation8 + $0x18] sm:$0xff] }
  0x30   :  { %601 = vmatprep.subr.mxu0 %v3686_v9  ;;  %286 = vmatpush1.msra.mxu1 %v3699_v15  ;;  %v3733_v24 = vld [vmem:[#allocation8 + $0x20] sm:$0xff]  ;;  %v3741_v27 = vld [vmem:[#allocation8 + $0x10] sm:$0xff]  ;;  %v3745_v28 = vld [vmem:[#allocation8 + $0x8] sm:$0xff] }
  0x31   :  { %287 = vmatprep.subr.mxu1 %v3702_v16  ;;  %352 = vrot.lane.b32.xlu0 %v3725_v23, %s3596_s29  ;;  %v3749_v29 = vld [vmem:[#allocation8] sm:$0xff]  ;;  %v85_v31 = vld [vmem:[%s4681_s0 + $0x28] sm:$0xff]  ;;  %v86_v33 = vld [vmem:[%s4681_s0 + $0x30] sm:$0xff] }
  0x32   :  { %3086 = vmatmul.mubr.msk.bf16.vlgmr.msra.gmra.mxu0 %vm128_vm0, %v88_v13  ;;  %288 = vmatpush1.msra.mxu1 %v3712_v19  ;;  %v84_v30 = vld [vmem:[%s4681_s0 + $0x20] sm:$0xff]  ;;  %v87_v34 = vld [vmem:[%s4681_s0 + $0x38] sm:$0xff] }
  0x33   :  { %183 = vmatprep.mubr.bf16.mxu0 %v3593_v0  ;;  %289 = vmatprep.subr.mxu1 %v3714_v20  ;;  %v90_v32 = vpack.c.bf16 %v85_v31, %v84_v30  ;;  %v91_v35 = vpack.c.bf16 %v87_v34, %v86_v33  ;;  %v3788_v36 = vld [vmem:[%s4682_s1] sm:$0xff] }
  0x34   :  { %602 = vmatpush1.msra.mxu0 %v3688_v10  ;;  %290 = vmatpush1.msra.mxu1 %v3718_v21  ;;  %v96_v42 = vld [vmem:[%s4685_s4] sm:$0x3]  ;;  %s3597_s4 = smov 96  }
  0x35   :  { %603 = vmatprep.subr.mxu0 %v3691_v11  ;;  %291 = vmatprep.subr.mxu1 %v3720_v22  ;;  %v101_v43 = vrot.slane %v96_v42, %v100_v41  ;;  %v105_v47 = vrot.slane %v96_v42, %v104_v44 }
  0x36   :  { %604 = vmatpush1.msra.mxu0 %v3693_v12  ;;  %292 = vmatpush1.msra.mxu1 %v3733_v24 }
  0x37   :  { %605 = vmatprep.subr.mxu0 %v3696_v14  ;;  %293 = vmatprep.subr.mxu1 %v3737_v26 }
  0x38   :  { %606 = vmatpush1.msra.mxu0 %v3699_v15  ;;  %294 = vmatpush1.msra.mxu1 %v3741_v27 }
  0x39   :  { %295 = vmatprep.subr.mxu1 %v3745_v28  ;;  %607 = vmatprep.subr.mxu0 %v3702_v16 }
  0x3a   :  { %3087 = vmatmul.mubr.msk.bf16.gmra.mxu0 %vm128_vm0, %v89_v25  ;;  %296 = vmatpush1.msra.mxu1 %v3749_v29 }
  0x3b   :  { %193 = vmatprep.mubr.bf16.mxu0 %v3593_v0  ;;  %444 = vmatprep.subr.mxu1 %v3686_v9 }
  0x3c   :  { %608 = vmatpush1.msra.mxu0 %v3712_v19 }
  0x3d   :  { %609 = vmatprep.subr.mxu0 %v3714_v20 }
  0x3e   :  { %610 = vmatpush1.msra.mxu0 %v3718_v21 }
  0x3f   :  { %611 = vmatprep.subr.mxu0 %v3720_v22 }
  0x40   :  { %612 = vmatpush1.msra.mxu0 %v3733_v24 }
  0x41   :  { %613 = vmatprep.subr.mxu0 %v3737_v26 }
  0x42   :  { %3088 = vmatmul.mubr.msk.bf16.gmra.mxu0 %vm128_vm0, %v90_v32 }
  0x43   :  { %203 = vmatprep.mubr.bf16.mxu0 %v3593_v0  ;;  %614 = vmatpush1.msra.mxu0 %v3741_v27 }
  0x44   :  { %615 = vmatprep.subr.mxu0 %v3745_v28 }
  0x45   :  { %616 = vmatpush1.msra.mxu0 %v3749_v29 }
  0x46   :  { %915 = vmatprep.subr.mxu0 %v3686_v9 }
  0x4a   :  { %3089 = vmatmul.mubr.msk.bf16.gmra.mxu0 %vm128_vm0, %v91_v35 }
  0x4b   :  { %649 = vmatprep.mubr.f32.mxu0 %v3594_v1 }
  0x9c   :  { %v259_v37 = vpop.permute.xlu0 %258 }
  0x9d   :  { %v261_v38 = vsel %vm128_vm0, %v3788_v36, %v259_v37 }
  0x9e   :  { %3092 = vmatmul.mubr.msk.f32.vlgmr.msra.gmra.mxu1 %vm215_vm1, %v261_v38 }
  0x9f   :  { %445 = vmatpush1.msra.mxu1 %v3688_v10  ;;  %492 = vmatprep.mubr.f32.mxu1 %v3594_v1 }
  0xa0   :  { %446 = vmatprep.subr.mxu1 %v3691_v11 }
  0xa1   :  { %447 = vmatpush1.msra.mxu1 %v3693_v12 }
  0xa2   :  { %448 = vmatprep.subr.mxu1 %v3696_v14 }
  0xa3   :  { %449 = vmatpush1.msra.mxu1 %v3699_v15  ;;  %v3844_v34 = vpop.permute.xlu0 %352 }
  0xa4   :  { %450 = vmatprep.subr.mxu1 %v3702_v16 }
  0xa5   :  { %451 = vmatpush1.msra.mxu1 %v3712_v19 }
  0xa6   :  { %452 = vmatprep.subr.mxu1 %v3714_v20 }
  0xa7   :  { %453 = vmatpush1.msra.mxu1 %v3718_v21 }
  0xa8   :  { %454 = vmatprep.subr.mxu1 %v3720_v22 }
  0xa9   :  { %455 = vmatpush1.msra.mxu1 %v3733_v24 }
  0xaa   :  { %456 = vmatprep.subr.mxu1 %v3737_v26 }
  0xab   :  { %457 = vmatpush1.msra.mxu1 %v3741_v27 }
  0xac   :  { %458 = vmatprep.subr.mxu1 %v3745_v28 }
  0xad   :  { %459 = vmatpush1.msra.mxu1 %v3749_v29 }
  0xae   :  { %758 = vmatprep.subr.mxu1 %v3686_v9 }
  0xf2   :  { %v175_v45 = vpop.f32.mrf.mxu0 }
  0xf3   :  { %v3819_v46 = vadd.f32 %v175_v45, %v101_v43 }
  0xf4   :  { %v177_v48 = vpop.f32.mrf.mxu0 }
  0xf5   :  { %214 = vst [vmem:[#allocation2] sm:$0xff] %v3819_v46  ;;  %v178_v49 = vadd.f32 %v177_v48, %v105_v47 }
  0xf6   :  { %v179_v50 = vpop.f32.mrf.mxu0 }
  0xf7   :  { %216 = vst.msk [vmem:[#allocation2 + $0x8] sm:$0xff] %vm215_vm1, %v178_v49  ;;  %v3825_v51 = vadd.f32 %v179_v50, %v101_v43 }
  0xf8   :  { %v181_v52 = vpop.f32.mrf.mxu0 }
  0xf9   :  { %v182_v53 = vadd.f32 %v181_v52, %v105_v47 }
  0xfa   :  { %v185_v54 = vpop.f32.mrf.mxu0 }
  0xfb   :  { %218 = vst.msk [vmem:[#allocation2 + $0x18] sm:$0xff] %vm215_vm1, %v182_v53  ;;  %v3828_v55 = vadd.f32 %v185_v54, %v101_v43 }
  0xfc   :  { %v187_v56 = vpop.f32.mrf.mxu0 }
  0xfd   :  { %v188_v57 = vadd.f32 %v187_v56, %v105_v47 }
  0xfe   :  { %v189_v58 = vpop.f32.mrf.mxu0 }
  0xff   :  { %220 = vst.msk [vmem:[#allocation2 + $0x28] sm:$0xff] %vm215_vm1, %v188_v57  ;;  %v3831_v59 = vadd.f32 %v189_v58, %v101_v43 }
 0x100   :  { %v191_v60 = vpop.f32.mrf.mxu0 }
 0x101   :  { %v192_v61 = vadd.f32 %v191_v60, %v105_v47 }
 0x102   :  { %v195_v62 = vpop.f32.mrf.mxu0 }
 0x103   :  { %222 = vst.msk [vmem:[#allocation2 + $0x38] sm:$0xff] %vm215_vm1, %v192_v61  ;;  %v3834_v63 = vadd.f32 %v195_v62, %v101_v43 }
 0x104   :  { %v197_v3 = vpop.f32.mrf.mxu0 }
 0x105   :  { %v198_v4 = vadd.f32 %v197_v3, %v105_v47 }
 0x106   :  { %v199_v5 = vpop.f32.mrf.mxu0 }
 0x107   :  { %224 = vst.msk [vmem:[#allocation2 + $0x48] sm:$0xff] %vm215_vm1, %v198_v4  ;;  %v3837_v6 = vadd.f32 %v199_v5, %v101_v43 }
 0x108   :  { %v201_v7 = vpop.f32.mrf.mxu0 }
 0x109   :  { %v202_v8 = vadd.f32 %v201_v7, %v105_v47 }
 0x10a   :  { %v205_v13 = vpop.f32.mrf.mxu0 }
 0x10b   :  { %226 = vst.msk [vmem:[#allocation2 + $0x58] sm:$0xff] %vm215_vm1, %v202_v8  ;;  %v3840_v17 = vadd.f32 %v205_v13, %v101_v43 }
 0x10c   :  { %v207_v18 = vpop.f32.mrf.mxu0 }
 0x10d   :  { %v208_v25 = vadd.f32 %v207_v18, %v105_v47 }
 0x10e   :  { %v209_v30 = vpop.f32.mrf.mxu0 }
 0x10f   :  { %228 = vst.msk [vmem:[#allocation2 + $0x68] sm:$0xff] %vm215_vm1, %v208_v25  ;;  %v210_v31 = vadd.f32 %v209_v30, %v101_v43 }
 0x110   :  { %v211_v32 = vpop.f32.mrf.mxu0 }
 0x111   :  { %229 = vst [vmem:[#allocation2 + $0x70] sm:$0xff] %v210_v31  ;;  %v212_v33 = vadd.f32 %v211_v32, %v105_v47 }
 0x113   :  { %230 = vst.msk [vmem:[#allocation2 + $0x78] sm:$0xff] %vm215_vm1, %v212_v33 }
 0x11a   :  { %v344_v3 = vld [vmem:[#allocation2 + $0x78] sm:$0xff] }
 0x15e   :  { %v331_v35 = vpop.f32.mrf.mxu1 }
 0x15f   :  { %v355_v37 = vadd.f32 %v3844_v34, %v331_v35  ;;  %v345_v42 = vadd.f32 %v331_v35, %v3819_v46  ;;  %v379_v45 = vadd.f32 %v331_v35, %v210_v31 }
 0x160   :  { %v333_v38 = vpop.f32.mrf.mxu1 }
 0x161   :  { %357 = vrot.lane.b32.xlu1 %v355_v37, %s3596_s29  ;;  %v393_v39 = vadd.f32 %v3725_v23, %v333_v38  ;;  %v3093_v43 = vmul.f32 -1.442695, %v345_v42  ;;  %v3094_v47 = vmul.f32 -1.442695, %v379_v45  ;;  %v380_v13 = vadd.f32 %v344_v3, %v333_v38 }
 0x163   :  { %3217 = vpow2.f32 %v3093_v43  ;;  %v3095_v18 = vmul.f32 -1.442695, %v380_v13 }
 0x164   :  { %3219 = vpow2.f32 %v3094_v47 }
 0x165   :  { %395 = vrot.lane.b32.xlu1 %v393_v39, %s3596_s29 }
 0x170   :  { %v3218_v48 = vpop.eup %3217 }
 0x171   :  { %v349_v49 = vadd.f32 1.0, %v3218_v48  ;;  %v3220_v50 = vpop.eup %3219 }
 0x172   :  { %v387_v52 = vadd.f32 1.0, %v3220_v50 }
 0x173   :  { %3221 = vrcp.f32 %v349_v49 }
 0x174   :  { %3223 = vrcp.f32 %v387_v52 }
 0x180   :  { %v3222_v53 = vpop.eup %3221 }
 0x181   :  { %v3224_v57 = vpop.eup %3223 }
 0x1d3   :  { %v358_v54 = vpop.permute.xlu1 %357 }
 0x1d4   :  { %v360_v56 = vmul.f32 %v3222_v53, %v358_v54 }
 0x1d6   :  { %362 = vrot.lane.b32.xlu0 %v360_v56, %s3596_s29 }
 0x1d7   :  { %v396_v58 = vpop.permute.xlu1 %395 }
 0x1d8   :  { %v398_v60 = vmul.f32 %v3224_v57, %v396_v58 }
 0x1da   :  { %400 = vrot.lane.b32.xlu1 %v398_v60, %s3596_s29 }
 0x1de   :  { %374 = vrot.lane.b32.xlu1 %v3788_v36, %s3595_s17 }
 0x248   :  { %v363_v61 = vpop.permute.xlu0 %362 }
 0x249   :  { %v365_v62 = vadd.f32 %v363_v61, %v3819_v46  ;;  %v367_v46 = vsub.f32 1.0, %v3222_v53 }
 0x24b   :  { %3225 = vtanh.f32 %v365_v62 }
 0x24c   :  { %v401_v4 = vpop.permute.xlu1 %400 }
 0x24d   :  { %v403_v5 = vadd.f32 %v401_v4, %v344_v3 }
 0x24f   :  { %3227 = vtanh.f32 %v403_v5 }
 0x250   :  { %3229 = vpow2.f32 %v3095_v18  ;;  %v375_v30 = vpop.permute.xlu1 %374 }
 0x251   :  { %v377_v33 = vmul.f32 %v3222_v53, %v375_v30  ;;  %v507_v30 = vld [vmem:[#allocation2 + $0x68] sm:$0xff] }
 0x258   :  { %v3226_v7 = vpop.eup %3225 }
 0x259   :  { %369 = vrot.lane.b32.xlu0 %v3226_v7, %s3597_s4 }
 0x25c   :  { %v3228_v8 = vpop.eup %3227 }
 0x25d   :  { %407 = vrot.lane.b32.xlu0 %v3228_v8, %s3597_s4  ;;  %v3230_v25 = vpop.eup %3229 }
 0x25e   :  { %v388_v36 = vadd.f32 1.0, %v3230_v25 }
 0x260   :  { %3231 = vrcp.f32 %v388_v36 }
 0x26d   :  { %v3232_v31 = vpop.eup %3231 }
 0x26e   :  { %v405_v39 = vsub.f32 1.0, %v3232_v31  ;;  %v411_v43 = vmul.f32 %v3232_v31, %v3676_v2 }
 0x2cb   :  { %v370_v32 = vpop.permute.xlu0 %369 }
 0x2cc   :  { %v372_v35 = vmul.f32 %v370_v32, %v367_v46 }
 0x2ce   :  { %v3858_v37 = vadd.f32 %v377_v33, %v372_v35 }
 0x2cf   :  { %v408_v42 = vpop.permute.xlu0 %407 }
 0x2d0   :  { %v410_v45 = vmul.f32 %v408_v42, %v405_v39  ;;  %414 = vrot.lane.b32.xlu1 %v3858_v37, %s3597_s4 }
 0x2d2   :  { %v3863_v38 = vadd.f32 %v411_v43, %v410_v45 }
 0x2d4   :  { %419 = vst.msk [vmem:[#allocation4 + $0x38] sm:$0xff] %vm128_vm0, %v3863_v38  ;;  %421 = vrot.lane.b32.xlu0 %v3863_v38, %s3595_s17 }
 0x342   :  { %v415_v47 = vpop.permute.xlu1 %414 }
 0x343   :  { %417 = vst.msk [vmem:[#allocation3] sm:$0xff] %vm128_vm0, %v415_v47 }
 0x346   :  { %v422_v48 = vpop.permute.xlu0 %421 }
 0x347   :  { %v424_v49 = vsel %vm128_vm0, %v415_v47, %v422_v48 }
 0x348   :  { %3096 = vmatmul.mubr.msk.f32.vlgmr.msra.gmra.mxu1 %vm215_vm1, %v424_v49 }
 0x349   :  { %759 = vmatpush1.msra.mxu1 %v3688_v10  ;;  %806 = vmatprep.mubr.f32.mxu1 %v3594_v1 }
 0x34a   :  { %760 = vmatprep.subr.mxu1 %v3691_v11 }
 0x34b   :  { %761 = vmatpush1.msra.mxu1 %v3693_v12 }
 0x34c   :  { %762 = vmatprep.subr.mxu1 %v3696_v14 }
 0x34d   :  { %763 = vmatpush1.msra.mxu1 %v3699_v15 }
 0x34e   :  { %764 = vmatprep.subr.mxu1 %v3702_v16 }
 0x34f   :  { %765 = vmatpush1.msra.mxu1 %v3712_v19 }
 0x350   :  { %766 = vmatprep.subr.mxu1 %v3714_v20 }
 0x351   :  { %767 = vmatpush1.msra.mxu1 %v3718_v21 }
 0x352   :  { %768 = vmatprep.subr.mxu1 %v3720_v22 }
 0x353   :  { %769 = vmatpush1.msra.mxu1 %v3733_v24 }
 0x354   :  { %770 = vmatprep.subr.mxu1 %v3737_v26 }
 0x355   :  { %771 = vmatpush1.msra.mxu1 %v3741_v27 }
 0x356   :  { %772 = vmatprep.subr.mxu1 %v3745_v28 }
 0x357   :  { %773 = vmatpush1.msra.mxu1 %v3749_v29 }
 0x358   :  { %1066 = vmatprep.subr.mxu1 %v3686_v9 }
 0x408   :  { %v494_v2 = vpop.f32.mrf.mxu1 }
 0x409   :  { %v515_v50 = vadd.f32 %v494_v2, %v3844_v34  ;;  %v508_v54 = vadd.f32 %v494_v2, %v3825_v51  ;;  %v535_v56 = vadd.f32 %v494_v2, %v3840_v17 }
 0x40a   :  { %v496_v52 = vpop.f32.mrf.mxu1 }
 0x40b   :  { %v549_v53 = vadd.f32 %v3725_v23, %v496_v52  ;;  %517 = vrot.lane.b32.xlu1 %v515_v50, %s3596_s29  ;;  %v3097_v57 = vmul.f32 -1.442695, %v508_v54  ;;  %v3098_v58 = vmul.f32 -1.442695, %v535_v56  ;;  %v536_v35 = vadd.f32 %v507_v30, %v496_v52 }
 0x40d   :  { %551 = vrot.lane.b32.xlu0 %v549_v53, %s3596_s29  ;;  %3233 = vpow2.f32 %v3097_v57  ;;  %v3099_v39 = vmul.f32 -1.442695, %v536_v35 }
 0x40e   :  { %3235 = vpow2.f32 %v3098_v58 }
 0x41a   :  { %v3234_v60 = vpop.eup %3233 }
 0x41b   :  { %v3236_v61 = vpop.eup %3235  ;;  %v512_v62 = vadd.f32 1.0, %v3234_v60 }
 0x41c   :  { %v543_v3 = vadd.f32 1.0, %v3236_v61 }
 0x41d   :  { %3237 = vrcp.f32 %v512_v62 }
 0x41e   :  { %3239 = vrcp.f32 %v543_v3 }
 0x42a   :  { %v3238_v4 = vpop.eup %3237 }
 0x42b   :  { %v3240_v8 = vpop.eup %3239  ;;  %v527_v47 = vsub.f32 1.0, %v3238_v4  ;;  %v533_v49 = vmul.f32 %v3238_v4, %v3858_v37 }
 0x47d   :  { %v518_v5 = vpop.permute.xlu1 %517 }
 0x47e   :  { %v520_v7 = vmul.f32 %v3238_v4, %v518_v5 }
 0x47f   :  { %v552_v13 = vpop.permute.xlu0 %551 }
 0x480   :  { %v554_v18 = vmul.f32 %v3240_v8, %v552_v13  ;;  %522 = vrot.lane.b32.xlu1 %v520_v7, %s3596_s29 }
 0x482   :  { %556 = vrot.lane.b32.xlu0 %v554_v18, %s3596_s29 }
 0x4f2   :  { %v523_v25 = vpop.permute.xlu1 %522 }
 0x4f3   :  { %v525_v36 = vadd.f32 %v523_v25, %v3825_v51 }
 0x4f4   :  { %v557_v46 = vpop.permute.xlu0 %556 }
 0x4f5   :  { %3241 = vtanh.f32 %v525_v36  ;;  %v559_v31 = vadd.f32 %v557_v46, %v507_v30 }
 0x4f7   :  { %3243 = vtanh.f32 %v559_v31 }
 0x4f8   :  { %3245 = vpow2.f32 %v3099_v39 }
 0x502   :  { %v3242_v32 = vpop.eup %3241 }
 0x503   :  { %529 = vrot.lane.b32.xlu1 %v3242_v32, %s3597_s4 }
 0x504   :  { %v3244_v33 = vpop.eup %3243 }
 0x505   :  { %563 = vrot.lane.b32.xlu0 %v3244_v33, %s3597_s4  ;;  %v3246_v42 = vpop.eup %3245 }
 0x506   :  { %v544_v43 = vadd.f32 1.0, %v3246_v42 }
 0x508   :  { %3247 = vrcp.f32 %v544_v43  ;;  %v664_v43 = vld [vmem:[#allocation2 + $0x58] sm:$0xff] }
 0x515   :  { %v3248_v45 = vpop.eup %3247 }
 0x516   :  { %v561_v50 = vsub.f32 1.0, %v3248_v45  ;;  %v567_v57 = vmul.f32 %v3248_v45, %v3863_v38 }
 0x575   :  { %v530_v48 = vpop.permute.xlu1 %529 }
 0x576   :  { %v532_v2 = vmul.f32 %v530_v48, %v527_v47 }
 0x577   :  { %v564_v53 = vpop.permute.xlu0 %563 }
 0x578   :  { %v3901_v54 = vadd.f32 %v533_v49, %v532_v2  ;;  %v566_v56 = vmul.f32 %v564_v53, %v561_v50 }
 0x57a   :  { %v3904_v58 = vadd.f32 %v567_v57, %v566_v56  ;;  %570 = vrot.lane.b32.xlu1 %v3901_v54, %s3597_s4 }
 0x57c   :  { %576 = vst.msk [vmem:[#allocation4 + $0x30] sm:$0xff] %vm128_vm0, %v3904_v58  ;;  %578 = vrot.lane.b32.xlu0 %v3904_v58, %s3595_s17 }
 0x5ec   :  { %v571_v37 = vpop.permute.xlu1 %570 }
 0x5ed   :  { %574 = vst.msk [vmem:[#allocation3 + $0x8] sm:$0xff] %vm128_vm0, %v571_v37 }
 0x5ee   :  { %v579_v52 = vpop.permute.xlu0 %578 }
 0x5ef   :  { %v581_v60 = vsel %vm128_vm0, %v571_v37, %v579_v52 }
 0x5f0   :  { %3100 = vmatmul.mubr.msk.f32.vlgmr.msra.gmra.mxu0 %vm215_vm1, %v581_v60 }
 0x5f1   :  { %916 = vmatpush1.msra.mxu0 %v3688_v10  ;;  %963 = vmatprep.mubr.f32.mxu0 %v3594_v1 }
 0x5f2   :  { %917 = vmatprep.subr.mxu0 %v3691_v11 }
 0x5f3   :  { %918 = vmatpush1.msra.mxu0 %v3693_v12 }
 0x5f4   :  { %919 = vmatprep.subr.mxu0 %v3696_v14 }
 0x5f5   :  { %920 = vmatpush1.msra.mxu0 %v3699_v15 }
 0x5f6   :  { %921 = vmatprep.subr.mxu0 %v3702_v16 }
 0x5f7   :  { %922 = vmatpush1.msra.mxu0 %v3712_v19 }
 0x5f8   :  { %923 = vmatprep.subr.mxu0 %v3714_v20 }
 0x5f9   :  { %924 = vmatpush1.msra.mxu0 %v3718_v21 }
 0x5fa   :  { %925 = vmatprep.subr.mxu0 %v3720_v22 }
 0x5fb   :  { %926 = vmatpush1.msra.mxu0 %v3733_v24 }
 0x5fc   :  { %927 = vmatprep.subr.mxu0 %v3737_v26 }
 0x5fd   :  { %928 = vmatpush1.msra.mxu0 %v3741_v27 }
 0x5fe   :  { %929 = vmatprep.subr.mxu0 %v3745_v28 }
 0x5ff   :  { %930 = vmatpush1.msra.mxu0 %v3749_v29 }
 0x600   :  { %1217 = vmatprep.subr.mxu0 %v3686_v9 }
 0x6b0   :  { %v651_v38 = vpop.f32.mrf.mxu0 }
 0x6b1   :  { %v672_v61 = vadd.f32 %v651_v38, %v3844_v34  ;;  %v665_v4 = vadd.f32 %v651_v38, %v3828_v55  ;;  %v692_v5 = vadd.f32 %v651_v38, %v3837_v6 }
 0x6b2   :  { %v653_v62 = vpop.f32.mrf.mxu0 }
 0x6b3   :  { %v706_v3 = vadd.f32 %v3725_v23, %v653_v62  ;;  %674 = vrot.lane.b32.xlu1 %v672_v61, %s3596_s29  ;;  %v3101_v7 = vmul.f32 -1.442695, %v665_v4  ;;  %v3102_v8 = vmul.f32 -1.442695, %v692_v5  ;;  %v693_v2 = vadd.f32 %v664_v43, %v653_v62 }
 0x6b5   :  { %708 = vrot.lane.b32.xlu0 %v706_v3, %s3596_s29  ;;  %3249 = vpow2.f32 %v3101_v7  ;;  %v3103_v50 = vmul.f32 -1.442695, %v693_v2 }
 0x6b6   :  { %3251 = vpow2.f32 %v3102_v8 }
 0x6c2   :  { %v3250_v13 = vpop.eup %3249 }
 0x6c3   :  { %v3252_v18 = vpop.eup %3251  ;;  %v669_v25 = vadd.f32 1.0, %v3250_v13 }
 0x6c4   :  { %v700_v36 = vadd.f32 1.0, %v3252_v18 }
 0x6c5   :  { %3253 = vrcp.f32 %v669_v25 }
 0x6c6   :  { %3255 = vrcp.f32 %v700_v36 }
 0x6d2   :  { %v3254_v30 = vpop.eup %3253 }
 0x6d3   :  { %v3256_v32 = vpop.eup %3255  ;;  %v684_v37 = vsub.f32 1.0, %v3254_v30  ;;  %v690_v60 = vmul.f32 %v3254_v30, %v3901_v54 }
 0x725   :  { %v675_v46 = vpop.permute.xlu1 %674 }
 0x726   :  { %v677_v31 = vmul.f32 %v3254_v30, %v675_v46 }
 0x727   :  { %v709_v33 = vpop.permute.xlu0 %708 }
 0x728   :  { %v711_v35 = vmul.f32 %v3256_v32, %v709_v33  ;;  %679 = vrot.lane.b32.xlu1 %v677_v31, %s3596_s29 }
 0x72a   :  { %713 = vrot.lane.b32.xlu0 %v711_v35, %s3596_s29 }
 0x79a   :  { %v680_v39 = vpop.permute.xlu1 %679 }
 0x79b   :  { %v682_v42 = vadd.f32 %v680_v39, %v3828_v55 }
 0x79c   :  { %v714_v45 = vpop.permute.xlu0 %713 }
 0x79d   :  { %3257 = vtanh.f32 %v682_v42  ;;  %v716_v47 = vadd.f32 %v714_v45, %v664_v43 }
 0x79f   :  { %3259 = vtanh.f32 %v716_v47 }
 0x7a0   :  { %3261 = vpow2.f32 %v3103_v50 }
 0x7aa   :  { %v3258_v48 = vpop.eup %3257 }
 0x7ab   :  { %686 = vrot.lane.b32.xlu1 %v3258_v48, %s3597_s4 }
 0x7ac   :  { %v3260_v49 = vpop.eup %3259 }
 0x7ad   :  { %720 = vrot.lane.b32.xlu0 %v3260_v49, %s3597_s4  ;;  %v3262_v53 = vpop.eup %3261 }
 0x7ae   :  { %v701_v56 = vadd.f32 1.0, %v3262_v53  ;;  %v821_v53 = vld [vmem:[#allocation2 + $0x48] sm:$0xff] }
 0x7b0   :  { %3263 = vrcp.f32 %v701_v56 }
 0x7bd   :  { %v3264_v57 = vpop.eup %3263 }
 0x7be   :  { %v718_v61 = vsub.f32 1.0, %v3264_v57  ;;  %v724_v7 = vmul.f32 %v3264_v57, %v3904_v58 }
 0x81d   :  { %v687_v52 = vpop.permute.xlu1 %686 }
 0x81e   :  { %v689_v38 = vmul.f32 %v687_v52, %v684_v37 }
 0x81f   :  { %v721_v3 = vpop.permute.xlu0 %720 }
 0x820   :  { %v3944_v4 = vadd.f32 %v690_v60, %v689_v38  ;;  %v723_v5 = vmul.f32 %v721_v3, %v718_v61 }
 0x822   :  { %v3947_v8 = vadd.f32 %v724_v7, %v723_v5  ;;  %727 = vrot.lane.b32.xlu1 %v3944_v4, %s3597_s4 }
 0x824   :  { %733 = vst.msk [vmem:[#allocation4 + $0x28] sm:$0xff] %vm128_vm0, %v3947_v8  ;;  %735 = vrot.lane.b32.xlu0 %v3947_v8, %s3595_s17 }
 0x894   :  { %v728_v54 = vpop.permute.xlu1 %727 }
 0x895   :  { %731 = vst.msk [vmem:[#allocation3 + $0x10] sm:$0xff] %vm128_vm0, %v728_v54 }
 0x896   :  { %v736_v62 = vpop.permute.xlu0 %735 }
 0x897   :  { %v738_v13 = vsel %vm128_vm0, %v728_v54, %v736_v62 }
 0x898   :  { %3104 = vmatmul.mubr.msk.f32.vlgmr.msra.gmra.mxu1 %vm215_vm1, %v738_v13 }
 0x899   :  { %1067 = vmatpush1.msra.mxu1 %v3688_v10  ;;  %1114 = vmatprep.mubr.f32.mxu1 %v3594_v1 }
 0x89a   :  { %1068 = vmatprep.subr.mxu1 %v3691_v11 }
 0x89b   :  { %1069 = vmatpush1.msra.mxu1 %v3693_v12 }
 0x89c   :  { %1070 = vmatprep.subr.mxu1 %v3696_v14 }
 0x89d   :  { %1071 = vmatpush1.msra.mxu1 %v3699_v15 }
 0x89e   :  { %1072 = vmatprep.subr.mxu1 %v3702_v16 }
 0x89f   :  { %1073 = vmatpush1.msra.mxu1 %v3712_v19 }
 0x8a0   :  { %1074 = vmatprep.subr.mxu1 %v3714_v20 }
 0x8a1   :  { %1075 = vmatpush1.msra.mxu1 %v3718_v21 }
 0x8a2   :  { %1076 = vmatprep.subr.mxu1 %v3720_v22 }
 0x8a3   :  { %1077 = vmatpush1.msra.mxu1 %v3733_v24 }
 0x8a4   :  { %1078 = vmatprep.subr.mxu1 %v3737_v26 }
 0x8a5   :  { %1079 = vmatpush1.msra.mxu1 %v3741_v27 }
 0x8a6   :  { %1080 = vmatprep.subr.mxu1 %v3745_v28 }
 0x8a7   :  { %1081 = vmatpush1.msra.mxu1 %v3749_v29 }
 0x8a8   :  { %1368 = vmatprep.subr.mxu1 %v3686_v9 }
 0x958   :  { %v808_v58 = vpop.f32.mrf.mxu1 }
 0x959   :  { %v829_v18 = vadd.f32 %v808_v58, %v3844_v34  ;;  %v822_v30 = vadd.f32 %v808_v58, %v3831_v59  ;;  %v849_v46 = vadd.f32 %v808_v58, %v3834_v63 }
 0x95a   :  { %v810_v25 = vpop.f32.mrf.mxu1 }
 0x95b   :  { %v863_v36 = vadd.f32 %v3725_v23, %v810_v25  ;;  %831 = vrot.lane.b32.xlu1 %v829_v18, %s3596_s29  ;;  %v3105_v31 = vmul.f32 -1.442695, %v822_v30  ;;  %v3106_v32 = vmul.f32 -1.442695, %v849_v46  ;;  %v850_v60 = vadd.f32 %v821_v53, %v810_v25 }
 0x95d   :  { %865 = vrot.lane.b32.xlu0 %v863_v36, %s3596_s29  ;;  %3265 = vpow2.f32 %v3105_v31  ;;  %v3107_v38 = vmul.f32 -1.442695, %v850_v60 }
 0x95e   :  { %3267 = vpow2.f32 %v3106_v32 }
 0x96a   :  { %v3266_v33 = vpop.eup %3265 }
 0x96b   :  { %v3268_v9 = vpop.eup %3267  ;;  %v826_v35 = vadd.f32 1.0, %v3266_v33 }
 0x96c   :  { %v857_v39 = vadd.f32 1.0, %v3268_v9 }
 0x96d   :  { %3269 = vrcp.f32 %v826_v35 }
 0x96e   :  { %3271 = vrcp.f32 %v857_v39 }
 0x97a   :  { %v3270_v42 = vpop.eup %3269 }
 0x97b   :  { %v3272_v47 = vpop.eup %3271  ;;  %v841_v7 = vsub.f32 1.0, %v3270_v42  ;;  %v847_v62 = vmul.f32 %v3270_v42, %v3944_v4 }
 0x9cd   :  { %v832_v43 = vpop.permute.xlu1 %831 }
 0x9ce   :  { %v834_v45 = vmul.f32 %v3270_v42, %v832_v43 }
 0x9cf   :  { %v866_v48 = vpop.permute.xlu0 %865 }
 0x9d0   :  { %v868_v49 = vmul.f32 %v3272_v47, %v866_v48  ;;  %836 = vrot.lane.b32.xlu1 %v834_v45, %s3596_s29  ;;  %v972_v47 = vld [vmem:[#allocation2 + $0x38] sm:$0xff] }
 0x9d2   :  { %870 = vrot.lane.b32.xlu0 %v868_v49, %s3596_s29 }
 0xa42   :  { %v837_v2 = vpop.permute.xlu1 %836 }
 0xa43   :  { %v839_v50 = vadd.f32 %v837_v2, %v3831_v59 }
 0xa44   :  { %v871_v56 = vpop.permute.xlu0 %870 }
 0xa45   :  { %3273 = vtanh.f32 %v839_v50  ;;  %v873_v57 = vadd.f32 %v871_v56, %v821_v53 }
 0xa47   :  { %3275 = vtanh.f32 %v873_v57 }
 0xa48   :  { %3277 = vpow2.f32 %v3107_v38 }
 0xa52   :  { %v3274_v37 = vpop.eup %3273 }
 0xa53   :  { %843 = vrot.lane.b32.xlu1 %v3274_v37, %s3597_s4 }
 0xa54   :  { %v3276_v52 = vpop.eup %3275 }
 0xa55   :  { %877 = vrot.lane.b32.xlu0 %v3276_v52, %s3597_s4  ;;  %v3278_v61 = vpop.eup %3277 }
 0xa56   :  { %v858_v3 = vadd.f32 1.0, %v3278_v61 }
 0xa58   :  { %3279 = vrcp.f32 %v858_v3 }
 0xa65   :  { %v3280_v5 = vpop.eup %3279 }
 0xa66   :  { %v875_v58 = vsub.f32 1.0, %v3280_v5  ;;  %v881_v46 = vmul.f32 %v3280_v5, %v3947_v8 }
 0xac5   :  { %v844_v54 = vpop.permute.xlu1 %843 }
 0xac6   :  { %v846_v13 = vmul.f32 %v844_v54, %v841_v7 }
 0xac7   :  { %v878_v18 = vpop.permute.xlu0 %877 }
 0xac8   :  { %v3987_v36 = vadd.f32 %v847_v62, %v846_v13  ;;  %v880_v30 = vmul.f32 %v878_v18, %v875_v58 }
 0xaca   :  { %v3990_v31 = vadd.f32 %v881_v46, %v880_v30  ;;  %884 = vrot.lane.b32.xlu1 %v3987_v36, %s3597_s4  ;;  %v3473_v30 = vld [vmem:[#allocation8 + $0x70] sm:$0xff]  ;;  %v3474_v46 = vld [vmem:[#allocation8 + $0x68] sm:$0xff] }
 0xacc   :  { %890 = vst.msk [vmem:[#allocation4 + $0x20] sm:$0xff] %vm128_vm0, %v3990_v31  ;;  %892 = vrot.lane.b32.xlu0 %v3990_v31, %s3595_s17 }
 0xb3c   :  { %v885_v4 = vpop.permute.xlu1 %884 }
 0xb3d   :  { %888 = vst.msk [vmem:[#allocation3 + $0x18] sm:$0xff] %vm128_vm0, %v885_v4 }
 0xb3e   :  { %v893_v25 = vpop.permute.xlu0 %892 }
 0xb3f   :  { %v895_v32 = vsel %vm128_vm0, %v885_v4, %v893_v25  ;;  %v3476_v4 = vld [vmem:[#allocation8 + $0x58] sm:$0xff]  ;;  %v3477_v25 = vld [vmem:[#allocation8 + $0x50] sm:$0xff] }
 0xb40   :  { %3108 = vmatmul.mubr.msk.f32.vlgmr.msra.gmra.mxu0 %vm215_vm1, %v895_v32  ;;  %v3478_v32 = vld [vmem:[#allocation8 + $0x48] sm:$0xff] }
 0xb41   :  { %1218 = vmatpush1.msra.mxu0 %v3688_v10  ;;  %1265 = vmatprep.mubr.f32.mxu0 %v3594_v1 }
 0xb42   :  { %1219 = vmatprep.subr.mxu0 %v3691_v11 }
 0xb43   :  { %1220 = vmatpush1.msra.mxu0 %v3693_v12 }
 0xb44   :  { %1221 = vmatprep.subr.mxu0 %v3696_v14 }
 0xb45   :  { %1222 = vmatpush1.msra.mxu0 %v3699_v15 }
 0xb46   :  { %1223 = vmatprep.subr.mxu0 %v3702_v16 }
 0xb47   :  { %1224 = vmatpush1.msra.mxu0 %v3712_v19 }
 0xb48   :  { %1225 = vmatprep.subr.mxu0 %v3714_v20 }
 0xb49   :  { %1226 = vmatpush1.msra.mxu0 %v3718_v21 }
 0xb4a   :  { %1227 = vmatprep.subr.mxu0 %v3720_v22 }
 0xb4b   :  { %1228 = vmatpush1.msra.mxu0 %v3733_v24 }
 0xb4c   :  { %1229 = vmatprep.subr.mxu0 %v3737_v26 }
 0xb4d   :  { %1230 = vmatpush1.msra.mxu0 %v3741_v27 }
 0xb4e   :  { %1231 = vmatprep.subr.mxu0 %v3745_v28 }
 0xb4f   :  { %1232 = vmatpush1.msra.mxu0 %v3749_v29 }
 0xc00   :  { %v965_v10 = vpop.f32.mrf.mxu0 }
 0xc01   :  { %v980_v11 = vadd.f32 %v965_v10, %v3844_v34  ;;  %v973_v15 = vadd.f32 %v965_v10, %v3834_v63  ;;  %v1000_v16 = vadd.f32 %v965_v10, %v3831_v59  ;;  %v3479_v10 = vld [vmem:[#allocation8 + $0x40] sm:$0xff] }
 0xc02   :  { %v967_v12 = vpop.f32.mrf.mxu0 }
 0xc03   :  { %v1014_v14 = vadd.f32 %v3725_v23, %v967_v12  ;;  %982 = vrot.lane.b32.xlu1 %v980_v11, %s3596_s29  ;;  %v3109_v19 = vmul.f32 -1.442695, %v973_v15  ;;  %v3110_v20 = vmul.f32 -1.442695, %v1000_v16  ;;  %v1001_v53 = vadd.f32 %v972_v47, %v967_v12  ;;  %v3480_v11 = vld [vmem:[#allocation8 + $0x38] sm:$0xff]  ;;  %v3481_v12 = vld [vmem:[#allocation8 + $0x30] sm:$0xff] }
 0xc05   :  { %1016 = vrot.lane.b32.xlu0 %v1014_v14, %s3596_s29  ;;  %3281 = vpow2.f32 %v3109_v19  ;;  %v3111_v56 = vmul.f32 -1.442695, %v1001_v53  ;;  %v3482_v14 = vld [vmem:[#allocation8 + $0x28] sm:$0xff] }
 0xc06   :  { %3283 = vpow2.f32 %v3110_v20  ;;  %v4053_v20 = vld [vmem:[%s4686_s5] ss:$0 sm:$0xff]  ;;  %s3560_s5 = scalar_lea.vmem %s3061_s21, 512 }
 0xc07   :  { %p3561_p1 = scmp.ne.s32.totalorder %s3061_s21, %s3560_s5  ;;  %p3566_p3 = scmp.lt.s32.totalorder %s3560_s5, %s3560_s5 }
 0xc09   :  { %p3567_p4 = por %p3566_p3, %p3565_p2 }
 0xc0b   :  { %p3568_p5 = pnand %p3567_p4, %p3561_p1 }
 0xc12   :  { %v3282_v21 = vpop.eup %3281 }
 0xc13   :  { %v3284_v22 = vpop.eup %3283  ;;  %v977_v8 = vadd.f32 1.0, %v3282_v21 }
 0xc14   :  { %v1008_v33 = vadd.f32 1.0, %v3284_v22 }
 0xc15   :  { %3285 = vrcp.f32 %v977_v8 }
 0xc16   :  { %3287 = vrcp.f32 %v1008_v33 }
 0xc22   :  { %v3286_v9 = vpop.eup %3285 }
 0xc23   :  { %v3288_v39 = vpop.eup %3287  ;;  %v992_v60 = vsub.f32 1.0, %v3286_v9  ;;  %v998_v38 = vmul.f32 %v3286_v9, %v3987_v36 }
 0xc75   :  { %v983_v23 = vpop.permute.xlu1 %982 }
 0xc76   :  { %v985_v35 = vmul.f32 %v3286_v9, %v983_v23 }
 0xc77   :  { %v1017_v42 = vpop.permute.xlu0 %1016 }
 0xc78   :  { %v1019_v43 = vmul.f32 %v3288_v39, %v1017_v42  ;;  %987 = vrot.lane.b32.xlu1 %v985_v35, %s3596_s29 }
 0xc7a   :  { %1021 = vrot.lane.b32.xlu0 %v1019_v43, %s3596_s29 }
 0xcea   :  { %v988_v59 = vpop.permute.xlu1 %987 }
 0xceb   :  { %v990_v45 = vadd.f32 %v988_v59, %v3834_v63 }
 0xcec   :  { %v1022_v48 = vpop.permute.xlu0 %1021 }
 0xced   :  { %3289 = vtanh.f32 %v990_v45  ;;  %v1024_v49 = vadd.f32 %v1022_v48, %v972_v47  ;;  %v1123_v45 = vld [vmem:[#allocation2 + $0x28] sm:$0xff] }
 0xcef   :  { %3291 = vtanh.f32 %v1024_v49 }
 0xcf0   :  { %3293 = vpow2.f32 %v3111_v56 }
 0xcfa   :  { %v3290_v2 = vpop.eup %3289 }
 0xcfb   :  { %994 = vrot.lane.b32.xlu1 %v3290_v2, %s3597_s4 }
 0xcfc   :  { %v3292_v50 = vpop.eup %3291 }
 0xcfd   :  { %1028 = vrot.lane.b32.xlu0 %v3292_v50, %s3597_s4  ;;  %v3294_v57 = vpop.eup %3293 }
 0xcfe   :  { %v1009_v37 = vadd.f32 1.0, %v3294_v57 }
 0xd00   :  { %3295 = vrcp.f32 %v1009_v37 }
 0xd0d   :  { %v3296_v52 = vpop.eup %3295 }
 0xd0e   :  { %v1026_v3 = vsub.f32 1.0, %v3296_v52  ;;  %v1032_v62 = vmul.f32 %v3296_v52, %v3990_v31  ;;  %v3475_v31 = vld [vmem:[#allocation8 + $0x60] sm:$0xff] }
 0xd6d   :  { %v995_v63 = vpop.permute.xlu1 %994 }
 0xd6e   :  { %v997_v61 = vmul.f32 %v995_v63, %v992_v60 }
 0xd6f   :  { %v1029_v5 = vpop.permute.xlu0 %1028 }
 0xd70   :  { %v4029_v7 = vadd.f32 %v998_v38, %v997_v61  ;;  %v1031_v54 = vmul.f32 %v1029_v5, %v1026_v3 }
 0xd72   :  { %v4032_v13 = vadd.f32 %v1032_v62, %v1031_v54  ;;  %1035 = vrot.lane.b32.xlu1 %v4029_v7, %s3597_s4 }
 0xd74   :  { %1041 = vst.msk [vmem:[#allocation4 + $0x18] sm:$0xff] %vm128_vm0, %v4032_v13  ;;  %1043 = vrot.lane.b32.xlu0 %v4032_v13, %s3595_s17 }
 0xde4   :  { %v1036_v58 = vpop.permute.xlu1 %1035 }
 0xde5   :  { %1039 = vst.msk [vmem:[#allocation3 + $0x20] sm:$0xff] %vm128_vm0, %v1036_v58 }
 0xde6   :  { %v1044_v18 = vpop.permute.xlu0 %1043 }
 0xde7   :  { %v1046_v36 = vsel %vm128_vm0, %v1036_v58, %v1044_v18 }
 0xde8   :  { %3112 = vmatmul.mubr.msk.f32.vlgmr.msra.gmra.mxu1 %vm215_vm1, %v1046_v36 }
 0xde9   :  { %1369 = vmatpush1.msra.mxu1 %v3473_v30  ;;  %1416 = vmatprep.mubr.f32.mxu1 %v3594_v1 }
 0xdea   :  { %1370 = vmatprep.subr.mxu1 %v3474_v46 }
 0xdeb   :  { %1371 = vmatpush1.msra.mxu1 %v3475_v31 }
 0xdec   :  { %1372 = vmatprep.subr.mxu1 %v3476_v4 }
 0xded   :  { %1373 = vmatpush1.msra.mxu1 %v3477_v25 }
 0xdee   :  { %1374 = vmatprep.subr.mxu1 %v3478_v32 }
 0xdef   :  { %1375 = vmatpush1.msra.mxu1 %v3479_v10 }
 0xdf0   :  { %1376 = vmatprep.subr.mxu1 %v3480_v11 }
 0xdf1   :  { %1377 = vmatpush1.msra.mxu1 %v3481_v12 }
 0xdf2   :  { %1378 = vmatprep.subr.mxu1 %v3482_v14 }
 0xdf3   :  { %1379 = vmatpush1.msra.mxu1 %v3733_v24 }
 0xdf4   :  { %1380 = vmatprep.subr.mxu1 %v3737_v26 }
 0xdf5   :  { %1381 = vmatpush1.msra.mxu1 %v3741_v27 }
 0xdf6   :  { %1382 = vmatprep.subr.mxu1 %v3745_v28 }
 0xdf7   :  { %1383 = vmatpush1.msra.mxu1 %v3749_v29 }
 0xea8   :  { %v1116_v15 = vpop.f32.mrf.mxu1 }
 0xea9   :  { %v1131_v16 = vadd.f32 %v1116_v15, %v3844_v34  ;;  %v1124_v24 = vadd.f32 %v1116_v15, %v3837_v6  ;;  %v1151_v26 = vadd.f32 %v1116_v15, %v3828_v55 }
 0xeaa   :  { %v1118_v19 = vpop.f32.mrf.mxu1 }
 0xeab   :  { %v1165_v21 = vadd.f32 %v4053_v20, %v1118_v19  ;;  %1133 = vrot.lane.b32.xlu1 %v1131_v16, %s3596_s29  ;;  %v3113_v27 = vmul.f32 -1.442695, %v1124_v24  ;;  %v3114_v28 = vmul.f32 -1.442695, %v1151_v26  ;;  %v1152_v50 = vadd.f32 %v1123_v45, %v1118_v19 }
 0xead   :  { %1167 = vrot.lane.b32.xlu0 %v1165_v21, %s3596_s29  ;;  %3297 = vpow2.f32 %v3113_v27  ;;  %v3115_v53 = vmul.f32 -1.442695, %v1152_v50 }
 0xeae   :  { %3299 = vpow2.f32 %v3114_v28  ;;  %v1274_v28 = vld [vmem:[#allocation2 + $0x18] sm:$0xff] }
 0xeba   :  { %v3298_v29 = vpop.eup %3297 }
 0xebb   :  { %v3300_v22 = vpop.eup %3299  ;;  %v1128_v8 = vadd.f32 1.0, %v3298_v29 }
 0xebc   :  { %v1159_v33 = vadd.f32 1.0, %v3300_v22 }
 0xebd   :  { %3301 = vrcp.f32 %v1128_v8 }
 0xebe   :  { %3303 = vrcp.f32 %v1159_v33 }
 0xeca   :  { %v3302_v9 = vpop.eup %3301 }
 0xecb   :  { %v3304_v39 = vpop.eup %3303  ;;  %v1143_v52 = vsub.f32 1.0, %v3302_v9  ;;  %v1149_v60 = vmul.f32 %v3302_v9, %v4029_v7 }
 0xf1d   :  { %v1134_v23 = vpop.permute.xlu1 %1133 }
 0xf1e   :  { %v1136_v35 = vmul.f32 %v3302_v9, %v1134_v23 }
 0xf1f   :  { %v1168_v42 = vpop.permute.xlu0 %1167 }
 0xf20   :  { %v1170_v43 = vmul.f32 %v3304_v39, %v1168_v42  ;;  %1138 = vrot.lane.b32.xlu1 %v1136_v35, %s3596_s29 }
 0xf22   :  { %1172 = vrot.lane.b32.xlu0 %v1170_v43, %s3596_s29 }
 0xf92   :  { %v1139_v55 = vpop.permute.xlu1 %1138 }
 0xf93   :  { %v1141_v59 = vadd.f32 %v1139_v55, %v3837_v6 }
 0xf94   :  { %v1173_v47 = vpop.permute.xlu0 %1172 }
 0xf95   :  { %3305 = vtanh.f32 %v1141_v59  ;;  %v1175_v48 = vadd.f32 %v1173_v47, %v1123_v45 }
 0xf97   :  { %3307 = vtanh.f32 %v1175_v48 }
 0xf98   :  { %3309 = vpow2.f32 %v3115_v53 }
 0xfa2   :  { %v3306_v49 = vpop.eup %3305 }
 0xfa3   :  { %1145 = vrot.lane.b32.xlu1 %v3306_v49, %s3597_s4 }
 0xfa4   :  { %v3308_v2 = vpop.eup %3307 }
 0xfa5   :  { %1179 = vrot.lane.b32.xlu0 %v3308_v2, %s3597_s4  ;;  %v3310_v56 = vpop.eup %3309 }
 0xfa6   :  { %v1160_v57 = vadd.f32 1.0, %v3310_v56 }
 0xfa8   :  { %3311 = vrcp.f32 %v1160_v57  ;;  %v3205_v57 = vld [vmem:[%s4687_s6 + $0x10] ss:$8 sps:$4 sm:$0xff]  }
 0xfb5   :  { %v3312_v37 = vpop.eup %3311 }
 0xfb6   :  { %v1177_v38 = vsub.f32 1.0, %v3312_v37  ;;  %v1183_v54 = vmul.f32 %v3312_v37, %v4032_v13 }
0x1015   :  { %v1146_v6 = vpop.permute.xlu1 %1145 }
0x1016   :  { %v1148_v63 = vmul.f32 %v1146_v6, %v1143_v52  ;;  %v3210_v52 = vld [vmem:[%s4687_s6 + $0x4] ss:$8 sps:$4 sm:$0xff]  }
0x1017   :  { %v1180_v61 = vpop.permute.xlu0 %1179 }
0x1018   :  { %v1150_v3 = vadd.f32 %v1149_v60, %v1148_v63  ;;  %v1182_v5 = vmul.f32 %v1180_v61, %v1177_v38  ;;  %v3208_v60 = vld [vmem:[%s4687_s6] ss:$8 sps:$4 sm:$0xff]  }
0x1019   :  { %v1498_v63 = vld [vmem:[#allocation3 + $0x8] sm:$0xff]  ;;  %v1497_v38 = vld [vmem:[#allocation3] sm:$0xff] }
0x101a   :  { %v4067_v62 = vadd.f32 %v1183_v54, %v1182_v5  ;;  %1186 = vrot.lane.b32.xlu1 %v1150_v3, %s3597_s4  ;;  %v1505_v61 = vpack.c.bf16 %v1498_v63, %v1497_v38  ;;  %v1499_v5 = vld [vmem:[#allocation3 + $0x10] sm:$0xff] }
0x101c   :  { %1192 = vst.msk [vmem:[#allocation4 + $0x10] sm:$0xff] %vm128_vm0, %v4067_v62  ;;  %1194 = vrot.lane.b32.xlu0 %v4067_v62, %s3595_s17 }
0x108c   :  { %v1187_v58 = vpop.permute.xlu1 %1186 }
0x108d   :  { %1190 = vst.msk [vmem:[#allocation3 + $0x28] sm:$0xff] %vm128_vm0, %v1187_v58 }
0x108e   :  { %v1195_v7 = vpop.permute.xlu0 %1194 }
0x108f   :  { %v1197_v18 = vsel %vm128_vm0, %v1187_v58, %v1195_v7  ;;  %v1501_v58 = vld [vmem:[#allocation3 + $0x20] sm:$0xff] }
0x1090   :  { %3116 = vmatmul.mubr.msk.f32.vlgmr.msra.gmra.mxu0 %vm215_vm1, %v1197_v18 }
0x1091   :  { %1594 = vmatprep.mubr.bf16.mxu0 %v3593_v0 }
0x1150   :  { %v1267_v13 = vpop.f32.mrf.mxu0 }
0x1151   :  { %v1282_v36 = vadd.f32 %v1267_v13, %v3844_v34  ;;  %v1275_v31 = vadd.f32 %v1267_v13, %v3840_v17  ;;  %v1302_v4 = vadd.f32 %v1267_v13, %v3825_v51 }
0x1152   :  { %v1269_v30 = vpop.f32.mrf.mxu0 }
0x1153   :  { %v1316_v46 = vadd.f32 %v4053_v20, %v1269_v30  ;;  %1284 = vrot.lane.b32.xlu1 %v1282_v36, %s3596_s29  ;;  %v3117_v25 = vmul.f32 -1.442695, %v1275_v31  ;;  %v3118_v32 = vmul.f32 -1.442695, %v1302_v4  ;;  %v1303_v9 = vadd.f32 %v1274_v28, %v1269_v30  ;;  %v1424_v4 = vld [vmem:[#allocation2] sm:$0xff] }
0x1155   :  { %1318 = vrot.lane.b32.xlu0 %v1316_v46, %s3596_s29  ;;  %3313 = vpow2.f32 %v3117_v25  ;;  %v3119_v23 = vmul.f32 -1.442695, %v1303_v9  ;;  %v1423_v46 = vld [vmem:[#allocation2 + $0x70] sm:$0xff]  ;;  %v3214_v9 = vld [vmem:[%s4687_s6 + $0x20] ss:$8 sps:$4 sm:$0xff]  }
0x1156   :  { %3315 = vpow2.f32 %v3118_v32 }
0x1162   :  { %v3314_v10 = vpop.eup %3313 }
0x1163   :  { %v3316_v11 = vpop.eup %3315  ;;  %v1279_v12 = vadd.f32 1.0, %v3314_v10 }
0x1164   :  { %v1310_v14 = vadd.f32 1.0, %v3316_v11 }
0x1165   :  { %3317 = vrcp.f32 %v1279_v12 }
0x1166   :  { %3319 = vrcp.f32 %v1310_v14 }
0x1172   :  { %v3318_v15 = vpop.eup %3317 }
0x1173   :  { %v3320_v21 = vpop.eup %3319  ;;  %v1294_v43 = vsub.f32 1.0, %v3318_v15  ;;  %v1300_v59 = vmul.f32 %v3318_v15, %v1150_v3  ;;  %v1500_v3 = vld [vmem:[#allocation3 + $0x18] sm:$0xff] }
0x1174   :  { %v1506_v54 = vpack.c.bf16 %v1500_v3, %v1499_v5  ;;  %v4209_v5 = vld [vmem:[%s4690_s9] ss:$0 sm:$0xff] }
0x11c5   :  { %v1285_v16 = vpop.permute.xlu1 %1284 }
0x11c6   :  { %v1287_v19 = vmul.f32 %v3318_v15, %v1285_v16 }
0x11c7   :  { %v1319_v24 = vpop.permute.xlu0 %1318 }
0x11c8   :  { %v1321_v26 = vmul.f32 %v3320_v21, %v1319_v24  ;;  %1289 = vrot.lane.b32.xlu1 %v1287_v19, %s3596_s29 }
0x11ca   :  { %1323 = vrot.lane.b32.xlu0 %v1321_v26, %s3596_s29 }
0x123a   :  { %v1290_v51 = vpop.permute.xlu1 %1289 }
0x123b   :  { %v1292_v27 = vadd.f32 %v1290_v51, %v3840_v17  ;;  %v3207_v17 = vld [vmem:[%s4687_s6 + $0x14] ss:$8 sps:$4 sm:$0xff]  }
0x123c   :  { %v1324_v29 = vpop.permute.xlu0 %1323  ;;  %1679 = vmatprep.subr.bf16.mxu1 %v3207_v17  ;;  %v4155_v17 = vld [vmem:[#allocation10 + $0x78] sm:$0xff] }
0x123d   :  { %3321 = vtanh.f32 %v1292_v27  ;;  %v1326_v22 = vadd.f32 %v1324_v29, %v1274_v28  ;;  %v1425_v27 = vld [vmem:[#allocation2 + $0x8] sm:$0xff] }
0x123f   :  { %3323 = vtanh.f32 %v1326_v22  ;;  %v3211_v22 = vld [vmem:[%s4687_s6 + $0x30] ss:$8 sps:$4 sm:$0xff]  }
0x1240   :  { %3325 = vpow2.f32 %v3119_v23 }
0x124a   :  { %v3322_v8 = vpop.eup %3321 }
0x124b   :  { %1296 = vrot.lane.b32.xlu1 %v3322_v8, %s3597_s4  ;;  %v3213_v8 = vld [vmem:[%s4687_s6 + $0x34] ss:$8 sps:$4 sm:$0xff]  }
0x124c   :  { %v3324_v33 = vpop.eup %3323  ;;  %1574 = vmatprep.subr.bf16.mxu0 %v3213_v8 }
0x124d   :  { %1330 = vrot.lane.b32.xlu0 %v3324_v33, %s3597_s4  ;;  %v3326_v35 = vpop.eup %3325  ;;  %v3216_v33 = vld [vmem:[%s4687_s6 + $0x24] ss:$8 sps:$4 sm:$0xff]   ;;  %1575 = vmatpush1.bf16.msra.mxu0 %v3211_v22 }
0x124e   :  { %v1311_v39 = vadd.f32 1.0, %v3326_v35  ;;  %1576 = vmatprep.subr.bf16.mxu0 %v3216_v33 }
0x1250   :  { %3327 = vrcp.f32 %v1311_v39  ;;  %v4150_v39 = vld [vmem:[%s4682_s1 + $0x18] sm:$0xff] }
0x1251   :  { %1577 = vmatpush1.bf16.msra.mxu0 %v3214_v9  ;;  %v1740_v9 = vld [vmem:[%s4689_s8] sm:$0x3] }
0x1252   :  { %1835 = vmatprep.subr.mxu0 %v4155_v17 }
0x125d   :  { %v3328_v42 = vpop.eup %3327 }
0x125e   :  { %v1328_v47 = vsub.f32 1.0, %v3328_v42  ;;  %v1334_v50 = vmul.f32 %v3328_v42, %v4067_v62  ;;  %v1502_v62 = vld [vmem:[#allocation3 + $0x28] sm:$0xff]  ;;  %v4158_v42 = vld [vmem:[#allocation10 + $0x70] sm:$0xff] }
0x125f   :  { %v1507_v7 = vpack.c.bf16 %v1502_v62, %v1501_v58 }
0x12bd   :  { %v1297_v55 = vpop.permute.xlu1 %1296 }
0x12be   :  { %v1299_v45 = vmul.f32 %v1297_v55, %v1294_v43  ;;  %v4161_v43 = vld [vmem:[#allocation10 + $0x68] sm:$0xff]  ;;  %v4164_v55 = vld [vmem:[#allocation10 + $0x60] sm:$0xff] }
0x12bf   :  { %v1331_v48 = vpop.permute.xlu0 %1330 }
0x12c0   :  { %v4092_v49 = vadd.f32 %v1300_v59, %v1299_v45  ;;  %v1333_v2 = vmul.f32 %v1331_v48, %v1328_v47  ;;  %v4168_v59 = vld [vmem:[#allocation10 + $0x58] sm:$0xff]  ;;  %v4170_v45 = vld [vmem:[#allocation10 + $0x50] sm:$0xff]  ;;  %v4173_v47 = vld [vmem:[#allocation10 + $0x48] sm:$0xff] }
0x12c1   :  { %v4176_v48 = vld [vmem:[#allocation10 + $0x40] sm:$0xff] }
0x12c2   :  { %v4095_v53 = vadd.f32 %v1334_v50, %v1333_v2  ;;  %1337 = vrot.lane.b32.xlu1 %v4092_v49, %s3597_s4  ;;  %v4180_v2 = vld [vmem:[#allocation10 + $0x38] sm:$0xff]  ;;  %v4182_v50 = vld [vmem:[#allocation10 + $0x30] sm:$0xff] }
0x12c4   :  { %1343 = vst.msk [vmem:[#allocation4 + $0x8] sm:$0xff] %vm128_vm0, %v4095_v53  ;;  %1345 = vrot.lane.b32.xlu0 %v4095_v53, %s3595_s17 }
0x1334   :  { %v1338_v56 = vpop.permute.xlu1 %1337 }
0x1335   :  { %1341 = vst.msk [vmem:[#allocation3 + $0x30] sm:$0xff] %vm128_vm0, %v1338_v56 }
0x1336   :  { %v1346_v37 = vpop.permute.xlu0 %1345 }
0x1337   :  { %v1348_v6 = vsel %vm128_vm0, %v1338_v56, %v1346_v37  ;;  %v4185_v56 = vld [vmem:[#allocation10 + $0x28] sm:$0xff]  ;;  %v4191_v37 = vld [vmem:[#allocation10 + $0x18] sm:$0xff] }
0x1338   :  { %3120 = vmatmul.mubr.msk.f32.vlgmr.msra.gmra.mxu1 %vm215_vm1, %v1348_v6  ;;  %v4197_v6 = vld [vmem:[#allocation10 + $0x8] sm:$0xff] }
0x1339   :  { %1680 = vmatpush1.bf16.msra.mxu1 %v3205_v57  ;;  %1699 = vmatprep.mubr.bf16.mxu1 %v3593_v0  ;;  %v4188_v57 = vld [vmem:[#allocation10 + $0x20] sm:$0xff] }
0x133a   :  { %1681 = vmatprep.subr.bf16.mxu1 %v3210_v52  ;;  %v4194_v52 = vld [vmem:[#allocation10 + $0x10] sm:$0xff] }
0x133d   :  { %1682 = vmatpush1.bf16.msra.mxu1 %v3208_v60  ;;  %v4200_v60 = vld [vmem:[#allocation10] sm:$0xff] }
0x133e   :  { %1991 = vmatprep.subr.mxu1 %v4155_v17 }
0x1340   :  { %3140 = vmatmul.mubr.msk.bf16.vlgmr.msra.gmra.mxu1 %vm128_vm0, %v1505_v61 }
0x1341   :  { %1709 = vmatprep.mubr.bf16.mxu1 %v3593_v0  ;;  %1992 = vmatpush1.msra.mxu1 %v4158_v42 }
0x1342   :  { %1993 = vmatprep.subr.mxu1 %v4161_v43 }
0x1343   :  { %1994 = vmatpush1.msra.mxu1 %v4164_v55 }
0x1344   :  { %1995 = vmatprep.subr.mxu1 %v4168_v59 }
0x1345   :  { %1996 = vmatpush1.msra.mxu1 %v4170_v45 }
0x1346   :  { %1997 = vmatprep.subr.mxu1 %v4173_v47 }
0x1347   :  { %1998 = vmatpush1.msra.mxu1 %v4176_v48 }
0x1348   :  { %3141 = vmatmul.mubr.msk.bf16.gmra.mxu1 %vm128_vm0, %v1506_v54  ;;  %1999 = vmatprep.subr.mxu1 %v4180_v2 }
0x1349   :  { %1719 = vmatprep.mubr.bf16.mxu1 %v3593_v0  ;;  %2000 = vmatpush1.msra.mxu1 %v4182_v50 }
0x134a   :  { %2001 = vmatprep.subr.mxu1 %v4185_v56 }
0x134b   :  { %2002 = vmatpush1.msra.mxu1 %v4188_v57 }
0x134c   :  { %2003 = vmatprep.subr.mxu1 %v4191_v37 }
0x134d   :  { %2004 = vmatpush1.msra.mxu1 %v4194_v52 }
0x134e   :  { %2005 = vmatprep.subr.mxu1 %v4197_v6 }
0x134f   :  { %2006 = vmatpush1.msra.mxu1 %v4200_v60 }
0x1350   :  { %3142 = vmatmul.mubr.msk.bf16.gmra.mxu1 %vm128_vm0, %v1507_v7  ;;  %2291 = vmatprep.subr.mxu1 %v4155_v17 }
0x1351   :  { %1729 = vmatprep.mubr.bf16.mxu1 %v3593_v0 }
0x13f8   :  { %v1418_v18 = vpop.f32.mrf.mxu1 }
0x13f9   :  { %v1433_v13 = vadd.f32 %v1418_v18, %v3844_v34  ;;  %v1426_v31 = vadd.f32 %v1423_v46, %v1418_v18  ;;  %v1453_v25 = vadd.f32 %v1424_v4, %v1418_v18 }
0x13fa   :  { %v4123_v36 = vpop.f32.mrf.mxu1 }
0x13fb   :  { %v1467_v30 = vadd.f32 %v4053_v20, %v4123_v36  ;;  %1435 = vrot.lane.b32.xlu1 %v1433_v13, %s3596_s29  ;;  %v3121_v32 = vmul.f32 -1.442695, %v1426_v31  ;;  %v3122_v10 = vmul.f32 -1.442695, %v1453_v25  ;;  %v1454_v63 = vadd.f32 %v1425_v27, %v4123_v36 }
0x13fd   :  { %1469 = vrot.lane.b32.xlu0 %v1467_v30, %s3596_s29  ;;  %3329 = vpow2.f32 %v3121_v32  ;;  %v3123_v38 = vmul.f32 -1.442695, %v1454_v63  ;;  %v1514_v32 = vld [vmem:[#allocation4 + $0x8] sm:$0xff] }
0x13fe   :  { %3331 = vpow2.f32 %v3122_v10 }
0x140a   :  { %v3330_v11 = vpop.eup %3329 }
0x140b   :  { %v3332_v12 = vpop.eup %3331  ;;  %v1430_v34 = vadd.f32 1.0, %v3330_v11 }
0x140c   :  { %v1461_v14 = vadd.f32 1.0, %v3332_v12  ;;  %v1517_v12 = vld [vmem:[#allocation4 + $0x20] sm:$0xff] }
0x140d   :  { %3333 = vrcp.f32 %v1430_v34  ;;  %v1518_v34 = vld [vmem:[#allocation4 + $0x28] sm:$0xff] }
0x140e   :  { %3335 = vrcp.f32 %v1461_v14  ;;  %v1523_v14 = vpack.c.bf16 %v1518_v34, %v1517_v12 }
0x141a   :  { %v4129_v15 = vpop.eup %3333 }
0x141b   :  { %v3336_v19 = vpop.eup %3335  ;;  %v1445_v62 = vsub.f32 1.0, %v4129_v15  ;;  %v1451_v7 = vmul.f32 %v4129_v15, %v4092_v49  ;;  %v1515_v49 = vld [vmem:[#allocation4 + $0x10] sm:$0xff] }
0x146d   :  { %v1436_v20 = vpop.permute.xlu1 %1435 }
0x146e   :  { %v1438_v16 = vmul.f32 %v4129_v15, %v1436_v20  ;;  %v1519_v15 = vld [vmem:[#allocation4 + $0x30] sm:$0xff]  ;;  %v1520_v20 = vld [vmem:[#allocation4 + $0x38] sm:$0xff] }
0x146f   :  { %v1470_v21 = vpop.permute.xlu0 %1469 }
0x1470   :  { %v1472_v24 = vmul.f32 %v3336_v19, %v1470_v21  ;;  %1440 = vrot.lane.b32.xlu1 %v1438_v16, %s3596_s29  ;;  %v1524_v16 = vpack.c.bf16 %v1520_v20, %v1519_v15  ;;  %v4247_v19 = vld [vmem:[%s4682_s1 + $0x10] sm:$0xff] }
0x1472   :  { %1474 = vrot.lane.b32.xlu0 %v1472_v24, %s3596_s29 }
0x14e2   :  { %v1441_v26 = vpop.permute.xlu1 %1440 }
0x14e3   :  { %v1443_v51 = vadd.f32 %v1441_v26, %v1423_v46  ;;  %v1503_v26 = vld [vmem:[#allocation3 + $0x30] sm:$0xff] }
0x14e4   :  { %v1475_v28 = vpop.permute.xlu0 %1474 }
0x14e5   :  { %3337 = vtanh.f32 %v1443_v51  ;;  %v1477_v29 = vadd.f32 %v1475_v28, %v1425_v27  ;;  %v1701_v28 = vpop.f32.mrf.mxu1 }
0x14e7   :  { %3339 = vtanh.f32 %v1477_v29  ;;  %v1703_v29 = vpop.f32.mrf.mxu1 }
0x14e8   :  { %3341 = vpow2.f32 %v3123_v38 }
0x14e9   :  { %v1705_v22 = vpop.f32.mrf.mxu1 }
0x14eb   :  { %v1707_v8 = vpop.f32.mrf.mxu1 }
0x14ed   :  { %v1711_v33 = vpop.f32.mrf.mxu1 }
0x14f2   :  { %v3338_v23 = vpop.eup %3337 }
0x14f3   :  { %1447 = vrot.lane.b32.xlu1 %v3338_v23, %s3597_s4  ;;  %v1713_v23 = vpop.f32.mrf.mxu1 }
0x14f4   :  { %v3340_v35 = vpop.eup %3339 }
0x14f5   :  { %1481 = vrot.lane.b32.xlu0 %v3340_v35, %s3597_s4  ;;  %v3342_v61 = vpop.eup %3341  ;;  %v4278_v35 = vrot.slane %v1740_v9, %v100_v41 }
0x14f6   :  { %v1462_v3 = vadd.f32 1.0, %v3342_v61  ;;  %v4282_v61 = vrot.slane %v1740_v9, %v104_v44 }
0x14f7   :  { %1812 = vrot.lane.b32.xlu1 %v4150_v39, %s3595_s17 }
0x14f8   :  { %3343 = vrcp.f32 %v1462_v3  ;;  %v1715_v3 = vpop.f32.mrf.mxu1 }
0x14fa   :  { %v1717_v41 = vpop.f32.mrf.mxu1 }
0x14fb   :  { %1900 = vrot.lane.b32.xlu1 %v4209_v5, %s3596_s29 }
0x1505   :  { %v3344_v54 = vpop.eup %3343 }
0x1506   :  { %v1479_v13 = vsub.f32 1.0, %v3344_v54  ;;  %v1485_v31 = vmul.f32 %v3344_v54, %v4095_v53  ;;  %v1516_v53 = vld [vmem:[#allocation4 + $0x18] sm:$0xff] }
0x1507   :  { %v1522_v11 = vpack.c.bf16 %v1516_v53, %v1515_v49 }
0x1565   :  { %v1448_v58 = vpop.permute.xlu1 %1447 }
0x1566   :  { %v1450_v18 = vmul.f32 %v1448_v58, %v1445_v62 }
0x1567   :  { %v1482_v36 = vpop.permute.xlu0 %1481 }
0x1568   :  { %v1452_v30 = vadd.f32 %v1451_v7, %v1450_v18  ;;  %v1484_v46 = vmul.f32 %v1482_v36, %v1479_v13 }
0x1569   :  { %v1813_v21 = vpop.permute.xlu1 %1812 }
0x156a   :  { %v1486_v4 = vadd.f32 %v1485_v31, %v1484_v46  ;;  %1488 = vrot.lane.b32.xlu0 %v1452_v30, %s3597_s4  ;;  %v1815_v24 = vsel %vm128_vm0, %v4247_v19, %v1813_v21 }
0x156c   :  { %1493 = vst.msk [vmem:[#allocation4] sm:$0xff] %vm128_vm0, %v1486_v4  ;;  %1496 = vst.msk [vmem:[#allocation11 + $0x8] sm:$0xff] %vm128_vm0, %v1486_v4  ;;  %v1721_v4 = vpop.f32.mrf.mxu1 }
0x156e   :  { %v1723_v12 = vpop.f32.mrf.mxu1 }
0x1573   :  { %v1513_v25 = vld [vmem:[#allocation4] sm:$0xff] }
0x1574   :  { %v1521_v10 = vpack.c.bf16 %v1514_v32, %v1513_v25 }
0x1576   :  { %3132 = vmatmul.mubr.msk.bf16.vlgmr.msra.gmra.mxu0 %vm128_vm0, %v1521_v10 }
0x1577   :  { %1604 = vmatprep.mubr.bf16.mxu0 %v3593_v0  ;;  %1836 = vmatpush1.msra.mxu0 %v4158_v42 }
0x1578   :  { %1837 = vmatprep.subr.mxu0 %v4161_v43 }
0x1579   :  { %1838 = vmatpush1.msra.mxu0 %v4164_v55 }
0x157a   :  { %1839 = vmatprep.subr.mxu0 %v4168_v59 }
0x157b   :  { %1840 = vmatpush1.msra.mxu0 %v4170_v45 }
0x157c   :  { %1841 = vmatprep.subr.mxu0 %v4173_v47 }
0x157d   :  { %1842 = vmatpush1.msra.mxu0 %v4176_v48 }
0x157e   :  { %3133 = vmatmul.mubr.msk.bf16.gmra.mxu0 %vm128_vm0, %v1522_v11  ;;  %1843 = vmatprep.subr.mxu0 %v4180_v2 }
0x157f   :  { %1614 = vmatprep.mubr.bf16.mxu0 %v3593_v0  ;;  %1844 = vmatpush1.msra.mxu0 %v4182_v50 }
0x1580   :  { %1845 = vmatprep.subr.mxu0 %v4185_v56 }
0x1581   :  { %1846 = vmatpush1.msra.mxu0 %v4188_v57 }
0x1582   :  { %1847 = vmatprep.subr.mxu0 %v4191_v37 }
0x1583   :  { %1848 = vmatpush1.msra.mxu0 %v4194_v52 }
0x1584   :  { %1849 = vmatprep.subr.mxu0 %v4197_v6 }
0x1585   :  { %1850 = vmatpush1.msra.mxu0 %v4200_v60 }
0x1586   :  { %3134 = vmatmul.mubr.msk.bf16.gmra.mxu0 %vm128_vm0, %v1523_v14  ;;  %2141 = vmatprep.subr.mxu0 %v4155_v17 }
0x1587   :  { %1624 = vmatprep.mubr.bf16.mxu0 %v3593_v0 }
0x158e   :  { %3135 = vmatmul.mubr.msk.bf16.gmra.mxu0 %vm128_vm0, %v1524_v16 }
0x158f   :  { %1883 = vmatprep.mubr.f32.mxu0 %v3594_v1 }
0x1596   :  { %3147 = vmatmul.mubr.msk.f32.vlgmr.msra.gmra.mxu0 %vm215_vm1, %v1815_v24  ;;  %v1725_v24 = vpop.f32.mrf.mxu1 }
0x1597   :  { %2142 = vmatpush1.msra.mxu0 %v4158_v42  ;;  %2189 = vmatprep.mubr.f32.mxu0 %v3594_v1 }
0x1598   :  { %2143 = vmatprep.subr.mxu0 %v4161_v43 }
0x1599   :  { %2144 = vmatpush1.msra.mxu0 %v4164_v55 }
0x159a   :  { %2145 = vmatprep.subr.mxu0 %v4168_v59 }
0x159b   :  { %2146 = vmatpush1.msra.mxu0 %v4170_v45 }
0x159c   :  { %2147 = vmatprep.subr.mxu0 %v4173_v47 }
0x159d   :  { %2148 = vmatpush1.msra.mxu0 %v4176_v48 }
0x159e   :  { %2149 = vmatprep.subr.mxu0 %v4180_v2 }
0x159f   :  { %2150 = vmatpush1.msra.mxu0 %v4182_v50 }
0x15a0   :  { %2151 = vmatprep.subr.mxu0 %v4185_v56 }
0x15a1   :  { %2152 = vmatpush1.msra.mxu0 %v4188_v57 }
0x15a2   :  { %2153 = vmatprep.subr.mxu0 %v4191_v37 }
0x15a3   :  { %2154 = vmatpush1.msra.mxu0 %v4194_v52 }
0x15a4   :  { %2155 = vmatprep.subr.mxu0 %v4197_v6 }
0x15a5   :  { %2156 = vmatpush1.msra.mxu0 %v4200_v60 }
0x15a6   :  { %2441 = vmatprep.subr.mxu0 %v4155_v17 }
0x15dc   :  { %v1489_v0 = vpop.permute.xlu0 %1488 }
0x15dd   :  { %1492 = vst.msk [vmem:[#allocation3 + $0x38] sm:$0xff] %vm128_vm0, %v1489_v0  ;;  %1494 = vst.msk [vmem:[#allocation11] sm:$0xff] %vm128_vm0, %v1489_v0 }
0x15e4   :  { %v1504_v51 = vld [vmem:[#allocation3 + $0x38] sm:$0xff] }
0x15e5   :  { %v1508_v27 = vpack.c.bf16 %v1504_v51, %v1503_v26 }
0x15e7   :  { %3143 = vmatmul.mubr.msk.bf16.gmra.mxu1 %vm128_vm0, %v1508_v27 }
0x15e8   :  { %2039 = vmatprep.mubr.f32.mxu1 %v3594_v1 }
0x1636   :  { %v1596_v63 = vpop.f32.mrf.mxu0 }
0x1637   :  { %v1702_v38 = vadd.f32 %v1701_v28, %v1596_v63 }
0x1638   :  { %v1598_v54 = vpop.f32.mrf.mxu0 }
0x1639   :  { %v4285_v62 = vadd.f32 %v4278_v35, %v1702_v38  ;;  %v1704_v58 = vadd.f32 %v1703_v29, %v1598_v54 }
0x163a   :  { %v1600_v7 = vpop.f32.mrf.mxu0 }
0x163b   :  { %1768 = vst [vmem:[#allocation2] sm:$0xff] %v4285_v62  ;;  %v1753_v18 = vadd.f32 %v4282_v61, %v1704_v58  ;;  %v1706_v13 = vadd.f32 %v1705_v22, %v1600_v7  ;;  %v1727_v22 = vpop.f32.mrf.mxu1  ;;  %v4316_v58 = vpop.permute.xlu1 %1900 }
0x163c   :  { %v1602_v36 = vpop.f32.mrf.mxu0 }
0x163d   :  { %1769 = vst.msk [vmem:[#allocation2 + $0x8] sm:$0xff] %vm215_vm1, %v1753_v18  ;;  %v4291_v40 = vadd.f32 %v4278_v35, %v1706_v13  ;;  %v1708_v44 = vadd.f32 %v1707_v8, %v1602_v36 }
0x163e   :  { %v1606_v30 = vpop.f32.mrf.mxu0 }
0x163f   :  { %1770 = vst [vmem:[#allocation2 + $0x10] sm:$0xff] %v4291_v40  ;;  %v1755_v46 = vadd.f32 %v4282_v61, %v1708_v44  ;;  %v1712_v31 = vadd.f32 %v1711_v33, %v1606_v30 }
0x1640   :  { %v1608_v25 = vpop.f32.mrf.mxu0 }
0x1641   :  { %1771 = vst.msk [vmem:[#allocation2 + $0x18] sm:$0xff] %vm215_vm1, %v1755_v46  ;;  %v4297_v32 = vadd.f32 %v4278_v35, %v1712_v31  ;;  %v1714_v10 = vadd.f32 %v1713_v23, %v1608_v25 }
0x1642   :  { %v1610_v49 = vpop.f32.mrf.mxu0 }
0x1643   :  { %v1757_v53 = vadd.f32 %v4282_v61, %v1714_v10  ;;  %v1716_v11 = vadd.f32 %v1715_v3, %v1610_v49 }
0x1644   :  { %v1612_v34 = vpop.f32.mrf.mxu0 }
0x1645   :  { %1773 = vst.msk [vmem:[#allocation2 + $0x28] sm:$0xff] %vm215_vm1, %v1757_v53  ;;  %v4302_v14 = vadd.f32 %v4278_v35, %v1716_v11  ;;  %v1718_v15 = vadd.f32 %v1717_v41, %v1612_v34 }
0x1646   :  { %v1616_v20 = vpop.f32.mrf.mxu0 }
0x1647   :  { %v1759_v16 = vadd.f32 %v4282_v61, %v1718_v15  ;;  %v1722_v21 = vadd.f32 %v1721_v4, %v1616_v20 }
0x1648   :  { %v1618_v0 = vpop.f32.mrf.mxu0 }
0x1649   :  { %1775 = vst.msk [vmem:[#allocation2 + $0x38] sm:$0xff] %vm215_vm1, %v1759_v16  ;;  %v4307_v26 = vadd.f32 %v4278_v35, %v1722_v21  ;;  %v1724_v51 = vadd.f32 %v1723_v12, %v1618_v0 }
0x164a   :  { %v1620_v27 = vpop.f32.mrf.mxu0 }
0x164b   :  { %v1761_v28 = vadd.f32 %v4282_v61, %v1724_v51  ;;  %v1726_v29 = vadd.f32 %v1725_v24, %v1620_v27 }
0x164c   :  { %v1622_v8 = vpop.f32.mrf.mxu0 }
0x164d   :  { %1777 = vst.msk [vmem:[#allocation2 + $0x48] sm:$0xff] %vm215_vm1, %v1761_v28  ;;  %v4312_v33 = vadd.f32 %v4278_v35, %v1726_v29  ;;  %v1728_v9 = vadd.f32 %v1727_v22, %v1622_v8 }
0x164e   :  { %v1626_v23 = vpop.f32.mrf.mxu0 }
0x164f   :  { %v1763_v63 = vadd.f32 %v4282_v61, %v1728_v9 }
0x1650   :  { %v1628_v38 = vpop.f32.mrf.mxu0 }
0x1651   :  { %1779 = vst.msk [vmem:[#allocation2 + $0x58] sm:$0xff] %vm215_vm1, %v1763_v63 }
0x1652   :  { %v1630_v3 = vpop.f32.mrf.mxu0 }
0x1654   :  { %v1632_v54 = vpop.f32.mrf.mxu0 }
0x1656   :  { %v1885_v7 = vpop.f32.mrf.mxu0 }
0x1657   :  { %v1903_v18 = vadd.f32 %v4316_v58, %v1885_v7  ;;  %v1893_v36 = vadd.f32 %v1885_v7, %v4285_v62 }
0x1658   :  { %v1887_v13 = vpop.f32.mrf.mxu0 }
0x1659   :  { %1905 = vrot.lane.b32.xlu0 %v1903_v18, %s3596_s29  ;;  %v1941_v41 = vadd.f32 %v4209_v5, %v1887_v13  ;;  %v3148_v44 = vmul.f32 -1.442695, %v1893_v36 }
0x165b   :  { %1943 = vrot.lane.b32.xlu1 %v1941_v41, %s3596_s29  ;;  %3345 = vpow2.f32 %v3148_v44 }
0x1668   :  { %v3346_v21 = vpop.eup %3345 }
0x1669   :  { %v1897_v24 = vadd.f32 1.0, %v3346_v21 }
0x16a7   :  { %v1731_v30 = vpop.f32.mrf.mxu1 }
0x16a8   :  { %v1732_v46 = vadd.f32 %v1731_v30, %v1626_v23 }
0x16a9   :  { %v1733_v31 = vpop.f32.mrf.mxu1 }
0x16aa   :  { %v4324_v4 = vadd.f32 %v4278_v35, %v1732_v46  ;;  %v1734_v25 = vadd.f32 %v1733_v31, %v1628_v38 }
0x16ab   :  { %v1735_v10 = vpop.f32.mrf.mxu1 }
0x16ac   :  { %v1765_v49 = vadd.f32 %v4282_v61, %v1734_v25  ;;  %v1736_v53 = vadd.f32 %v1735_v10, %v1630_v3 }
0x16ad   :  { %v1737_v11 = vpop.f32.mrf.mxu1 }
0x16ae   :  { %1781 = vst.msk [vmem:[#allocation2 + $0x68] sm:$0xff] %vm215_vm1, %v1765_v49  ;;  %v1766_v12 = vadd.f32 %v4278_v35, %v1736_v53  ;;  %v1738_v34 = vadd.f32 %v1737_v11, %v1632_v54 }
0x16b0   :  { %1782 = vst [vmem:[#allocation2 + $0x70] sm:$0xff] %v1766_v12  ;;  %v1767_v15 = vadd.f32 %v4282_v61, %v1738_v34  ;;  %v1927_v20 = vadd.f32 %v1885_v7, %v1766_v12 }
0x16b2   :  { %1783 = vst.msk [vmem:[#allocation2 + $0x78] sm:$0xff] %vm215_vm1, %v1767_v15  ;;  %v3149_v16 = vmul.f32 -1.442695, %v1927_v20 }
0x16b4   :  { %3347 = vpow2.f32 %v3149_v16 }
0x16b5   :  { %3349 = vrcp.f32 %v1897_v24 }
0x16b9   :  { %v1892_v63 = vld [vmem:[#allocation2 + $0x78] sm:$0xff] }
0x16ba   :  { %v1928_v7 = vadd.f32 %v1892_v63, %v1887_v13 }
0x16bc   :  { %v3150_v18 = vmul.f32 -1.442695, %v1928_v7  ;;  %v2048_v7 = vld [vmem:[#allocation2 + $0x68] sm:$0xff] }
0x16c1   :  { %v3348_v0 = vpop.eup %3347 }
0x16c2   :  { %v1935_v51 = vadd.f32 1.0, %v3348_v0  ;;  %v3350_v27 = vpop.eup %3349 }
0x16c3   :  { %v1915_v44 = vsub.f32 1.0, %v3350_v27 }
0x16c4   :  { %3351 = vrcp.f32 %v1935_v51 }
0x16cb   :  { %v1906_v28 = vpop.permute.xlu0 %1905 }
0x16cc   :  { %v1908_v29 = vmul.f32 %v3350_v27, %v1906_v28 }
0x16cd   :  { %v1944_v22 = vpop.permute.xlu1 %1943 }
0x16ce   :  { %1910 = vrot.lane.b32.xlu0 %v1908_v29, %s3596_s29 }
0x16d1   :  { %v3352_v35 = vpop.eup %3351 }
0x16d2   :  { %v1946_v8 = vmul.f32 %v3352_v35, %v1944_v22 }
0x16d4   :  { %1948 = vrot.lane.b32.xlu1 %v1946_v8, %s3596_s29 }
0x16d8   :  { %1922 = vrot.lane.b32.xlu1 %v4247_v19, %s3595_s17 }
0x1740   :  { %v1911_v61 = vpop.permute.xlu0 %1910 }
0x1741   :  { %v1913_v9 = vadd.f32 %v1911_v61, %v4285_v62 }
0x1743   :  { %3353 = vtanh.f32 %v1913_v9 }
0x1746   :  { %v1949_v23 = vpop.permute.xlu1 %1948 }
0x1747   :  { %v1951_v38 = vadd.f32 %v1949_v23, %v1892_v63 }
0x1749   :  { %3355 = vtanh.f32 %v1951_v38 }
0x174a   :  { %3357 = vpow2.f32 %v3150_v18  ;;  %v1923_v19 = vpop.permute.xlu1 %1922 }
0x174b   :  { %v1925_v30 = vmul.f32 %v3350_v27, %v1923_v19 }
0x1750   :  { %v3354_v3 = vpop.eup %3353 }
0x1751   :  { %1917 = vrot.lane.b32.xlu0 %v3354_v3, %s3597_s4 }
0x1756   :  { %v3356_v54 = vpop.eup %3355 }
0x1757   :  { %1955 = vrot.lane.b32.xlu0 %v3356_v54, %s3597_s4  ;;  %v3358_v41 = vpop.eup %3357 }
0x1758   :  { %v1936_v36 = vadd.f32 1.0, %v3358_v41 }
0x175a   :  { %3359 = vrcp.f32 %v1936_v36 }
0x1767   :  { %v3360_v31 = vpop.eup %3359 }
0x1768   :  { %v1953_v10 = vsub.f32 1.0, %v3360_v31  ;;  %v1959_v13 = vmul.f32 %v3360_v31, %v4150_v39 }
0x17c3   :  { %v1918_v62 = vpop.permute.xlu0 %1917 }
0x17c4   :  { %v1920_v46 = vmul.f32 %v1918_v62, %v1915_v44 }
0x17c6   :  { %v4338_v25 = vadd.f32 %v1925_v30, %v1920_v46 }
0x17c8   :  { %1962 = vrot.lane.b32.xlu1 %v4338_v25, %s3597_s4 }
0x17c9   :  { %v1956_v49 = vpop.permute.xlu0 %1955 }
0x17ca   :  { %v1958_v53 = vmul.f32 %v1956_v49, %v1953_v10 }
0x17cc   :  { %v4343_v11 = vadd.f32 %v1959_v13, %v1958_v53 }
0x17ce   :  { %1966 = vst.msk [vmem:[#allocation4 + $0x38] sm:$0xff] %vm128_vm0, %v4343_v11  ;;  %1968 = vrot.lane.b32.xlu0 %v4343_v11, %s3595_s17 }
0x183a   :  { %v1963_v12 = vpop.permute.xlu1 %1962 }
0x183b   :  { %1965 = vst.msk [vmem:[%s4691_s10] sm:$0xff] %vm128_vm0, %v1963_v12 }
0x1840   :  { %v1969_v34 = vpop.permute.xlu0 %1968 }
0x1841   :  { %v1971_v15 = vsel %vm128_vm0, %v1963_v12, %v1969_v34 }
0x1842   :  { %3151 = vmatmul.mubr.msk.f32.vlgmr.msra.gmra.mxu1 %vm215_vm1, %v1971_v15 }
0x1843   :  { %2292 = vmatpush1.msra.mxu1 %v4158_v42  ;;  %2339 = vmatprep.mubr.f32.mxu1 %v3594_v1 }
0x1844   :  { %2293 = vmatprep.subr.mxu1 %v4161_v43 }
0x1845   :  { %2294 = vmatpush1.msra.mxu1 %v4164_v55 }
0x1846   :  { %2295 = vmatprep.subr.mxu1 %v4168_v59 }
0x1847   :  { %2296 = vmatpush1.msra.mxu1 %v4170_v45 }
0x1848   :  { %2297 = vmatprep.subr.mxu1 %v4173_v47 }
0x1849   :  { %2298 = vmatpush1.msra.mxu1 %v4176_v48 }
0x184a   :  { %2299 = vmatprep.subr.mxu1 %v4180_v2 }
0x184b   :  { %2300 = vmatpush1.msra.mxu1 %v4182_v50 }
0x184c   :  { %2301 = vmatprep.subr.mxu1 %v4185_v56 }
0x184d   :  { %2302 = vmatpush1.msra.mxu1 %v4188_v57 }
0x184e   :  { %2303 = vmatprep.subr.mxu1 %v4191_v37 }
0x184f   :  { %2304 = vmatpush1.msra.mxu1 %v4194_v52 }
0x1850   :  { %2305 = vmatprep.subr.mxu1 %v4197_v6 }
0x1851   :  { %2306 = vmatpush1.msra.mxu1 %v4200_v60 }
0x1852   :  { %2591 = vmatprep.subr.mxu1 %v4155_v17 }
0x1902   :  { %v2041_v39 = vpop.f32.mrf.mxu1 }
0x1903   :  { %v2056_v20 = vadd.f32 %v2041_v39, %v4316_v58  ;;  %v2049_v24 = vadd.f32 %v2041_v39, %v4291_v40  ;;  %v2076_v0 = vadd.f32 %v2041_v39, %v4324_v4 }
0x1904   :  { %v2043_v16 = vpop.f32.mrf.mxu1 }
0x1905   :  { %v2090_v21 = vadd.f32 %v4209_v5, %v2043_v16  ;;  %2058 = vrot.lane.b32.xlu1 %v2056_v20, %s3596_s29  ;;  %v3152_v51 = vmul.f32 -1.442695, %v2049_v24  ;;  %v3153_v27 = vmul.f32 -1.442695, %v2076_v0  ;;  %v2077_v44 = vadd.f32 %v2048_v7, %v2043_v16 }
0x1907   :  { %2092 = vrot.lane.b32.xlu0 %v2090_v21, %s3596_s29  ;;  %3361 = vpow2.f32 %v3152_v51  ;;  %v3154_v62 = vmul.f32 -1.442695, %v2077_v44 }
0x1908   :  { %3363 = vpow2.f32 %v3153_v27 }
0x1914   :  { %v3362_v28 = vpop.eup %3361 }
0x1915   :  { %v3364_v29 = vpop.eup %3363  ;;  %v2053_v35 = vadd.f32 1.0, %v3362_v28 }
0x1916   :  { %v2084_v22 = vadd.f32 1.0, %v3364_v29 }
0x1917   :  { %3365 = vrcp.f32 %v2053_v35 }
0x1918   :  { %3367 = vrcp.f32 %v2084_v22 }
0x1924   :  { %v3366_v8 = vpop.eup %3365 }
0x1925   :  { %v3368_v23 = vpop.eup %3367  ;;  %v2068_v10 = vsub.f32 1.0, %v3366_v8  ;;  %v2074_v49 = vmul.f32 %v3366_v8, %v4338_v25 }
0x1977   :  { %v2059_v61 = vpop.permute.xlu1 %2058 }
0x1978   :  { %v2061_v9 = vmul.f32 %v3366_v8, %v2059_v61 }
0x1979   :  { %v2093_v63 = vpop.permute.xlu0 %2092 }
0x197a   :  { %v2095_v38 = vmul.f32 %v3368_v23, %v2093_v63  ;;  %2063 = vrot.lane.b32.xlu1 %v2061_v9, %s3596_s29 }
0x197c   :  { %2097 = vrot.lane.b32.xlu0 %v2095_v38, %s3596_s29 }
0x19ec   :  { %v2064_v3 = vpop.permute.xlu1 %2063 }
0x19ed   :  { %v2066_v54 = vadd.f32 %v2064_v3, %v4291_v40 }
0x19ee   :  { %v2098_v18 = vpop.permute.xlu0 %2097 }
0x19ef   :  { %3369 = vtanh.f32 %v2066_v54  ;;  %v2100_v41 = vadd.f32 %v2098_v18, %v2048_v7 }
0x19f1   :  { %3371 = vtanh.f32 %v2100_v41 }
0x19f2   :  { %3373 = vpow2.f32 %v3154_v62 }
0x19fc   :  { %v3370_v36 = vpop.eup %3369 }
0x19fd   :  { %2070 = vrot.lane.b32.xlu1 %v3370_v36, %s3597_s4  ;;  %v2198_v36 = vld [vmem:[#allocation2 + $0x58] sm:$0xff] }
0x19fe   :  { %v3372_v19 = vpop.eup %3371 }
0x19ff   :  { %2104 = vrot.lane.b32.xlu0 %v3372_v19, %s3597_s4  ;;  %v3374_v30 = vpop.eup %3373 }
0x1a00   :  { %v2085_v46 = vadd.f32 1.0, %v3374_v30 }
0x1a02   :  { %3375 = vrcp.f32 %v2085_v46 }
0x1a0f   :  { %v3376_v31 = vpop.eup %3375 }
0x1a10   :  { %v2102_v13 = vsub.f32 1.0, %v3376_v31  ;;  %v2108_v39 = vmul.f32 %v3376_v31, %v4343_v11 }
0x1a6f   :  { %v2071_v40 = vpop.permute.xlu1 %2070 }
0x1a70   :  { %v2073_v53 = vmul.f32 %v2071_v40, %v2068_v10 }
0x1a71   :  { %v2105_v12 = vpop.permute.xlu0 %2104 }
0x1a72   :  { %v4384_v34 = vadd.f32 %v2074_v49, %v2073_v53  ;;  %v2107_v15 = vmul.f32 %v2105_v12, %v2102_v13 }
0x1a74   :  { %v4387_v20 = vadd.f32 %v2108_v39, %v2107_v15  ;;  %2111 = vrot.lane.b32.xlu1 %v4384_v34, %s3597_s4 }
0x1a76   :  { %2116 = vst.msk [vmem:[#allocation4 + $0x30] sm:$0xff] %vm128_vm0, %v4387_v20  ;;  %2118 = vrot.lane.b32.xlu0 %v4387_v20, %s3595_s17 }
0x1ae6   :  { %v2112_v25 = vpop.permute.xlu1 %2111 }
0x1ae7   :  { %3155 = vst.msk [vmem:[%s4691_s10 + $0x8] sm:$0xff] %vm128_vm0, %v2112_v25 }
0x1ae8   :  { %v2119_v16 = vpop.permute.xlu0 %2118 }
0x1ae9   :  { %v2121_v11 = vsel %vm128_vm0, %v2112_v25, %v2119_v16 }
0x1aea   :  { %3156 = vmatmul.mubr.msk.f32.vlgmr.msra.gmra.mxu0 %vm215_vm1, %v2121_v11 }
0x1aeb   :  { %2442 = vmatpush1.msra.mxu0 %v4158_v42  ;;  %2489 = vmatprep.mubr.f32.mxu0 %v3594_v1 }
0x1aec   :  { %2443 = vmatprep.subr.mxu0 %v4161_v43 }
0x1aed   :  { %2444 = vmatpush1.msra.mxu0 %v4164_v55 }
0x1aee   :  { %2445 = vmatprep.subr.mxu0 %v4168_v59 }
0x1aef   :  { %2446 = vmatpush1.msra.mxu0 %v4170_v45 }
0x1af0   :  { %2447 = vmatprep.subr.mxu0 %v4173_v47 }
0x1af1   :  { %2448 = vmatpush1.msra.mxu0 %v4176_v48 }
0x1af2   :  { %2449 = vmatprep.subr.mxu0 %v4180_v2 }
0x1af3   :  { %2450 = vmatpush1.msra.mxu0 %v4182_v50 }
0x1af4   :  { %2451 = vmatprep.subr.mxu0 %v4185_v56 }
0x1af5   :  { %2452 = vmatpush1.msra.mxu0 %v4188_v57 }
0x1af6   :  { %2453 = vmatprep.subr.mxu0 %v4191_v37 }
0x1af7   :  { %2454 = vmatpush1.msra.mxu0 %v4194_v52 }
0x1af8   :  { %2455 = vmatprep.subr.mxu0 %v4197_v6 }
0x1af9   :  { %2456 = vmatpush1.msra.mxu0 %v4200_v60 }
0x1afa   :  { %2741 = vmatprep.subr.mxu0 %v4155_v17 }
0x1baa   :  { %v2191_v21 = vpop.f32.mrf.mxu0 }
0x1bab   :  { %v2206_v24 = vadd.f32 %v2191_v21, %v4316_v58  ;;  %v2199_v27 = vadd.f32 %v2191_v21, %v4297_v32  ;;  %v2226_v28 = vadd.f32 %v2191_v21, %v4312_v33 }
0x1bac   :  { %v2193_v0 = vpop.f32.mrf.mxu0 }
0x1bad   :  { %v2240_v51 = vadd.f32 %v4209_v5, %v2193_v0  ;;  %2208 = vrot.lane.b32.xlu1 %v2206_v24, %s3596_s29  ;;  %v3157_v29 = vmul.f32 -1.442695, %v2199_v27  ;;  %v3158_v35 = vmul.f32 -1.442695, %v2226_v28  ;;  %v2227_v46 = vadd.f32 %v2198_v36, %v2193_v0 }
0x1baf   :  { %2242 = vrot.lane.b32.xlu0 %v2240_v51, %s3596_s29  ;;  %3377 = vpow2.f32 %v3157_v29  ;;  %v3159_v31 = vmul.f32 -1.442695, %v2227_v46 }
0x1bb0   :  { %3379 = vpow2.f32 %v3158_v35 }
0x1bbc   :  { %v3378_v22 = vpop.eup %3377 }
0x1bbd   :  { %v3380_v8 = vpop.eup %3379  ;;  %v2203_v61 = vadd.f32 1.0, %v3378_v22 }
0x1bbe   :  { %v2234_v9 = vadd.f32 1.0, %v3380_v8 }
0x1bbf   :  { %3381 = vrcp.f32 %v2203_v61 }
0x1bc0   :  { %3383 = vrcp.f32 %v2234_v9 }
0x1bcc   :  { %v3382_v23 = vpop.eup %3381 }
0x1bcd   :  { %v3384_v3 = vpop.eup %3383  ;;  %v2218_v53 = vsub.f32 1.0, %v3382_v23  ;;  %v2224_v12 = vmul.f32 %v3382_v23, %v4384_v34 }
0x1c1f   :  { %v2209_v63 = vpop.permute.xlu1 %2208 }
0x1c20   :  { %v2211_v38 = vmul.f32 %v3382_v23, %v2209_v63 }
0x1c21   :  { %v2243_v54 = vpop.permute.xlu0 %2242 }
0x1c22   :  { %v2245_v7 = vmul.f32 %v3384_v3, %v2243_v54  ;;  %2213 = vrot.lane.b32.xlu1 %v2211_v38, %s3596_s29 }
0x1c24   :  { %2247 = vrot.lane.b32.xlu0 %v2245_v7, %s3596_s29 }
0x1c94   :  { %v2214_v18 = vpop.permute.xlu1 %2213 }
0x1c95   :  { %v2216_v41 = vadd.f32 %v2214_v18, %v4297_v32 }
0x1c96   :  { %v2248_v19 = vpop.permute.xlu0 %2247 }
0x1c97   :  { %3385 = vtanh.f32 %v2216_v41  ;;  %v2250_v44 = vadd.f32 %v2248_v19, %v2198_v36 }
0x1c99   :  { %3387 = vtanh.f32 %v2250_v44  ;;  %v2348_v44 = vld [vmem:[#allocation2 + $0x48] sm:$0xff] }
0x1c9a   :  { %3389 = vpow2.f32 %v3159_v31 }
0x1ca4   :  { %v3386_v62 = vpop.eup %3385 }
0x1ca5   :  { %2220 = vrot.lane.b32.xlu1 %v3386_v62, %s3597_s4 }
0x1ca6   :  { %v3388_v30 = vpop.eup %3387 }
0x1ca7   :  { %2254 = vrot.lane.b32.xlu0 %v3388_v30, %s3597_s4  ;;  %v3390_v10 = vpop.eup %3389 }
0x1ca8   :  { %v2235_v40 = vadd.f32 1.0, %v3390_v10 }
0x1caa   :  { %3391 = vrcp.f32 %v2235_v40 }
0x1cb7   :  { %v3392_v49 = vpop.eup %3391 }
0x1cb8   :  { %v2252_v39 = vsub.f32 1.0, %v3392_v49  ;;  %v2258_v21 = vmul.f32 %v3392_v49, %v4387_v20 }
0x1d17   :  { %v2221_v13 = vpop.permute.xlu1 %2220 }
0x1d18   :  { %v2223_v15 = vmul.f32 %v2221_v13, %v2218_v53 }
0x1d19   :  { %v2255_v25 = vpop.permute.xlu0 %2254 }
0x1d1a   :  { %v4430_v16 = vadd.f32 %v2224_v12, %v2223_v15  ;;  %v2257_v11 = vmul.f32 %v2255_v25, %v2252_v39 }
0x1d1c   :  { %v4433_v24 = vadd.f32 %v2258_v21, %v2257_v11  ;;  %2261 = vrot.lane.b32.xlu1 %v4430_v16, %s3597_s4 }
0x1d1e   :  { %2266 = vst.msk [vmem:[#allocation4 + $0x28] sm:$0xff] %vm128_vm0, %v4433_v24  ;;  %2268 = vrot.lane.b32.xlu0 %v4433_v24, %s3595_s17 }
0x1d8e   :  { %v2262_v34 = vpop.permute.xlu1 %2261 }
0x1d8f   :  { %3160 = vst.msk [vmem:[%s4691_s10 + $0x10] sm:$0xff] %vm128_vm0, %v2262_v34 }
0x1d90   :  { %v2269_v0 = vpop.permute.xlu0 %2268 }
0x1d91   :  { %v2271_v20 = vsel %vm128_vm0, %v2262_v34, %v2269_v0 }
0x1d92   :  { %3161 = vmatmul.mubr.msk.f32.vlgmr.msra.gmra.mxu1 %vm215_vm1, %v2271_v20 }
0x1d93   :  { %2592 = vmatpush1.msra.mxu1 %v4158_v42  ;;  %2639 = vmatprep.mubr.f32.mxu1 %v3594_v1 }
0x1d94   :  { %2593 = vmatprep.subr.mxu1 %v4161_v43 }
0x1d95   :  { %2594 = vmatpush1.msra.mxu1 %v4164_v55 }
0x1d96   :  { %2595 = vmatprep.subr.mxu1 %v4168_v59 }
0x1d97   :  { %2596 = vmatpush1.msra.mxu1 %v4170_v45 }
0x1d98   :  { %2597 = vmatprep.subr.mxu1 %v4173_v47 }
0x1d99   :  { %2598 = vmatpush1.msra.mxu1 %v4176_v48 }
0x1d9a   :  { %2599 = vmatprep.subr.mxu1 %v4180_v2 }
0x1d9b   :  { %2600 = vmatpush1.msra.mxu1 %v4182_v50 }
0x1d9c   :  { %2601 = vmatprep.subr.mxu1 %v4185_v56 }
0x1d9d   :  { %2602 = vmatpush1.msra.mxu1 %v4188_v57 }
0x1d9e   :  { %2603 = vmatprep.subr.mxu1 %v4191_v37 }
0x1d9f   :  { %2604 = vmatpush1.msra.mxu1 %v4194_v52 }
0x1da0   :  { %2605 = vmatprep.subr.mxu1 %v4197_v6 }
0x1da1   :  { %2606 = vmatpush1.msra.mxu1 %v4200_v60 }
0x1da2   :  { %2891 = vmatprep.subr.mxu1 %v4155_v17 }
0x1e52   :  { %v2341_v51 = vpop.f32.mrf.mxu1 }
0x1e53   :  { %v2356_v27 = vadd.f32 %v2341_v51, %v4316_v58  ;;  %v2349_v35 = vadd.f32 %v2341_v51, %v4302_v14  ;;  %v2376_v22 = vadd.f32 %v2341_v51, %v4307_v26 }
0x1e54   :  { %v2343_v28 = vpop.f32.mrf.mxu1 }
0x1e55   :  { %v2390_v29 = vadd.f32 %v4209_v5, %v2343_v28  ;;  %2358 = vrot.lane.b32.xlu1 %v2356_v27, %s3596_s29  ;;  %v3162_v8 = vmul.f32 -1.442695, %v2349_v35  ;;  %v3163_v61 = vmul.f32 -1.442695, %v2376_v22  ;;  %v2377_v10 = vadd.f32 %v2348_v44, %v2343_v28  ;;  %v2498_v22 = vld [vmem:[#allocation2 + $0x38] sm:$0xff] }
0x1e57   :  { %2392 = vrot.lane.b32.xlu0 %v2390_v29, %s3596_s29  ;;  %3393 = vpow2.f32 %v3162_v8  ;;  %v3164_v40 = vmul.f32 -1.442695, %v2377_v10 }
0x1e58   :  { %3395 = vpow2.f32 %v3163_v61 }
0x1e64   :  { %v3394_v9 = vpop.eup %3393 }
0x1e65   :  { %v3396_v17 = vpop.eup %3395  ;;  %v2353_v23 = vadd.f32 1.0, %v3394_v9 }
0x1e66   :  { %v2384_v63 = vadd.f32 1.0, %v3396_v17 }
0x1e67   :  { %3397 = vrcp.f32 %v2353_v23 }
0x1e68   :  { %3399 = vrcp.f32 %v2384_v63 }
0x1e74   :  { %v3398_v38 = vpop.eup %3397 }
0x1e75   :  { %v3400_v7 = vpop.eup %3399  ;;  %v2368_v12 = vsub.f32 1.0, %v3398_v38  ;;  %v2374_v39 = vmul.f32 %v3398_v38, %v4430_v16 }
0x1ec7   :  { %v2359_v3 = vpop.permute.xlu1 %2358 }
0x1ec8   :  { %v2361_v54 = vmul.f32 %v3398_v38, %v2359_v3 }
0x1ec9   :  { %v2393_v18 = vpop.permute.xlu0 %2392 }
0x1eca   :  { %v2395_v41 = vmul.f32 %v3400_v7, %v2393_v18  ;;  %2363 = vrot.lane.b32.xlu1 %v2361_v54, %s3596_s29 }
0x1ecc   :  { %2397 = vrot.lane.b32.xlu0 %v2395_v41, %s3596_s29 }
0x1f3c   :  { %v2364_v36 = vpop.permute.xlu1 %2363 }
0x1f3d   :  { %v2366_v19 = vadd.f32 %v2364_v36, %v4302_v14 }
0x1f3e   :  { %v2398_v62 = vpop.permute.xlu0 %2397 }
0x1f3f   :  { %3401 = vtanh.f32 %v2366_v19  ;;  %v2400_v30 = vadd.f32 %v2398_v62, %v2348_v44 }
0x1f41   :  { %3403 = vtanh.f32 %v2400_v30 }
0x1f42   :  { %3405 = vpow2.f32 %v3164_v40 }
0x1f4c   :  { %v3402_v46 = vpop.eup %3401 }
0x1f4d   :  { %2370 = vrot.lane.b32.xlu1 %v3402_v46, %s3597_s4 }
0x1f4e   :  { %v3404_v31 = vpop.eup %3403 }
0x1f4f   :  { %2404 = vrot.lane.b32.xlu0 %v3404_v31, %s3597_s4  ;;  %v3406_v49 = vpop.eup %3405 }
0x1f50   :  { %v2385_v53 = vadd.f32 1.0, %v3406_v49 }
0x1f52   :  { %3407 = vrcp.f32 %v2385_v53 }
0x1f5f   :  { %v3408_v13 = vpop.eup %3407 }
0x1f60   :  { %v2402_v11 = vsub.f32 1.0, %v3408_v13  ;;  %v2408_v20 = vmul.f32 %v3408_v13, %v4433_v24 }
0x1fbf   :  { %v2371_v15 = vpop.permute.xlu1 %2370 }
0x1fc0   :  { %v2373_v25 = vmul.f32 %v2371_v15, %v2368_v12  ;;  %v3484_v12 = vld [vmem:[#allocation10 + $0x70] sm:$0xff]  ;;  %v3485_v15 = vld [vmem:[#allocation10 + $0x68] sm:$0xff] }
0x1fc1   :  { %v2405_v21 = vpop.permute.xlu0 %2404 }
0x1fc2   :  { %v4476_v34 = vadd.f32 %v2374_v39, %v2373_v25  ;;  %v2407_v0 = vmul.f32 %v2405_v21, %v2402_v11  ;;  %v3486_v39 = vld [vmem:[#allocation10 + $0x60] sm:$0xff]  ;;  %v3487_v21 = vld [vmem:[#allocation10 + $0x58] sm:$0xff] }
0x1fc4   :  { %v4479_v51 = vadd.f32 %v2408_v20, %v2407_v0  ;;  %2411 = vrot.lane.b32.xlu1 %v4476_v34, %s3597_s4  ;;  %v3488_v0 = vld [vmem:[#allocation10 + $0x50] sm:$0xff]  ;;  %v3489_v20 = vld [vmem:[#allocation10 + $0x48] sm:$0xff] }
0x1fc6   :  { %2416 = vst.msk [vmem:[#allocation4 + $0x20] sm:$0xff] %vm128_vm0, %v4479_v51  ;;  %2418 = vrot.lane.b32.xlu0 %v4479_v51, %s3595_s17 }
0x1fcd   :  { %v3033_v11 = vld [vmem:[#allocation4 + $0x20] sm:$0xff] }
0x2036   :  { %v2412_v16 = vpop.permute.xlu1 %2411 }
0x2037   :  { %3165 = vst.msk [vmem:[%s4691_s10 + $0x18] sm:$0xff] %vm128_vm0, %v2412_v16 }
0x2038   :  { %v2419_v27 = vpop.permute.xlu0 %2418 }
0x2039   :  { %v2421_v24 = vsel %vm128_vm0, %v2412_v16, %v2419_v27  ;;  %v3492_v16 = vld [vmem:[#allocation10 + $0x30] sm:$0xff]  ;;  %v3493_v27 = vld [vmem:[#allocation10 + $0x28] sm:$0xff] }
0x203a   :  { %3166 = vmatmul.mubr.msk.f32.vlgmr.msra.gmra.mxu0 %vm215_vm1, %v2421_v24  ;;  %v3494_v24 = vld [vmem:[#allocation10 + $0x20] sm:$0xff] }
0x203b   :  { %2742 = vmatpush1.msra.mxu0 %v4158_v42  ;;  %2789 = vmatprep.mubr.f32.mxu0 %v3594_v1 }
0x203c   :  { %2743 = vmatprep.subr.mxu0 %v4161_v43 }
0x203d   :  { %2744 = vmatpush1.msra.mxu0 %v4164_v55 }
0x203e   :  { %2745 = vmatprep.subr.mxu0 %v4168_v59  ;;  %v3024_v31 = vld [vmem:[%s4691_s10 + $0x18] sm:$0xff] }
0x203f   :  { %2746 = vmatpush1.msra.mxu0 %v4170_v45 }
0x2040   :  { %2747 = vmatprep.subr.mxu0 %v4173_v47 }
0x2041   :  { %2748 = vmatpush1.msra.mxu0 %v4176_v48 }
0x2042   :  { %2749 = vmatprep.subr.mxu0 %v4180_v2 }
0x2043   :  { %2750 = vmatpush1.msra.mxu0 %v4182_v50 }
0x2044   :  { %2751 = vmatprep.subr.mxu0 %v4185_v56 }
0x2045   :  { %2752 = vmatpush1.msra.mxu0 %v4188_v57 }
0x2046   :  { %2753 = vmatprep.subr.mxu0 %v4191_v37 }
0x2047   :  { %2754 = vmatpush1.msra.mxu0 %v4194_v52 }
0x2048   :  { %2755 = vmatprep.subr.mxu0 %v4197_v6 }
0x2049   :  { %2756 = vmatpush1.msra.mxu0 %v4200_v60 }
0x20fa   :  { %v2491_v42 = vpop.f32.mrf.mxu0 }
0x20fb   :  { %v2506_v43 = vadd.f32 %v2491_v42, %v4316_v58  ;;  %v2499_v45 = vadd.f32 %v2491_v42, %v4307_v26  ;;  %v2526_v47 = vadd.f32 %v2491_v42, %v4302_v14  ;;  %v3495_v42 = vld [vmem:[#allocation10 + $0x18] sm:$0xff] }
0x20fc   :  { %v2493_v55 = vpop.f32.mrf.mxu0 }
0x20fd   :  { %v2540_v59 = vadd.f32 %v4209_v5, %v2493_v55  ;;  %2508 = vrot.lane.b32.xlu1 %v2506_v43, %s3596_s29  ;;  %v3167_v48 = vmul.f32 -1.442695, %v2499_v45  ;;  %v3168_v2 = vmul.f32 -1.442695, %v2526_v47  ;;  %v2527_v23 = vadd.f32 %v2498_v22, %v2493_v55  ;;  %v3496_v43 = vld [vmem:[#allocation10 + $0x10] sm:$0xff]  ;;  %v3497_v55 = vld [vmem:[#allocation10 + $0x8] sm:$0xff] }
0x20ff   :  { %2542 = vrot.lane.b32.xlu0 %v2540_v59, %s3596_s29  ;;  %3409 = vpow2.f32 %v3167_v48  ;;  %v3169_v63 = vmul.f32 -1.442695, %v2527_v23  ;;  %v3498_v59 = vld [vmem:[#allocation10] sm:$0xff] }
0x2100   :  { %3411 = vpow2.f32 %v3168_v2  ;;  %v4557_v2 = vld [vmem:[%s4690_s9] ss:$0 sm:$0xff] }
0x210c   :  { %v3410_v50 = vpop.eup %3409 }
0x210d   :  { %v3412_v56 = vpop.eup %3411  ;;  %v2503_v57 = vadd.f32 1.0, %v3410_v50 }
0x210e   :  { %v2534_v37 = vadd.f32 1.0, %v3412_v56 }
0x210f   :  { %3413 = vrcp.f32 %v2503_v57 }
0x2110   :  { %3415 = vrcp.f32 %v2534_v37 }
0x211c   :  { %v3414_v52 = vpop.eup %3413 }
0x211d   :  { %v3416_v5 = vpop.eup %3415  ;;  %v2518_v7 = vsub.f32 1.0, %v3414_v52  ;;  %v2524_v18 = vmul.f32 %v3414_v52, %v4476_v34 }
0x216f   :  { %v2509_v6 = vpop.permute.xlu1 %2508 }
0x2170   :  { %v2511_v60 = vmul.f32 %v3414_v52, %v2509_v6 }
0x2171   :  { %v2543_v28 = vpop.permute.xlu0 %2542 }
0x2172   :  { %v2545_v29 = vmul.f32 %v3416_v5, %v2543_v28  ;;  %2513 = vrot.lane.b32.xlu1 %v2511_v60, %s3596_s29 }
0x2174   :  { %2547 = vrot.lane.b32.xlu0 %v2545_v29, %s3596_s29 }
0x21e4   :  { %v2514_v14 = vpop.permute.xlu1 %2513 }
0x21e5   :  { %v2516_v35 = vadd.f32 %v2514_v14, %v4307_v26 }
0x21e6   :  { %v2548_v8 = vpop.permute.xlu0 %2547 }
0x21e7   :  { %3417 = vtanh.f32 %v2516_v35  ;;  %v2550_v61 = vadd.f32 %v2548_v8, %v2498_v22 }
0x21e9   :  { %3419 = vtanh.f32 %v2550_v61 }
0x21ea   :  { %3421 = vpow2.f32 %v3169_v63 }
0x21f4   :  { %v3418_v9 = vpop.eup %3417 }
0x21f5   :  { %2520 = vrot.lane.b32.xlu1 %v3418_v9, %s3597_s4 }
0x21f6   :  { %v3420_v17 = vpop.eup %3419 }
0x21f7   :  { %2554 = vrot.lane.b32.xlu0 %v3420_v17, %s3597_s4  ;;  %v3422_v38 = vpop.eup %3421  ;;  %v2648_v17 = vld [vmem:[#allocation2 + $0x28] sm:$0xff] }
0x21f8   :  { %v2535_v3 = vadd.f32 1.0, %v3422_v38 }
0x21fa   :  { %3423 = vrcp.f32 %v2535_v3 }
0x2207   :  { %v3424_v54 = vpop.eup %3423 }
0x2208   :  { %v2552_v36 = vsub.f32 1.0, %v3424_v54  ;;  %v2558_v30 = vmul.f32 %v3424_v54, %v4479_v51  ;;  %v3491_v51 = vld [vmem:[#allocation10 + $0x38] sm:$0xff] }
0x2267   :  { %v2521_v26 = vpop.permute.xlu1 %2520 }
0x2268   :  { %v2523_v41 = vmul.f32 %v2521_v26, %v2518_v7 }
0x2269   :  { %v2555_v19 = vpop.permute.xlu0 %2554 }
0x226a   :  { %v4521_v44 = vadd.f32 %v2524_v18, %v2523_v41  ;;  %v2557_v62 = vmul.f32 %v2555_v19, %v2552_v36 }
0x226c   :  { %v4524_v46 = vadd.f32 %v2558_v30, %v2557_v62  ;;  %2561 = vrot.lane.b32.xlu1 %v4521_v44, %s3597_s4 }
0x226e   :  { %2566 = vst.msk [vmem:[#allocation4 + $0x18] sm:$0xff] %vm128_vm0, %v4524_v46  ;;  %2568 = vrot.lane.b32.xlu0 %v4524_v46, %s3595_s17 }
0x2275   :  { %v3032_v10 = vld [vmem:[#allocation4 + $0x18] sm:$0xff] }
0x2276   :  { %v3040_v40 = vadd.f32 %v3032_v10, %v3024_v31 }
0x2278   :  { %3048 = vst.msk [vmem:[%s4691_s10 + $0x18] sm:$0xff] %vm128_vm0, %v3040_v40 }
0x22de   :  { %v2562_v49 = vpop.permute.xlu1 %2561 }
0x22df   :  { %3170 = vst.msk [vmem:[%s4691_s10 + $0x20] sm:$0xff] %vm128_vm0, %v2562_v49 }
0x22e0   :  { %v2569_v53 = vpop.permute.xlu0 %2568 }
0x22e1   :  { %v2571_v13 = vsel %vm128_vm0, %v2562_v49, %v2569_v53 }
0x22e2   :  { %3171 = vmatmul.mubr.msk.f32.vlgmr.msra.gmra.mxu1 %vm215_vm1, %v2571_v13 }
0x22e3   :  { %2892 = vmatpush1.msra.mxu1 %v3484_v12  ;;  %2939 = vmatprep.mubr.f32.mxu1 %v3594_v1  ;;  %v3490_v1 = vld [vmem:[#allocation10 + $0x40] sm:$0xff] }
0x22e4   :  { %2893 = vmatprep.subr.mxu1 %v3485_v15 }
0x22e5   :  { %2894 = vmatpush1.msra.mxu1 %v3486_v39 }
0x22e6   :  { %v3025_v25 = vld [vmem:[%s4691_s10 + $0x20] sm:$0xff]  ;;  %2895 = vmatprep.subr.mxu1 %v3487_v21 }
0x22e7   :  { %v3041_v34 = vadd.f32 %v3033_v11, %v3025_v25  ;;  %2896 = vmatpush1.msra.mxu1 %v3488_v0  ;;  %v3034_v11 = vld [vmem:[#allocation4 + $0x28] sm:$0xff] }
0x22e8   :  { %2897 = vmatprep.subr.mxu1 %v3489_v20 }
0x22e9   :  { %3049 = vst.msk [vmem:[%s4691_s10 + $0x20] sm:$0xff] %vm128_vm0, %v3041_v34  ;;  %2898 = vmatpush1.msra.mxu1 %v3490_v1 }
0x22ea   :  { %2899 = vmatprep.subr.mxu1 %v3491_v51 }
0x22eb   :  { %2900 = vmatpush1.msra.mxu1 %v3492_v16  ;;  %v2797_v16 = vld [vmem:[#allocation2 + $0x10] sm:$0xff] }
0x22ec   :  { %2901 = vmatprep.subr.mxu1 %v3493_v27 }
0x22ed   :  { %2902 = vmatpush1.msra.mxu1 %v3494_v24 }
0x22ee   :  { %2903 = vmatprep.subr.mxu1 %v3495_v42 }
0x22ef   :  { %2904 = vmatpush1.msra.mxu1 %v3496_v43 }
0x22f0   :  { %2905 = vmatprep.subr.mxu1 %v3497_v55 }
0x22f1   :  { %2906 = vmatpush1.msra.mxu1 %v3498_v59 }
0x23a2   :  { %v2641_v45 = vpop.f32.mrf.mxu1 }
0x23a3   :  { %v2656_v47 = vadd.f32 %v2641_v45, %v4316_v58  ;;  %v2649_v56 = vadd.f32 %v2641_v45, %v4312_v33  ;;  %v2676_v57 = vadd.f32 %v2641_v45, %v4297_v32 }
0x23a4   :  { %v2643_v48 = vpop.f32.mrf.mxu1 }
0x23a5   :  { %v2690_v50 = vadd.f32 %v4557_v2, %v2643_v48  ;;  %2658 = vrot.lane.b32.xlu1 %v2656_v47, %s3596_s29  ;;  %v3172_v37 = vmul.f32 -1.442695, %v2649_v56  ;;  %v3173_v52 = vmul.f32 -1.442695, %v2676_v57  ;;  %v2677_v54 = vadd.f32 %v2648_v17, %v2643_v48 }
0x23a7   :  { %2692 = vrot.lane.b32.xlu0 %v2690_v50, %s3596_s29  ;;  %3425 = vpow2.f32 %v3172_v37  ;;  %v3174_v7 = vmul.f32 -1.442695, %v2677_v54 }
0x23a8   :  { %3427 = vpow2.f32 %v3173_v52 }
0x23b4   :  { %v3426_v6 = vpop.eup %3425 }
0x23b5   :  { %v3428_v60 = vpop.eup %3427  ;;  %v2653_v5 = vadd.f32 1.0, %v3426_v6 }
0x23b6   :  { %v2684_v28 = vadd.f32 1.0, %v3428_v60  ;;  %v2798_v60 = vld [vmem:[#allocation2 + $0x18] sm:$0xff] }
0x23b7   :  { %3429 = vrcp.f32 %v2653_v5 }
0x23b8   :  { %3431 = vrcp.f32 %v2684_v28 }
0x23c4   :  { %v3430_v29 = vpop.eup %3429 }
0x23c5   :  { %v3432_v22 = vpop.eup %3431  ;;  %v2668_v36 = vsub.f32 1.0, %v3430_v29  ;;  %v2674_v19 = vmul.f32 %v3430_v29, %v4521_v44  ;;  %v3023_v44 = vld [vmem:[%s4691_s10 + $0x10] sm:$0xff] }
0x2417   :  { %v2659_v14 = vpop.permute.xlu1 %2658 }
0x2418   :  { %v2661_v35 = vmul.f32 %v3430_v29, %v2659_v14 }
0x2419   :  { %v2693_v8 = vpop.permute.xlu0 %2692 }
0x241a   :  { %v2695_v61 = vmul.f32 %v3432_v22, %v2693_v8  ;;  %2663 = vrot.lane.b32.xlu1 %v2661_v35, %s3596_s29 }
0x241c   :  { %2697 = vrot.lane.b32.xlu0 %v2695_v61, %s3596_s29 }
0x248c   :  { %v2664_v32 = vpop.permute.xlu1 %2663 }
0x248d   :  { %v2666_v9 = vadd.f32 %v2664_v32, %v4312_v33 }
0x248e   :  { %v2698_v23 = vpop.permute.xlu0 %2697 }
0x248f   :  { %3433 = vtanh.f32 %v2666_v9  ;;  %v2700_v63 = vadd.f32 %v2698_v23, %v2648_v17 }
0x2491   :  { %3435 = vtanh.f32 %v2700_v63 }
0x2492   :  { %3437 = vpow2.f32 %v3174_v7 }
0x249c   :  { %v3434_v38 = vpop.eup %3433 }
0x249d   :  { %2670 = vrot.lane.b32.xlu1 %v3434_v38, %s3597_s4 }
0x249e   :  { %v3436_v3 = vpop.eup %3435 }
0x249f   :  { %2704 = vrot.lane.b32.xlu0 %v3436_v3, %s3597_s4  ;;  %v3438_v26 = vpop.eup %3437 }
0x24a0   :  { %v2685_v18 = vadd.f32 1.0, %v3438_v26 }
0x24a2   :  { %3439 = vrcp.f32 %v2685_v18  ;;  %v3022_v18 = vld [vmem:[%s4691_s10 + $0x8] sm:$0xff] }
0x24af   :  { %v3440_v41 = vpop.eup %3439 }
0x24b0   :  { %v2702_v30 = vsub.f32 1.0, %v3440_v41  ;;  %v2708_v49 = vmul.f32 %v3440_v41, %v4524_v46 }
0x250f   :  { %v2671_v33 = vpop.permute.xlu1 %2670 }
0x2510   :  { %v2673_v62 = vmul.f32 %v2671_v33, %v2668_v36 }
0x2511   :  { %v2705_v31 = vpop.permute.xlu0 %2704 }
0x2512   :  { %v4570_v10 = vadd.f32 %v2674_v19, %v2673_v62  ;;  %v2707_v40 = vmul.f32 %v2705_v31, %v2702_v30  ;;  %v3035_v31 = vld [vmem:[#allocation4 + $0x30] sm:$0xff] }
0x2514   :  { %v4573_v53 = vadd.f32 %v2708_v49, %v2707_v40  ;;  %2711 = vrot.lane.b32.xlu1 %v4570_v10, %s3597_s4 }
0x2516   :  { %2716 = vst.msk [vmem:[#allocation4 + $0x10] sm:$0xff] %vm128_vm0, %v4573_v53  ;;  %2718 = vrot.lane.b32.xlu0 %v4573_v53, %s3595_s17 }
0x251d   :  { %v3031_v13 = vld [vmem:[#allocation4 + $0x10] sm:$0xff] }
0x251e   :  { %v3039_v12 = vadd.f32 %v3031_v13, %v3023_v44  ;;  %v2946_v13 = vld [vmem:[#allocation2 + $0x70] sm:$0xff] }
0x2520   :  { %3047 = vst.msk [vmem:[%s4691_s10 + $0x10] sm:$0xff] %vm128_vm0, %v3039_v12 }
0x2586   :  { %v2712_v46 = vpop.permute.xlu1 %2711 }
0x2587   :  { %3175 = vst.msk [vmem:[%s4691_s10 + $0x28] sm:$0xff] %vm128_vm0, %v2712_v46 }
0x2588   :  { %v2719_v15 = vpop.permute.xlu0 %2718 }
0x2589   :  { %v2721_v39 = vsel %vm128_vm0, %v2712_v46, %v2719_v15  ;;  %v2947_v46 = vld [vmem:[#allocation2] sm:$0xff] }
0x258a   :  { %3176 = vmatmul.mubr.msk.f32.vlgmr.msra.gmra.mxu0 %vm215_vm1, %v2721_v39 }
0x258e   :  { %v3026_v25 = vld [vmem:[%s4691_s10 + $0x28] sm:$0xff] }
0x258f   :  { %v3042_v21 = vadd.f32 %v3034_v11, %v3026_v25 }
0x2591   :  { %3050 = vst.msk [vmem:[%s4691_s10 + $0x28] sm:$0xff] %vm128_vm0, %v3042_v21 }
0x264a   :  { %v2791_v34 = vpop.f32.mrf.mxu0 }
0x264b   :  { %v2806_v0 = vadd.f32 %v2791_v34, %v4316_v58  ;;  %v2799_v51 = vadd.f32 %v2791_v34, %v4324_v4  ;;  %v2826_v27 = vadd.f32 %v2797_v16, %v2791_v34 }
0x264c   :  { %v2793_v20 = vpop.f32.mrf.mxu0 }
0x264d   :  { %v2840_v1 = vadd.f32 %v4557_v2, %v2793_v20  ;;  %2808 = vrot.lane.b32.xlu1 %v2806_v0, %s3596_s29  ;;  %v3177_v24 = vmul.f32 -1.442695, %v2799_v51  ;;  %v3178_v42 = vmul.f32 -1.442695, %v2826_v27  ;;  %v2827_v35 = vadd.f32 %v2798_v60, %v2793_v20 }
0x264f   :  { %2842 = vrot.lane.b32.xlu0 %v2840_v1, %s3596_s29  ;;  %3441 = vpow2.f32 %v3177_v24  ;;  %v3179_v22 = vmul.f32 -1.442695, %v2827_v35 }
0x2650   :  { %3443 = vpow2.f32 %v3178_v42  ;;  %v2948_v42 = vld [vmem:[#allocation2 + $0x8] sm:$0xff] }
0x265c   :  { %v3442_v43 = vpop.eup %3441 }
0x265d   :  { %v3444_v55 = vpop.eup %3443  ;;  %v2803_v59 = vadd.f32 1.0, %v3442_v43 }
0x265e   :  { %v2834_v45 = vadd.f32 1.0, %v3444_v55 }
0x265f   :  { %3445 = vrcp.f32 %v2803_v59 }
0x2660   :  { %3447 = vrcp.f32 %v2834_v45 }
0x266c   :  { %v3446_v47 = vpop.eup %3445 }
0x266d   :  { %v3448_v56 = vpop.eup %3447  ;;  %v2818_v9 = vsub.f32 1.0, %v3446_v47  ;;  %v2824_v17 = vmul.f32 %v3446_v47, %v4570_v10 }
0x26bf   :  { %v2809_v48 = vpop.permute.xlu1 %2808 }
0x26c0   :  { %v2811_v50 = vmul.f32 %v3446_v47, %v2809_v48 }
0x26c1   :  { %v2843_v57 = vpop.permute.xlu0 %2842 }
0x26c2   :  { %v2845_v37 = vmul.f32 %v3448_v56, %v2843_v57  ;;  %2813 = vrot.lane.b32.xlu1 %v2811_v50, %s3596_s29 }
0x26c4   :  { %2847 = vrot.lane.b32.xlu0 %v2845_v37, %s3596_s29 }
0x2734   :  { %v2814_v52 = vpop.permute.xlu1 %2813 }
0x2735   :  { %v2816_v6 = vadd.f32 %v2814_v52, %v4324_v4 }
0x2736   :  { %v2848_v5 = vpop.permute.xlu0 %2847 }
0x2737   :  { %3449 = vtanh.f32 %v2816_v6  ;;  %v2850_v28 = vadd.f32 %v2848_v5, %v2798_v60 }
0x2739   :  { %3451 = vtanh.f32 %v2850_v28 }
0x273a   :  { %3453 = vpow2.f32 %v3179_v22 }
0x2744   :  { %v3450_v29 = vpop.eup %3449 }
0x2745   :  { %2820 = vrot.lane.b32.xlu1 %v3450_v29, %s3597_s4 }
0x2746   :  { %v3452_v14 = vpop.eup %3451 }
0x2747   :  { %2854 = vrot.lane.b32.xlu0 %v3452_v14, %s3597_s4  ;;  %v3454_v8 = vpop.eup %3453 }
0x2748   :  { %v2835_v61 = vadd.f32 1.0, %v3454_v8  ;;  %v3021_v8 = vld [vmem:[%s4691_s10] sm:$0xff] }
0x274a   :  { %3455 = vrcp.f32 %v2835_v61 }
0x2757   :  { %v3456_v32 = vpop.eup %3455 }
0x2758   :  { %v2852_v63 = vsub.f32 1.0, %v3456_v32  ;;  %v2858_v7 = vmul.f32 %v3456_v32, %v4573_v53 }
0x27b7   :  { %v2821_v4 = vpop.permute.xlu1 %2820 }
0x27b8   :  { %v2823_v23 = vmul.f32 %v2821_v4, %v2818_v9 }
0x27b9   :  { %v2855_v38 = vpop.permute.xlu0 %2854 }
0x27ba   :  { %v4612_v3 = vadd.f32 %v2824_v17, %v2823_v23  ;;  %v2857_v54 = vmul.f32 %v2855_v38, %v2852_v63 }
0x27bc   :  { %v4615_v26 = vadd.f32 %v2858_v7, %v2857_v54  ;;  %2861 = vrot.lane.b32.xlu1 %v4612_v3, %s3597_s4 }
0x27be   :  { %2866 = vst.msk [vmem:[#allocation4 + $0x8] sm:$0xff] %vm128_vm0, %v4615_v26  ;;  %2868 = vrot.lane.b32.xlu0 %v4615_v26, %s3595_s17 }
0x27c5   :  { %v3030_v41 = vld [vmem:[#allocation4 + $0x8] sm:$0xff] }
0x27c6   :  { %v3038_v36 = vadd.f32 %v3030_v41, %v3022_v18 }
0x27c8   :  { %3046 = vst.msk [vmem:[%s4691_s10 + $0x8] sm:$0xff] %vm128_vm0, %v3038_v36 }
0x282e   :  { %v2862_v33 = vpop.permute.xlu1 %2861 }
0x282f   :  { %3180 = vst.msk [vmem:[%s4691_s10 + $0x30] sm:$0xff] %vm128_vm0, %v2862_v33 }
0x2830   :  { %v2869_v19 = vpop.permute.xlu0 %2868 }
0x2831   :  { %v2871_v62 = vsel %vm128_vm0, %v2862_v33, %v2869_v19 }
0x2832   :  { %3181 = vmatmul.mubr.msk.f32.vlgmr.msra.gmra.mxu1 %vm215_vm1, %v2871_v62 }
0x2836   :  { %v3027_v30 = vld [vmem:[%s4691_s10 + $0x30] sm:$0xff] }
0x2837   :  { %v3043_v10 = vadd.f32 %v3035_v31, %v3027_v30 }
0x2839   :  { %3051 = vst.msk [vmem:[%s4691_s10 + $0x30] sm:$0xff] %vm128_vm0, %v3043_v10 }
0x28f2   :  { %v2941_v40 = vpop.f32.mrf.mxu1 }
0x28f3   :  { %v2956_v49 = vadd.f32 %v2941_v40, %v4316_v58  ;;  %v2949_v12 = vadd.f32 %v2946_v13, %v2941_v40  ;;  %v2976_v15 = vadd.f32 %v2947_v46, %v2941_v40 }
0x28f4   :  { %v2943_v53 = vpop.f32.mrf.mxu1 }
0x28f5   :  { %v2990_v44 = vadd.f32 %v4557_v2, %v2943_v53  ;;  %2958 = vrot.lane.b32.xlu1 %v2956_v49, %s3596_s29  ;;  %v3182_v39 = vmul.f32 -1.442695, %v2949_v12  ;;  %v3183_v25 = vmul.f32 -1.442695, %v2976_v15  ;;  %v2977_v47 = vadd.f32 %v2948_v42, %v2943_v53 }
0x28f7   :  { %2992 = vrot.lane.b32.xlu0 %v2990_v44, %s3596_s29  ;;  %3457 = vpow2.f32 %v3182_v39  ;;  %v3184_v48 = vmul.f32 -1.442695, %v2977_v47 }
0x28f8   :  { %3459 = vpow2.f32 %v3183_v25 }
0x2904   :  { %v3458_v11 = vpop.eup %3457 }
0x2905   :  { %v3460_v21 = vpop.eup %3459  ;;  %v2953_v34 = vadd.f32 1.0, %v3458_v11 }
0x2906   :  { %v2984_v0 = vadd.f32 1.0, %v3460_v21 }
0x2907   :  { %3461 = vrcp.f32 %v2953_v34 }
0x2908   :  { %3463 = vrcp.f32 %v2984_v0 }
0x2914   :  { %v3462_v58 = vpop.eup %3461 }
0x2915   :  { %v3464_v1 = vpop.eup %3463  ;;  %v2968_v37 = vsub.f32 1.0, %v3462_v58  ;;  %v2974_v6 = vmul.f32 %v3462_v58, %v4612_v3 }
0x2967   :  { %v2959_v2 = vpop.permute.xlu1 %2958 }
0x2968   :  { %v2961_v20 = vmul.f32 %v3462_v58, %v2959_v2 }
0x2969   :  { %v2993_v51 = vpop.permute.xlu0 %2992 }
0x296a   :  { %v2995_v16 = vmul.f32 %v3464_v1, %v2993_v51  ;;  %2963 = vrot.lane.b32.xlu1 %v2961_v20, %s3596_s29 }
0x296c   :  { %2997 = vrot.lane.b32.xlu0 %v2995_v16, %s3596_s29 }
0x29dc   :  { %v2964_v27 = vpop.permute.xlu1 %2963 }
0x29dd   :  { %v2966_v24 = vadd.f32 %v2964_v27, %v2946_v13 }
0x29de   :  { %v2998_v43 = vpop.permute.xlu0 %2997 }
0x29df   :  { %3465 = vtanh.f32 %v2966_v24  ;;  %v3000_v55 = vadd.f32 %v2998_v43, %v2948_v42 }
0x29e1   :  { %3467 = vtanh.f32 %v3000_v55 }
0x29e2   :  { %3469 = vpow2.f32 %v3184_v48 }
0x29ec   :  { %v3466_v59 = vpop.eup %3465 }
0x29ed   :  { %2970 = vrot.lane.b32.xlu1 %v3466_v59, %s3597_s4 }
0x29ee   :  { %v3468_v45 = vpop.eup %3467 }
0x29ef   :  { %3004 = vrot.lane.b32.xlu0 %v3468_v45, %s3597_s4  ;;  %v3470_v50 = vpop.eup %3469 }
0x29f0   :  { %v2985_v56 = vadd.f32 1.0, %v3470_v50 }
0x29f2   :  { %3471 = vrcp.f32 %v2985_v56 }
0x29ff   :  { %v3472_v57 = vpop.eup %3471 }
0x2a00   :  { %v3002_v5 = vsub.f32 1.0, %v3472_v57  ;;  %v3008_v35 = vmul.f32 %v3472_v57, %v4615_v26 }
0x2a5f   :  { %v2971_v52 = vpop.permute.xlu1 %2970 }
0x2a60   :  { %v2973_v60 = vmul.f32 %v2971_v52, %v2968_v37 }
0x2a61   :  { %v3005_v28 = vpop.permute.xlu0 %3004 }
0x2a62   :  { %v2975_v29 = vadd.f32 %v2974_v6, %v2973_v60  ;;  %v3007_v14 = vmul.f32 %v3005_v28, %v3002_v5 }
0x2a64   :  { %v3009_v22 = vadd.f32 %v3008_v35, %v3007_v14  ;;  %3011 = vrot.lane.b32.xlu1 %v2975_v29, %s3597_s4 }
0x2a66   :  { %3016 = vst.msk [vmem:[#allocation4] sm:$0xff] %vm128_vm0, %v3009_v22  ;;  %3020 = vst.msk [vmem:[#allocation11 + $0x18] sm:$0xff] %vm128_vm0, %v3009_v22 }
0x2a6d   :  { %v3029_v61 = vld [vmem:[#allocation4] sm:$0xff] }
0x2a6e   :  { %v3037_v32 = vadd.f32 %v3029_v61, %v3021_v8 }
0x2a70   :  { %3045 = vst.msk [vmem:[%s4691_s10] sm:$0xff] %vm128_vm0, %v3037_v32 }
0x2ad6   :  { %v3012_v9 = vpop.permute.xlu1 %3011 }
0x2ad7   :  { %3185 = vst.msk [vmem:[%s4691_s10 + $0x38] sm:$0xff] %vm128_vm0, %v3012_v9  ;;  %3018 = vst.msk [vmem:[#allocation11 + $0x10] sm:$0xff] %vm128_vm0, %v3012_v9 }
0x2ad8   :  { %3571 = shalt.err (!%p3568_p5)
}
0x2ad9   :  { %3066 = dma.vmem_to_hbm [thread:$0]  %s3061_s21, 512, %s4692_s11, [#allocation7], %s3590_s27, %s3590_s27, %s3591_s28   ;;  %v3036_v17 = vld [vmem:[#allocation4 + $0x38] sm:$0xff] }
0x2ade   :  { %v3028_v4 = vld [vmem:[%s4691_s10 + $0x38] sm:$0xff] }
0x2adf   :  { %v3044_v23 = vadd.f32 %v3036_v17, %v3028_v4 }
0x2ae1   :  { %3052 = vst.msk [vmem:[%s4691_s10 + $0x38] sm:$0xff] %vm128_vm0, %v3044_v23 }
0x2ae2   :  { %3584 = dma.done.wait [#allocation7], 512  }
0x2ae3   :  { %3585 = vsyncadd [#allocation7], 4294966784 }
0x2ae4   :  { %3072 = vsyncpa [#allocation6], 1 }
0x2ae5   :  { %3073 = vsyncpa [#allocation9], 1 }
0x2ae6   :  { %3074 = vsyncpa [#allocation7], 1 }

</bundles_post_ra>
